<compile_context>
chip_gen: v7x
topology: tpu7x:2x2x1
jax: 0.10.0
libtpu: 0.0.40
codegen_flags: <defaults>
</compile_context>

<pallas_src>
import functools
from math import exp

import numpy as np
import jax
import jax.numpy as jnp
from jax import lax
from jax.experimental import pallas as pl
from jax.experimental.pallas import tpu as pltpu


# ----------------------------- Gaussian window (host-side glue) -----------------------

def gaussian_1d(window_size: int, sigma: float = 1.5) -> np.ndarray:
    g = np.array(
        [exp(-((x - window_size // 2) ** 2) / float(2 * sigma ** 2)) for x in range(window_size)],
        dtype=np.float64,
    )
    return (g / g.sum()).astype(np.float32)


def banded_matrices(H: int, W: int, window_size: int, sigma: float = 1.5):
    """GH (OH, H), GW (W, OW) such that valid depthwise conv with outer(g,g) == GH @ X @ GW."""
    g = gaussian_1d(window_size, sigma)
    OH = H - window_size + 1
    OW = W - window_size + 1
    GH = np.zeros((OH, H), np.float32)   # column (vertical) pass, left-multiply
    for o in range(OH):
        GH[o, o:o + window_size] = g
    GW = np.zeros((W, OW), np.float32)   # row (horizontal) pass, right-multiply
    for o in range(OW):
        GW[o:o + window_size, o] = g
    return GH, GW


# ----------------------------------- Pallas kernel ------------------------------------

def _ssim_kernel(consts_ref, img1_ref, img2_ref, gh_ref, gw_ref, out_ref, *, bnc: int):
    # consts_ref : SMEM (2,)        f32  -> [C1, C2]
    # img1_ref   : VMEM (bnc, H, W) native dtype (one block of NC planes)
    # img2_ref   : VMEM (bnc, H, W) native dtype
    # gh_ref     : VMEM (OH, H)     f32  banded Gaussian (column pass)
    # gw_ref     : VMEM (W, OW)     f32  banded Gaussian (row pass)
    # out_ref    : VMEM (1, 8, 128) f32  lane-dense per-block partial SSIM sum
    C1 = consts_ref[0]
    C2 = consts_ref[1]

    img1 = img1_ref[...].astype(jnp.float32)
    img2 = img2_ref[...].astype(jnp.float32)
    gh = gh_ref[...]                      # (OH, H)
    gw = gw_ref[...]                      # (W, OW)

    _, H, W = img1.shape
    OH = gh.shape[0]
    OW = gw.shape[1]
    P = 5 * bnc

    hi = lax.Precision.HIGHEST            # explicit precision: full-f32 Gaussian sums

    # Fused 5-map stack: one MXU pass per direction instead of 10 small matmuls.
    stack = jnp.concatenate(
        [img1, img2, img1 * img1, img2 * img2, img1 * img2], axis=0)       # (P, H, W)

    # ---- Row (horizontal) pass ----
    if H % 8 == 0:
        # Free layout merge -> one tall 2-D matmul; GW stays weight-stationary in the MXU.
        t = jnp.dot(stack.reshape(P * H, W), gw,
                    preferred_element_type=jnp.float32,
                    precision=hi).reshape(P, H, OW)                         # (P, H, OW)
    else:
        # Fallback for non-8-aligned H (reshape would not be a free layout merge).
        gw_b = jnp.broadcast_to(gw[None, :, :], (P, W, OW))
        t = jnp.einsum('phw,pwq->phq', stack, gw_b,
                       preferred_element_type=jnp.float32, precision=hi)    # (P, H, OW)

    # ---- Column (vertical) pass ----
    # Batched MXU matmul; GH broadcast ONCE across the whole fused stack (hoisted —
    # JAX does not CSE broadcast_in_dim).
    gh_b = jnp.broadcast_to(gh[None, :, :], (P, OH, H))
    conv = jnp.einsum('poh,phq->poq', gh_b, t,
                      preferred_element_type=jnp.float32, precision=hi)     # (P, OH, OW)

    mu1 = conv[0 * bnc:1 * bnc]
    mu2 = conv[1 * bnc:2 * bnc]
    s11 = conv[2 * bnc:3 * bnc]
    s22 = conv[3 * bnc:4 * bnc]
    s12 = conv[4 * bnc:5 * bnc]

    mu1_sq = mu1 * mu1
    mu2_sq = mu2 * mu2
    mu1_mu2 = mu1 * mu2

    sigma1_sq = s11 - mu1_sq
    sigma2_sq = s22 - mu2_sq
    sigma12 = s12 - mu1_mu2

    v1 = 2.0 * sigma12 + C2
    v2 = sigma1_sq + sigma2_sq + C2

    num = (2.0 * mu1_mu2 + C1) * v1
    den = (mu1_sq + mu2_sq + C1) * v2
    ssim_map = num * pl.reciprocal(den, approx=True)      # EUP vrcp: divide is ~free

    part = jnp.sum(ssim_map)
    # Lane-dense unmasked store of the per-block partial sum (wrapper reads [:, 0, 0]).
    out_ref[...] = jnp.full((1, 8, 128), part, dtype=jnp.float32)


# ------------------------------------- wrapper ----------------------------------------

def _vmem_capacity_bytes() -> int:
    try:
        info = pltpu.get_tpu_info()
        cap = getattr(info, "vmem_capacity_bytes", None)
        if cap:
            return int(cap)
    except Exception:
        pass
    return 64 * 1024 * 1024            # conservative (v7x-sized) fallback


def _snap_to_divisor(nc: int, target: int) -> int:
    """Largest divisor of nc that is <= target; prefer >=2 grid blocks (v7x 2 TCs)."""
    target = max(1, min(int(target), nc))
    divisors = [d for d in range(1, nc + 1) if nc % d == 0 and d <= target]
    multi = [d for d in divisors if nc // d >= 2]
    return max(multi) if multi else max(divisors)


def _pick_block_planes(nc, H, W, OH, OW, in_itemsize, vmem_limit):
    """Honest per-block VMEM footprint -> largest plane count that fits with headroom."""
    budget = (2 * vmem_limit) // 3                                  # pipeline/scratch slop
    fixed = 2 * (OH * H + W * OW) * 4 + 2 * 8 * 128 * 4             # GH/GW (2x-buffered) + out
    per_plane = (
        2 * 2 * H * W * in_itemsize     # two input blocks x pipeline double-buffer
        + 2 * H * W * 4                 # in-kernel f32 upcasts of the two blocks
        + 5 * H * W * 4                 # fused 5-map stack
        + 5 * H * OW * 4                # row-pass output
        + 5 * OH * H * 4                # GH broadcast (column pass)
        + 5 * OH * OW * 4               # column-pass output
        + 8 * OH * OW * 4               # epilogue temporaries
    )
    return max(1, (budget - fixed) // per_plane)


def ssim_pallas(img1, img2, *, window_size: int = 11, val_range=None, block_planes=None):
    assert img1.shape == img2.shape and img1.ndim == 4, "expected NCHW inputs"
    N, C, H, W = img1.shape
    assert H >= window_size and W >= window_size
    # TODO(synk): H-band spatial tiling (with conv halos) for planes too large for one
    # VMEM block; the current grid tiles over NC planes only.
    # TODO(synk): band/K-blocked matmul (or 11-tap shifted multiply-add) for W >= ~512 to
    # avoid the dense banded-matrix FLOP inflation flagged in the review.

    # Dynamic-range constants (matches the torch reference val_range=None logic). Pass
    # val_range explicitly to skip this extra full-image reduction pass over img1.
    if val_range is None:
        max_val = jnp.where(jnp.max(img1).astype(jnp.float32) > 128.0, 255.0, 1.0)
        min_val = jnp.where(jnp.min(img1).astype(jnp.float32) < -0.5, -1.0, 0.0)
        L = max_val - min_val
    else:
        L = jnp.float32(val_range)
    C1 = (0.01 * L) ** 2
    C2 = (0.03 * L) ** 2
    consts = jnp.stack([C1, C2]).astype(jnp.float32)                 # (2,) -> SMEM

    GH_np, GW_np = banded_matrices(H, W, window_size)
    OH = H - window_size + 1
    OW = W - window_size + 1
    gh = jnp.asarray(GH_np)                                          # (OH, H)
    gw = jnp.asarray(GW_np)                                          # (W, OW)

    nc = N * C
    # Keep inputs in their NATIVE dtype through the HBM->VMEM DMA; kernel upcasts.
    img1_f = img1.reshape(nc, H, W)
    img2_f = img2.reshape(nc, H, W)
    in_itemsize = img1.dtype.itemsize

    # Generation-aware VMEM budget (v5e/v6e: 128 MiB, v7x: 64 MiB).
    vmem_cap = _vmem_capacity_bytes()
    vmem_limit = max(32 * 1024 * 1024, min(int(0.75 * vmem_cap), 100 * 1024 * 1024))

    target = block_planes if block_planes is not None else _pick_block_planes(
        nc, H, W, OH, OW, in_itemsize, vmem_limit)
    bnc = _snap_to_divisor(nc, target)   # divides nc exactly -> no HBM padding, no mask
    num_blocks = nc // bnc

    kernel = functools.partial(_ssim_kernel, bnc=bnc)

    out = pl.pallas_call(
        kernel,
        out_shape=jax.ShapeDtypeStruct((num_blocks, 8, 128), jnp.float32),
        grid=(num_blocks,),
        in_specs=[
            pl.BlockSpec(memory_space=pltpu.MemorySpace.SMEM),        # consts [C1, C2]
            pl.BlockSpec((bnc, H, W), lambda i: (i, 0, 0)),           # img1 plane block
            pl.BlockSpec((bnc, H, W), lambda i: (i, 0, 0)),           # img2 plane block
            pl.BlockSpec((OH, H), lambda i: (0, 0)),                  # GH (resident)
            pl.BlockSpec((W, OW), lambda i: (0, 0)),                  # GW (resident)
        ],
        out_specs=pl.BlockSpec((1, 8, 128), lambda i: (i, 0, 0)),
        compiler_params=pltpu.CompilerParams(
            dimension_semantics=("parallel",),
            vmem_limit_bytes=int(vmem_limit),
        ),
    )(consts, img1_f, img2_f, gh, gw)

    total = jnp.sum(out[:, 0, 0])
    # size_average=True -> mean over the TRUE valid-conv element count.  (The reference
    # uses padding=0 (VALID) and ssim_map.mean(), i.e. nc*OH*OW elements.)
    return total / jnp.float32(nc * OH * OW)


class SSIMPallas:
    """Mirrors the torch SSIM module's forward (size_average=True, val_range=None)."""

    def __init__(self, window_size: int = 11, size_average: bool = True, val_range=None):
        assert size_average, "only size_average=True is implemented (module default)"
        self.window_size = window_size
        self.val_range = val_range

    def __call__(self, img1, img2):
        return ssim_pallas(img1, img2, window_size=self.window_size, val_range=self.val_range)


# --------------------------------------- main -----------------------------------------

if __name__ == "__main__":
    key = jax.random.PRNGKey(0)
    k1, k2 = jax.random.split(key)
    # NCHW, small shapes consistent with the module (H, W >= window_size=11).
    img1 = jax.random.uniform(k1, (2, 4, 16, 16), dtype=jnp.float32)
    img2 = jax.random.uniform(k2, (2, 4, 16, 16), dtype=jnp.float32)

    model = SSIMPallas(window_size=11, size_average=True)
    result = model(img1, img2)
    jax.block_until_ready(result)

    print("KERNEL_OK")
</pallas_src>

<mosaic_0001>
module attributes {stable_mosaic.version = 11 : i64} {
  func.func @_ssim_kernel(%arg0: i32, %arg1: memref<2xf32, #tpu.memory_space<smem>>, %arg2: memref<4x16x16xf32, #tpu.memory_space<vmem>>, %arg3: memref<4x16x16xf32, #tpu.memory_space<vmem>>, %arg4: memref<6x16xf32, #tpu.memory_space<vmem>>, %arg5: memref<16x6xf32, #tpu.memory_space<vmem>>, %arg6: memref<1x8x128xf32, #tpu.memory_space<vmem>>) attributes {dimension_semantics = [#tpu.dimension_semantics<parallel>], iteration_bounds = array<i64: 2>, scalar_prefetch = 0 : i64, scratch_operands = 0 : i64, tpu.core_type = #tpu.core_type<tc>, window_params = [{transform_indices = @transform_0, window_bounds = array<i64: 2>}, {transform_indices = @transform_1, window_bounds = array<i64: 4, 16, 16>}, {transform_indices = @transform_2, window_bounds = array<i64: 4, 16, 16>}, {pipeline_mode = #tpu.pipeline_mode<synchronous>, transform_indices = @transform_3, window_bounds = array<i64: 6, 16>}, {pipeline_mode = #tpu.pipeline_mode<synchronous>, transform_indices = @transform_4, window_bounds = array<i64: 16, 6>}, {transform_indices = @transform_5, window_bounds = array<i64: 1, 8, 128>}]} {
    %c0 = arith.constant 0 : index
    %0 = memref.load %arg1[%c0] : memref<2xf32, #tpu.memory_space<smem>>
    %c1 = arith.constant 1 : index
    %1 = memref.load %arg1[%c1] : memref<2xf32, #tpu.memory_space<smem>>
    %c0_0 = arith.constant 0 : index
    %c0_1 = arith.constant 0 : index
    %c0_2 = arith.constant 0 : index
    %2 = vector.load %arg2[%c0_0, %c0_1, %c0_2] : memref<4x16x16xf32, #tpu.memory_space<vmem>>, vector<4x16x16xf32>
    %c0_3 = arith.constant 0 : index
    %c0_4 = arith.constant 0 : index
    %c0_5 = arith.constant 0 : index
    %3 = vector.load %arg3[%c0_3, %c0_4, %c0_5] : memref<4x16x16xf32, #tpu.memory_space<vmem>>, vector<4x16x16xf32>
    %c0_6 = arith.constant 0 : index
    %c0_7 = arith.constant 0 : index
    %4 = vector.load %arg4[%c0_6, %c0_7] : memref<6x16xf32, #tpu.memory_space<vmem>>, vector<6x16xf32>
    %c0_8 = arith.constant 0 : index
    %c0_9 = arith.constant 0 : index
    %5 = vector.load %arg5[%c0_8, %c0_9] : memref<16x6xf32, #tpu.memory_space<vmem>>, vector<16x6xf32>
    %6 = arith.mulf %2, %2 : vector<4x16x16xf32>
    %7 = arith.mulf %3, %3 : vector<4x16x16xf32>
    %8 = arith.mulf %2, %3 : vector<4x16x16xf32>
    %9 = tpu.concatenate %2, %3, %6, %7, %8 in 0 : vector<4x16x16xf32>, vector<4x16x16xf32>, vector<4x16x16xf32>, vector<4x16x16xf32>, vector<4x16x16xf32> -> vector<20x16x16xf32>
    %10 = vector.shape_cast %9 : vector<20x16x16xf32> to vector<320x16xf32>
    %cst = arith.constant dense<0.000000e+00> : vector<320x6xf32>
    %11 = tpu.matmul %10, %5, %cst {dimension_numbers = #tpu.dot_dimension_numbers<[1], [0], [0], [1], [0, 0, 1, 1], [], []>, precision = #tpu.contract_precision<fp32>} : vector<320x16xf32>, vector<16x6xf32>, vector<320x6xf32> -> vector<320x6xf32>
    %12 = vector.shape_cast %11 : vector<320x6xf32> to vector<20x16x6xf32>
    %13 = vector.shape_cast %4 : vector<6x16xf32> to vector<1x6x16xf32>
    %14 = vector.shape_cast %13 : vector<1x6x16xf32> to vector<1x6x16xf32>
    %15 = vector.broadcast %14 : vector<1x6x16xf32> to vector<20x6x16xf32>
    "tpu.trace_start"() <{level = 10 : i32, message = "poh,phq->poq"}> : () -> ()
    %cst_10 = arith.constant dense<0.000000e+00> : vector<20x6x6xf32>
    %16 = tpu.matmul %15, %12, %cst_10 {dimension_numbers = #tpu.dot_dimension_numbers<[2], [1], [1], [2], [0, 0, 0, 1, 1, 2], [0], [0]>, precision = #tpu.contract_precision<fp32>} : vector<20x6x16xf32>, vector<20x16x6xf32>, vector<20x6x6xf32> -> vector<20x6x6xf32>
    "tpu.trace_stop"() : () -> ()
    %17 = vector.extract_strided_slice %16 {offsets = [0, 0, 0], sizes = [4, 6, 6], strides = [1, 1, 1]} : vector<20x6x6xf32> to vector<4x6x6xf32>
    %18 = vector.extract_strided_slice %16 {offsets = [4, 0, 0], sizes = [4, 6, 6], strides = [1, 1, 1]} : vector<20x6x6xf32> to vector<4x6x6xf32>
    %19 = vector.extract_strided_slice %16 {offsets = [8, 0, 0], sizes = [4, 6, 6], strides = [1, 1, 1]} : vector<20x6x6xf32> to vector<4x6x6xf32>
    %20 = vector.extract_strided_slice %16 {offsets = [12, 0, 0], sizes = [4, 6, 6], strides = [1, 1, 1]} : vector<20x6x6xf32> to vector<4x6x6xf32>
    %21 = vector.extract_strided_slice %16 {offsets = [16, 0, 0], sizes = [4, 6, 6], strides = [1, 1, 1]} : vector<20x6x6xf32> to vector<4x6x6xf32>
    %22 = arith.mulf %17, %17 : vector<4x6x6xf32>
    %23 = arith.mulf %18, %18 : vector<4x6x6xf32>
    %24 = arith.mulf %17, %18 : vector<4x6x6xf32>
    %25 = arith.subf %19, %22 : vector<4x6x6xf32>
    %26 = arith.subf %20, %23 : vector<4x6x6xf32>
    %27 = arith.subf %21, %24 : vector<4x6x6xf32>
    %cst_11 = arith.constant 2.000000e+00 : f32
    %28 = vector.broadcast %cst_11 : f32 to vector<4x6x6xf32>
    %29 = arith.mulf %28, %27 : vector<4x6x6xf32>
    %30 = vector.broadcast %1 : f32 to vector<4x6x6xf32>
    %31 = arith.addf %29, %30 : vector<4x6x6xf32>
    %32 = arith.addf %25, %26 : vector<4x6x6xf32>
    %33 = vector.broadcast %1 : f32 to vector<4x6x6xf32>
    %34 = arith.addf %32, %33 : vector<4x6x6xf32>
    %cst_12 = arith.constant 2.000000e+00 : f32
    %35 = vector.broadcast %cst_12 : f32 to vector<4x6x6xf32>
    %36 = arith.mulf %35, %24 : vector<4x6x6xf32>
    %37 = vector.broadcast %0 : f32 to vector<4x6x6xf32>
    %38 = arith.addf %36, %37 : vector<4x6x6xf32>
    %39 = arith.mulf %38, %31 : vector<4x6x6xf32>
    %40 = arith.addf %22, %23 : vector<4x6x6xf32>
    %41 = vector.broadcast %0 : f32 to vector<4x6x6xf32>
    %42 = arith.addf %40, %41 : vector<4x6x6xf32>
    %43 = arith.mulf %42, %34 : vector<4x6x6xf32>
    %44 = tpu.reciprocal %43 {approx = true} : vector<4x6x6xf32> -> vector<4x6x6xf32>
    %45 = arith.mulf %39, %44 : vector<4x6x6xf32>
    %46 = vector.shape_cast %45 : vector<4x6x6xf32> to vector<1x4x6x6xf32>
    %cst_13 = arith.constant dense<0.000000e+00> : vector<1xf32>
    %47 = vector.multi_reduction <add>, %46, %cst_13 [1, 2, 3] : vector<1x4x6x6xf32> to vector<1xf32>
    %48 = vector.shape_cast %47 : vector<1xf32> to vector<1x1x1x1xf32>
    %49 = vector.extract %48[0, 0, 0, 0] : f32 from vector<1x1x1x1xf32>
    %50 = vector.broadcast %49 : f32 to vector<1x8x128xf32>
    %c0_14 = arith.constant 0 : index
    %c0_15 = arith.constant 0 : index
    %c0_16 = arith.constant 0 : index
    %51 = vector.load %arg6[%c0_14, %c0_15, %c0_16] : memref<1x8x128xf32, #tpu.memory_space<vmem>>, vector<1x8x128xf32>
    tpu.vector_store %arg6[%c0_14, %c0_15, %c0_16], %50 {strides = array<i32>} : memref<1x8x128xf32, #tpu.memory_space<vmem>>, vector<1x8x128xf32>,
    return
  }
  func.func @transform_0(%arg0: i32) -> i32 {
    %c0_i32 = arith.constant 0 : i32
    %c0_i32_0 = arith.constant 0 : i32
    return %c0_i32 : i32
  }
  func.func @transform_1(%arg0: i32) -> (i32, i32, i32) {
    %c0_i32 = arith.constant 0 : i32
    %c0_i32_0 = arith.constant 0 : i32
    %c0_i32_1 = arith.constant 0 : i32
    return %arg0, %c0_i32, %c0_i32_0 : i32, i32, i32
  }
  func.func @transform_2(%arg0: i32) -> (i32, i32, i32) {
    %c0_i32 = arith.constant 0 : i32
    %c0_i32_0 = arith.constant 0 : i32
    %c0_i32_1 = arith.constant 0 : i32
    return %arg0, %c0_i32, %c0_i32_0 : i32, i32, i32
  }
  func.func @transform_3(%arg0: i32) -> (i32, i32) {
    %c0_i32 = arith.constant 0 : i32
    %c0_i32_0 = arith.constant 0 : i32
    %c0_i32_1 = arith.constant 0 : i32
    return %c0_i32, %c0_i32_0 : i32, i32
  }
  func.func @transform_4(%arg0: i32) -> (i32, i32) {
    %c0_i32 = arith.constant 0 : i32
    %c0_i32_0 = arith.constant 0 : i32
    %c0_i32_1 = arith.constant 0 : i32
    return %c0_i32, %c0_i32_0 : i32, i32
  }
  func.func @transform_5(%arg0: i32) -> (i32, i32, i32) {
    %c0_i32 = arith.constant 0 : i32
    %c0_i32_0 = arith.constant 0 : i32
    %c0_i32_1 = arith.constant 0 : i32
    return %arg0, %c0_i32, %c0_i32_0 : i32, i32, i32
  }
}

</mosaic_0001>

<bundles_post_ra>
// kernel: tpu_custom_call.1
= control target key start
LH: loop header
LB: loop body
LE: loop exit
PB: predicated region body
PF: predicated region fallthrough
CT: control target
= control target key end

     0   :  { %s17046_s0 = inlined_call_operand.vmem [shape: f32[2], index: 0, kind: input, shape index: {}]   ;;  %s17047_s1 = inlined_call_operand.hbm [shape: f32[8,16,16], index: 1, kind: input, shape index: {}]   ;;  %s17048_s2 = inlined_call_operand.hbm [shape: f32[8,16,16], index: 2, kind: input, shape index: {}]   ;;  %s17049_s3 = inlined_call_operand.vmem [shape: f32[6,16], index: 3, kind: input, shape index: {}]   ;;  %s17050_s4 = inlined_call_operand.vmem [shape: f32[16,6], index: 4, kind: input, shape index: {}]   ;;  %s17051_s5 = inlined_call_operand.hbm [shape: f32[2,8,128], index: 5, kind: output, shape index: {}]  }
   0x1   :  { %17222 = sst [smem:[#allocation66_spill]] %s17046_s0 }
   0x2   :  { %17223 = sst [smem:[#allocation67_spill]] %s17047_s1 }
   0x3   :  { %10 = vsyncpa [#allocation5], 0 }
   0x4   :  { %11 = vsyncpa [#allocation3], 0 }
   0x5   :  { %13 = vsyncpa [#allocation3 + $0x1], 0 }
   0x6   :  { %14 = vsyncpa [#allocation8], 0 }
   0x7   :  { %16 = vsyncpa [#allocation8 + $0x1], 0 }
   0x8   :  { %17 = vsyncpa [#allocation4], 0 }
   0x9   :  { %19 = vsyncpa [#allocation4 + $0x1], 0  ;;  %s14911_s18 = smov 0   ;;  %s14913_s19 = smov 0  }
   0xa   :  { %s14915_s20 = smov 0   ;;  %s14917_s21 = smov 0  }
   0xb LB: > { %s14932_s22 = sadd.s32 4294967295, %s14870_s21   ;;  %s11998_s23 = sadd.s32 4294967294, %s14870_s21   ;;  %s14870_s21 = sphi %s14917_s21, %s17520_s21   ;;  %s14866_s20 = sphi %s14915_s20, %s17519_s20   ;;  %s14862_s19 = sphi %s14913_s19, %s17518_s19   ;;  %s14858_s18 = sphi %s14911_s18, %s17517_s18  }
   0xc   : > { %s14936_s24 = sadd.s32 1, %s14870_s21   ;;  %s53_s25 = sadd.s32 1, %s14866_s20 }
   0xd   : > { %s50_s26 = ssub.s32 %s14870_s21, %s14936_s24  ;;  %p60_p0 = scmp.ne.s32.totalorder %s14866_s20, %s14862_s19 }
   0xe   : > { %p51_p1 = scmp.eq.s32.totalorder %s50_s26, 0  ;;  %p61_p2 = scmp.eq.s32.totalorder %s14870_s21, 0 }
   0xf   : > { %p66_p3 = scmp.ne.s32.totalorder %s14862_s19, %s14858_s18  ;;  %p17052_p4 = scmp.eq.s32.totalorder %s14932_s22, 0 }
  0x10   : > { %s14948_s27 = scalar_select %p51_p1, %s14866_s20, %s53_s25  }
  0x11   : > { %p14950_p5 = por %p61_p2, %p60_p0  ;;  %p14956_p6 = por %p17052_p4, %p66_p3 }
  0x12   : > { %p158_p7 = scmp.eq.s32.totalorder %s14932_s22, 1  ;;  %p164_p8 = scmp.eq.s32.totalorder %s11998_s23, 1 }
  0x13   : > { %s17225_s29 = scalar_select %p14956_p6, 1, 0 }
  0x14   : > { %p11999_p9 = scmp.ge.s32.totalorder %s14870_s21, 1  ;;  %p171_p10 = scmp.lt.s32.totalorder %s14870_s21, 3 }
  0x15   : > { %p14963_p11 = por %p158_p7, %p60_p0  ;;  %p14967_p12 = por %p164_p8, %p66_p3 }
  0x16   : > { %p14971_p13 = pnand %p11999_p9, %p171_p10  ;;  %s17229_s0 = sld [smem:[#allocation66_spill]] }
  0x17   : > { %s17226_s30 = scalar_select %p14963_p11, 1, 0 }
  0x18   : > { %s17227_s6 = scalar_select %p14967_p12, 1, 0 }
  0x19   : > { %p14656_p1 = pneg %p14971_p13  ;;  %p14672_p2 = scmp.lt.s32.totalorder %s14870_s21, 2 }
  0x1a   : > { %s14989_s12 = sand.u32 1, %s14866_s20  }
  0x1b   : > { %p14984_p7 = pnand %p14656_p1, %p17052_p4  ;;  %p14993_p3 = pnand %p14672_p2, %p14950_p5 }
  0x1c   : > { %s184_s10 = sshll.u32 %s17229_s0, 4  ;;  %s12002_s14 = sshll.u32 %s14989_s12, 6  ;;  %s185_s10 = int_to_ptr.vmem [resolvable:$true] %s184_s10 }
  0x1d   : > { %s14721_s15 = scalar_lea.vmem %s185_s10, 16  ;;  %p14723_p9 = pneg %p14984_p7 }
  0x1e   : > { %p14722_p8 = scmp.ne.s32.totalorder %s185_s10, %s14721_s15  ;;  %p14729_p1 = scmp.lt.s32.totalorder %s185_s10, %s185_s10 }
  0x1f   : > { %p14730_p4 = scmp.lt.s32.totalorder %s14721_s15, %s14721_s15 }
  0x20   : > { %p14724_p10 = pnand %p14723_p9, %p14722_p8 }
  0x21   : > { %p14731_p12 = por %p14730_p4, %p14729_p1 }
  0x22   : > { %p14725_p0 = pneg %p14724_p10 }
  0x24   : > { %p14732_p11 = pnand %p14731_p12, %p14725_p0 }
  0x26   : > { %14735 = shalt.err (!%p14732_p11)
}
  0x27   : > { %s14872_s16 = smov [#allocation2]   ;;  %s12021_s17 = sshll.u32 %s14870_s21, 10 }
  0x28   : > { %14659 = dma.vmem_to_smem (!%p14984_p7), %s185_s10, 16, %s14872_s16, [#allocation5]  }
  0x29   : > { %s205_s23 = scalar_lea.vmem [#allocation6], %s12002_s14  ;;  %s17232_s1 = sld [smem:[#allocation67_spill]] }
  0x2a   : > { %s213_s25 = sshll.u32 %s205_s23, 4  ;;  %s202_s9 = scalar_lea.sflag [#allocation3], %s14989_s12  ;;  %s15012_s25 = int_to_ptr.vmem [resolvable:$true] %s213_s25 }
  0x2b   : > { %p14738_p5 = pneg %p14993_p3 }
  0x2f   : > { %s15010_s8 = scalar_lea.hbm %s17232_s1, %s12021_s17  ;;  %s14741_s16 = scalar_lea.hbm %s17232_s1, 2048 }
  0x30   : > { %s14736_s11 = scalar_lea.hbm %s15010_s8, 1024  ;;  %p14742_p0 = scmp.lt.u32.totalorder %s15010_s8, %s17232_s1 }
  0x31   : > { %p14737_p4 = scmp.ne.s32.totalorder %s15010_s8, %s14736_s11  ;;  %p14743_p2 = scmp.lt.u32.totalorder %s14741_s16, %s14736_s11 }
  0x32   : > { %p14745_p8 = scmp.lt.u32.totalorder %s14736_s11, %s15010_s8 }
  0x33   : > { %p14739_p11 = pnand %p14738_p5, %p14737_p4  ;;  %p14744_p7 = por %p14743_p2, %p14742_p0 }
  0x35   : > { %p14740_p12 = pneg %p14739_p11  ;;  %p14746_p9 = por %p14745_p8, %p14744_p7 }
  0x37   : > { %p14747_p10 = pnand %p14746_p9, %p14740_p12 }
  0x39   : > { %14750 = shalt.err (!%p14747_p10)
}
  0x3a   : > { %s14751_s28 = scalar_lea.vmem %s15012_s25, 1024  ;;  %s14873_s10 = smov [#allocation6]  }
  0x3b   : > { %p14752_p1 = scmp.ne.s32.totalorder %s15012_s25, %s14751_s28  ;;  %s14756_s15 = sshll.u32 %s14873_s10, 4  ;;  %s14757_s15 = int_to_ptr.vmem [resolvable:$false] %s14756_s15 }
  0x3c   : > { %s14758_s23 = scalar_lea.vmem %s14757_s15, 2048  ;;  %p14759_p6 = scmp.lt.s32.totalorder %s15012_s25, %s14757_s15 }
  0x3d   : > { %p14754_p4 = pnand %p14752_p1, %p14738_p5  ;;  %p14760_p0 = scmp.lt.s32.totalorder %s14758_s23, %s14751_s28 }
  0x3f   : > { %p14755_p11 = pneg %p14754_p4  ;;  %p14761_p2 = por %p14760_p0, %p14759_p6 }
  0x41   : > { %p14762_p7 = pnand %p14761_p2, %p14755_p11 }
  0x43   : > { %14765 = shalt.err (!%p14762_p7)
}
  0x44   : > { %s14874_s11 = smov 128   ;;  %s14875_s16 = smov 8  }
  0x45   : > { %14663 = dma.hbm_to_vmem [thread:$0]  (!%p14993_p3), %s15010_s8, 1024, %s15012_s25, %s202_s9, %s14874_s11, %s14874_s11, %s14875_s16  }
  0x46   : > { %s15050_s10 = scalar_lea.hbm %s17048_s2, %s12021_s17  ;;  %s227_s15 = scalar_lea.vmem [#allocation7], %s12002_s14 }
  0x47   : > { %s235_s23 = sshll.u32 %s227_s15, 4  ;;  %s224_s0 = scalar_lea.sflag [#allocation8], %s14989_s12  ;;  %s15054_s23 = int_to_ptr.vmem [resolvable:$true] %s235_s23 }
  0x48   : > { %s14766_s1 = scalar_lea.hbm %s15050_s10, 1024  ;;  %s14771_s17 = scalar_lea.hbm %s17048_s2, 2048 }
  0x49   : > { %p14767_p6 = scmp.ne.s32.totalorder %s15050_s10, %s14766_s1  ;;  %p14772_p9 = scmp.lt.u32.totalorder %s15050_s10, %s17048_s2 }
  0x4a   : > { %p14773_p10 = scmp.lt.u32.totalorder %s14771_s17, %s14766_s1  ;;  %p14775_p4 = scmp.lt.u32.totalorder %s14766_s1, %s15050_s10 }
  0x4b   : > { %p14769_p12 = pnand %p14767_p6, %p14738_p5 }
  0x4c   : > { %p14774_p1 = por %p14773_p10, %p14772_p9 }
  0x4d   : > { %p14770_p8 = pneg %p14769_p12 }
  0x4e   : > { %p14776_p11 = por %p14775_p4, %p14774_p1 }
  0x50   : > { %p14777_p0 = pnand %p14776_p11, %p14770_p8 }
  0x52   : > { %14780 = shalt.err (!%p14777_p0)
}
  0x53   : > { %s14781_s14 = scalar_lea.vmem %s15054_s23, 1024  ;;  %s14876_s28 = smov [#allocation7]  }
  0x54   : > { %p14782_p2 = scmp.ne.s32.totalorder %s15054_s23, %s14781_s14  ;;  %s14786_s15 = sshll.u32 %s14876_s28, 4  ;;  %s14787_s15 = int_to_ptr.vmem [resolvable:$false] %s14786_s15 }
  0x55   : > { %s14788_s25 = scalar_lea.vmem %s14787_s15, 2048  ;;  %p14789_p12 = scmp.lt.s32.totalorder %s15054_s23, %s14787_s15 }
  0x56   : > { %p14784_p7 = pnand %p14782_p2, %p14738_p5  ;;  %p14790_p9 = scmp.lt.s32.totalorder %s14788_s25, %s14781_s14 }
  0x58   : > { %p14785_p6 = pneg %p14784_p7  ;;  %p14791_p10 = por %p14790_p9, %p14789_p12 }
  0x5a   : > { %p14792_p1 = pnand %p14791_p10, %p14785_p6 }
  0x5c   : > { %14795 = shalt.err (!%p14792_p1)
}
  0x5d   : > { %14666 = dma.hbm_to_vmem [thread:$0]  (!%p14993_p3), %s15050_s10, 1024, %s15054_s23, %s224_s0, %s14874_s11, %s14874_s11, %s14875_s16  }
  0x5e   : > { %247 = sbr.rel (%p14971_p13) target bundleno = 2066 (0x812), region = 40 }
  0x65   : > { %p17233_p5 = scmp.eq.s32.totalorder %s14932_s22, 0 }
  0x67   : > { %14841 = dma.done.wait (%p17233_p5), [#allocation5], 16   ;;  %p17234_p8 = pmov %p17233_p5 }
  0x68   : > { %s15092_s1 = sand.u32 1, %s14862_s19   ;;  %p17235_p3 = scmp.ne.s32.totalorder %s17225_s29, 0 }
  0x69   : > { %14843 = vsyncadd (%p17234_p8), [#allocation5], 4294967280  ;;  %s12012_s13 = sshll.u32 %s15092_s1, 6  ;;  %s254_s12 = scalar_lea.sflag [#allocation3], %s15092_s1 }
  0x6a   : > { %s15096_s8 = scalar_lea.vmem [#allocation6], %s12012_s13 }
  0x6b   : > { %14845 = dma.done.wait (%p17235_p3), %s254_s12, 1024  }
  0x6c   : > { %14847 = vsyncadd (%p17235_p3), %s254_s12, 4294966272  ;;  %s263_s0 = scalar_lea.sflag [#allocation8], %s15092_s1  ;;  %s15103_s7 = scalar_lea.vmem [#allocation7], %s12012_s13 }
  0x6d   : > { %14849 = dma.done.wait (%p17235_p3), %s263_s0, 1024  }
  0x6e   : > { %14851 = vsyncadd (%p17235_p3), %s263_s0, 4294966272 }
  0x6f   : > { %271 = sfence }
  0x70   : > { %v320_v0 = vld [vmem:[%s17050_s4] sm:$0xff]  ;;  %v321_v1 = vld [vmem:[%s17050_s4 + $0x8] sm:$0xff]  ;;  %vm346_vm0 = vcmask 130048   ;;  %v15124_v7 = vld [vmem:[%s15096_s8 + $0x10] sm:$0xff]  ;;  %vm14878_vm1 = vmmov 0   ;;  %s301_s9 = sld [smem:[#allocation2]] }
  0x71   : > { %v15116_v2 = vld [vmem:[%s15096_s8] sm:$0xff]  ;;  %v468_v3 = vand.u32 4294901760, %v320_v0  ;;  %v471_v4 = vand.u32 4294901760, %v321_v1  ;;  %v15121_v6 = vld [vmem:[%s15096_s8 + $0x8] sm:$0xff]  ;;  %v354_v11 = vsel %vm346_vm0, %v15124_v7, 0  ;;  %v15137_v12 = vld [vmem:[%s15096_s8 + $0x18] sm:$0xff] }
  0x72   : > { %v348_v5 = vsel %vm346_vm0, %v15116_v2, 0  ;;  %v15128_v8 = vmul.f32 %v15116_v2, %v15116_v2  ;;  %v351_v10 = vsel %vm346_vm0, %v15121_v6, 0  ;;  %v15140_v13 = vld [vmem:[%s15096_s8 + $0x20] sm:$0xff]  ;;  %v15143_v14 = vld [vmem:[%s15096_s8 + $0x28] sm:$0xff]  ;;  %v15149_v17 = vand.u32 4294901760, %v354_v11  ;;  %v15209_v43 = vld [vmem:[%s15096_s8 + $0x30] sm:$0xff] }
  0x73   : > { %v15130_v9 = vand.u32 4294901760, %v348_v5  ;;  %v15145_v15 = vpack.c.bf16 %v471_v4, %v468_v3  ;;  %v15147_v16 = vand.u32 4294901760, %v351_v10  ;;  %v357_v18 = vsel %vm346_vm0, %v15137_v12, 0  ;;  %v15212_v44 = vld [vmem:[%s15096_s8 + $0x38] sm:$0xff]  ;;  %v15215_v45 = vld [vmem:[%s15103_s7] sm:$0xff]  ;;  %v15221_v50 = vld [vmem:[%s15103_s7 + $0x8] sm:$0xff] }
  0x74   : > { %v15156_v20 = vand.u32 4294901760, %v357_v18  ;;  %v15158_v21 = vsub.f32 %v320_v0, %v468_v3  ;;  %v15160_v22 = vsub.f32 %v321_v1, %v471_v4  ;;  %v15167_v24 = vsub.f32 %v354_v11, %v15149_v17  ;;  %v15226_v55 = vld [vmem:[%s15103_s7 + $0x10] sm:$0xff]  ;;  %v15229_v56 = vld [vmem:[%s15103_s7 + $0x18] sm:$0xff]  ;;  %v15257_v11 = vld [vmem:[%s15103_s7 + $0x28] sm:$0xff]  ;;  %s12015_s26 = sld [smem:[#allocation2 + $0x1]]  ;;  %s12014_s14 = sshll.u32 %s15092_s1, 3 }
  0x75   : > { %v15154_v19 = vsub.f32 %v348_v5, %v15130_v9  ;;  %13861 = vmatprep.subr.bf16.mxu0 %v15145_v15  ;;  %v15164_v23 = vsub.f32 %v351_v10, %v15147_v16  ;;  %v360_v25 = vsel %vm346_vm0, %v15140_v13, 0  ;;  %v363_v26 = vsel %vm346_vm0, %v15143_v14, 0  ;;  %v15254_v10 = vld [vmem:[%s15103_s7 + $0x20] sm:$0xff]  ;;  %s298_s28 = scalar_lea.vmem [#allocation9], %s12014_s14  ;;  %s12017_s25 = sshll.u32 %s14932_s22, 7 }
  0x76   : > { %17238 = vst [vmem:[#allocation16_spill] sm:$0xff] %v15167_v24  ;;  %13863 = vmatpush3.bf16.msra.mxu0 %v15145_v15  ;;  %v15176_v28 = vsub.f32 %v357_v18, %v15156_v20  ;;  %v17068_v29 = vand.u32 4294901760, %v15158_v21  ;;  %v17065_v30 = vand.u32 4294901760, %v15160_v22  ;;  %v17060_v32 = vand.u32 4294901760, %v15167_v24  ;;  %s11893_s15 = sshll.u32 %s298_s28, 4  ;;  %s17004_s0 = scalar_lea.hbm %s17051_s5, %s12017_s25  ;;  %s16999_s15 = int_to_ptr.vmem [resolvable:$true] %s11893_s15 }
  0x77   : > { %17236 = vst [vmem:[#allocation14_spill] sm:$0xff] %v15154_v19  ;;  %17237 = vst [vmem:[#allocation15_spill] sm:$0xff] %v15164_v23  ;;  %v17064_v27 = vand.u32 4294901760, %v15154_v19  ;;  %v17061_v31 = vand.u32 4294901760, %v15164_v23  ;;  %v15182_v33 = vand.u32 4294901760, %v360_v25  ;;  %v15184_v34 = vand.u32 4294901760, %v363_v26 }
  0x78   : > { %17239 = vst [vmem:[#allocation17_spill] sm:$0xff] %v15176_v28  ;;  %v17059_v36 = vand.u32 4294901760, %v15176_v28  ;;  %v938_v37 = vsub.f32 %v15158_v21, %v17068_v29  ;;  %v945_v38 = vsub.f32 %v15160_v22, %v17065_v30  ;;  %v557_v40 = vsub.f32 %v15167_v24, %v17060_v32  ;;  %s14796_s11 = scalar_lea.vmem %s16999_s15, 128  ;;  %p17514_p4 = scmp.ne.s32.totalorder %s17226_s30, 0 }
  0x79   : > { %v537_v35 = vsub.f32 %v15154_v19, %v17064_v27  ;;  %v547_v39 = vsub.f32 %v15164_v23, %v17061_v31  ;;  %v15203_v41 = vsub.f32 %v360_v25, %v15182_v33  ;;  %v15206_v42 = vsub.f32 %v363_v26, %v15184_v34  ;;  %p14797_p13 = scmp.ne.s32.totalorder %s16999_s15, %s14796_s11  ;;  %s14880_s22 = smov [#allocation9]  }
  0x7a   : > { %v567_v47 = vsub.f32 %v15176_v28, %v17059_v36  ;;  %v939_v48 = vand.u32 4294901760, %v938_v37  ;;  %v946_v49 = vand.u32 4294901760, %v945_v38  ;;  %v558_v52 = vand.u32 4294901760, %v557_v40  ;;  %s14800_s16 = sshll.u32 %s14880_s22, 4  ;;  %s14801_s16 = int_to_ptr.vmem [resolvable:$false] %s14800_s16 }
  0x7b   : > { %17240 = vst [vmem:[#allocation18_spill] sm:$0xff] %v15203_v41  ;;  %17241 = vst [vmem:[#allocation19_spill] sm:$0xff] %v15206_v42  ;;  %v538_v46 = vand.u32 4294901760, %v537_v35  ;;  %v548_v51 = vand.u32 4294901760, %v547_v39  ;;  %v17057_v53 = vand.u32 4294901760, %v15203_v41  ;;  %v17055_v54 = vand.u32 4294901760, %v15206_v42  ;;  %p14798_p11 = pnand %p14797_p13, %p17514_p4  ;;  %p14803_p2 = scmp.lt.s32.totalorder %s16999_s15, %s14801_s16 }
  0x7c   : > { %v568_v57 = vand.u32 4294901760, %v567_v47  ;;  %v13864_v58 = vpack.c.bf16 %v946_v49, %v939_v48  ;;  %v366_v59 = vsel %vm346_vm0, %v15209_v43, 0  ;;  %v369_v60 = vsel %vm346_vm0, %v15212_v44, 0  ;;  %s14802_s10 = scalar_lea.vmem %s14801_s16, 256 }
  0x7d   : > { %12640 = vmatprep.mubr.f32.mxu0 %v538_v46  ;;  %v577_v61 = vsub.f32 %v15203_v41, %v17057_v53  ;;  %v587_v62 = vsub.f32 %v15206_v42, %v17055_v54  ;;  %v15241_v63 = vand.u32 4294901760, %v366_v59  ;;  %v15243_v0 = vand.u32 4294901760, %v369_v60  ;;  %v15309_v54 = vld [vmem:[%s15103_s7 + $0x38] sm:$0xff]  ;;  %p14799_p0 = pneg %p14798_p11  ;;  %p14804_p7 = scmp.lt.s32.totalorder %s14802_s10, %s14796_s11 }
  0x7e   : > { %12641 = vmatmul.mubr.f32.vlgmr.msra.gmra.mrb[0].mxu0 %v548_v51  ;;  %13865 = vmatprep.subr.bf16.mxu0 %v13864_v58  ;;  %v372_v1 = vsel %vm346_vm0, %v15215_v45, 0  ;;  %v375_v3 = vsel %vm346_vm0, %v15221_v50, 0  ;;  %v378_v4 = vsel %vm346_vm0, %v15226_v55, 0  ;;  %v381_v5 = vsel %vm346_vm0, %v15229_v56, 0 }
  0x7f   : > { %12643 = vmatprep.mubr.f32.mxu0 %v558_v52  ;;  %13867 = vmatpush3.bf16.msra.mxu0 %v13864_v58  ;;  %v578_v18 = vand.u32 4294901760, %v577_v61  ;;  %v588_v25 = vand.u32 4294901760, %v587_v62  ;;  %v15260_v26 = vsub.f32 %v366_v59, %v15241_v63  ;;  %v15263_v35 = vsub.f32 %v369_v60, %v15243_v0  ;;  %p14805_p6 = por %p14804_p7, %p14803_p2 }
  0x80   : > { %v15265_v37 = vand.u32 4294901760, %v372_v1  ;;  %v15267_v38 = vand.u32 4294901760, %v375_v3  ;;  %v15269_v39 = vand.u32 4294901760, %v378_v4  ;;  %v15271_v40 = vand.u32 4294901760, %v381_v5 }
  0x81   : > { %17242 = vst [vmem:[#allocation20_spill] sm:$0xff] %v15260_v26  ;;  %17243 = vst [vmem:[#allocation21_spill] sm:$0xff] %v15263_v35  ;;  %v17056_v46 = vand.u32 4294901760, %v15260_v26  ;;  %v17058_v47 = vand.u32 4294901760, %v15263_v35  ;;  %v384_v48 = vsel %vm346_vm0, %v15254_v10, 0  ;;  %v387_v49 = vsel %vm346_vm0, %v15257_v11, 0  ;;  %p14806_p12 = pnand %p14805_p6, %p14799_p0 }
  0x82   : > { %12644 = vmatmul.mubr.f32.gmra.mrb[2].mxu0 %v568_v57  ;;  %v15280_v51 = vsub.f32 %v372_v1, %v15265_v37  ;;  %v15283_v52 = vsub.f32 %v375_v3, %v15267_v38  ;;  %v15286_v57 = vsub.f32 %v378_v4, %v15269_v39  ;;  %v15289_v58 = vsub.f32 %v381_v5, %v15271_v40 }
  0x83   : > { %12646 = vmatprep.mubr.f32.mxu0 %v578_v18  ;;  %v597_v59 = vsub.f32 %v15260_v26, %v17056_v46  ;;  %v607_v60 = vsub.f32 %v15263_v35, %v17058_v47  ;;  %v15297_v61 = vand.u32 4294901760, %v384_v48  ;;  %v15299_v62 = vand.u32 4294901760, %v387_v49  ;;  %v15306_v18 = vld [vmem:[%s15103_s7 + $0x30] sm:$0xff]  ;;  %s11880_s7 = scalar_lea.sflag [#allocation4], %s15092_s1 }
  0x84   : > { %17244 = vst [vmem:[#allocation22_spill] sm:$0xff] %v15280_v51  ;;  %17245 = vst [vmem:[#allocation23_spill] sm:$0xff] %v15283_v52  ;;  %v17062_v1 = vand.u32 4294901760, %v15280_v51  ;;  %v17063_v3 = vand.u32 4294901760, %v15283_v52  ;;  %v17066_v4 = vand.u32 4294901760, %v15286_v57  ;;  %v17067_v5 = vand.u32 4294901760, %v15289_v58 }
  0x85   : > { %17246 = vst [vmem:[#allocation24_spill] sm:$0xff] %v15286_v57  ;;  %17247 = vst [vmem:[#allocation25_spill] sm:$0xff] %v15289_v58  ;;  %v598_v46 = vand.u32 4294901760, %v597_v59  ;;  %v608_v53 = vand.u32 4294901760, %v607_v60  ;;  %v15312_v47 = vsub.f32 %v384_v48, %v15297_v61  ;;  %v15315_v36 = vsub.f32 %v387_v49, %v15299_v62 }
  0x86   : > { %12647 = vmatmul.mubr.f32.gmra.mrb[4].mxu0 %v588_v25  ;;  %v617_v32 = vsub.f32 %v15280_v51, %v17062_v1  ;;  %v627_v31 = vsub.f32 %v15283_v52, %v17063_v3  ;;  %v637_v25 = vsub.f32 %v15286_v57, %v17066_v4  ;;  %v647_v48 = vsub.f32 %v15289_v58, %v17067_v5 }
  0x87   : > { %17248 = vst [vmem:[#allocation26_spill] sm:$0xff] %v15312_v47  ;;  %17249 = vst [vmem:[#allocation27_spill] sm:$0xff] %v15315_v36  ;;  %12649 = vmatprep.mubr.f32.mxu0 %v598_v46  ;;  %v17071_v49 = vand.u32 4294901760, %v15312_v47  ;;  %v390_v60 = vsel %vm346_vm0, %v15306_v18, 0  ;;  %v393_v1 = vsel %vm346_vm0, %v15309_v54, 0  ;;  %v396_v59 = vsel %vm346_vm0, %v15128_v8, 0 }
  0x88   : > { %v618_v3 = vand.u32 4294901760, %v617_v32  ;;  %v628_v27 = vand.u32 4294901760, %v627_v31  ;;  %v638_v30 = vand.u32 4294901760, %v637_v25  ;;  %v648_v4 = vand.u32 4294901760, %v647_v48 }
  0x89   : > { %v657_v5 = vsub.f32 %v15312_v47, %v17071_v49  ;;  %v15338_v46 = vand.u32 4294901760, %v390_v60  ;;  %v15340_v29 = vand.u32 4294901760, %v393_v1  ;;  %v323_v58 = vmul.f32 %v15121_v6, %v15121_v6 }
  0x8a   : > { %12650 = vmatmul.mubr.f32.gmra.mrb[6].mxu0 %v608_v53  ;;  %v324_v31 = vmul.f32 %v15124_v7, %v15124_v7  ;;  %v325_v32 = vmul.f32 %v15137_v12, %v15137_v12  ;;  %v17250_v25 = vand.u32 4294901760, %v15315_v36  ;;  %v15359_v8 = vand.u32 4294901760, %v396_v59 }
  0x8b   : > { %12652 = vmatprep.mubr.f32.mxu0 %v618_v3  ;;  %v658_v53 = vand.u32 4294901760, %v657_v5  ;;  %v15354_v49 = vsub.f32 %v390_v60, %v15338_v46  ;;  %v15357_v3 = vsub.f32 %v393_v1, %v15340_v29  ;;  %v399_v47 = vsel %vm346_vm0, %v323_v58, 0 }
  0x8c   : > { %v667_v48 = vsub.f32 %v15315_v36, %v17250_v25  ;;  %17253 = vst [vmem:[#allocation30_spill] sm:$0xff] %v15359_v8  ;;  %v402_v57 = vsel %vm346_vm0, %v324_v31, 0  ;;  %v405_v52 = vsel %vm346_vm0, %v325_v32, 0  ;;  %v15366_v25 = vand.u32 4294901760, %v399_v47 }
  0x8d   : > { %17251 = vst [vmem:[#allocation28_spill] sm:$0xff] %v15354_v49  ;;  %17252 = vst [vmem:[#allocation29_spill] sm:$0xff] %v15357_v3  ;;  %v17090_v5 = vand.u32 4294901760, %v15354_v49  ;;  %v15368_v60 = vand.u32 4294901760, %v402_v57  ;;  %v15371_v1 = vsub.f32 %v396_v59, %v15359_v8  ;;  %v15373_v36 = vand.u32 4294901760, %v405_v52 }
  0x8e   : > { %12653 = vmatmul.mubr.f32.gmra.mrb[8].mxu0 %v628_v27  ;;  %17254 = vst [vmem:[#allocation31_spill] sm:$0xff] %v15366_v25  ;;  %v326_v58 = vmul.f32 %v15140_v13, %v15140_v13  ;;  %v327_v27 = vmul.f32 %v15143_v14, %v15143_v14  ;;  %v668_v31 = vand.u32 4294901760, %v667_v48  ;;  %v15383_v51 = vsub.f32 %v399_v47, %v15366_v25 }
  0x8f   : > { %17255 = vst [vmem:[#allocation32_spill] sm:$0xff] %v15368_v60  ;;  %12655 = vmatprep.mubr.f32.mxu0 %v638_v30  ;;  %17256 = vst [vmem:[#allocation33_spill] sm:$0xff] %v15371_v1  ;;  %v677_v32 = vsub.f32 %v15354_v49, %v17090_v5  ;;  %v15386_v30 = vsub.f32 %v402_v57, %v15368_v60  ;;  %v17093_v59 = vand.u32 4294901760, %v15371_v1  ;;  %v17261_v41 = vand.u32 4294901760, %v15357_v3 }
  0x90   : > { %17257 = vst [vmem:[#allocation34_spill] sm:$0xff] %v15373_v36  ;;  %17258 = vst [vmem:[#allocation35_spill] sm:$0xff] %v15383_v51  ;;  %v15390_v35 = vsub.f32 %v405_v52, %v15373_v36  ;;  %v408_v26 = vsel %vm346_vm0, %v326_v58, 0  ;;  %v411_v42 = vsel %vm346_vm0, %v327_v27, 0  ;;  %v17102_v47 = vand.u32 4294901760, %v15383_v51 }
  0x91   : > { %17259 = vst [vmem:[#allocation36_spill] sm:$0xff] %v15386_v30  ;;  %v678_v48 = vand.u32 4294901760, %v677_v32  ;;  %v687_v5 = vsub.f32 %v15357_v3, %v17261_v41  ;;  %v17105_v57 = vand.u32 4294901760, %v15386_v30  ;;  %v697_v52 = vsub.f32 %v15371_v1, %v17093_v59 }
  0x92   : > { %17260 = vst [vmem:[#allocation37_spill] sm:$0xff] %v15390_v35  ;;  %12656 = vmatmul.mubr.f32.gmra.mrb[10].mxu0 %v648_v4  ;;  %v15403_v58 = vand.u32 4294901760, %v408_v26  ;;  %v15405_v27 = vand.u32 4294901760, %v411_v42  ;;  %v328_v4 = vmul.f32 %v15209_v43, %v15209_v43  ;;  %v329_v41 = vmul.f32 %v15212_v44, %v15212_v44 }
  0x93   : > { %12658 = vmatprep.mubr.f32.mxu0 %v658_v53  ;;  %v707_v53 = vsub.f32 %v15383_v51, %v17102_v47  ;;  %v688_v49 = vand.u32 4294901760, %v687_v5  ;;  %v717_v1 = vsub.f32 %v15386_v30, %v17105_v57  ;;  %v698_v24 = vand.u32 4294901760, %v697_v52 }
  0x94   : > { %17262 = vst [vmem:[#allocation38_spill] sm:$0xff] %v15403_v58  ;;  %17263 = vst [vmem:[#allocation39_spill] sm:$0xff] %v15405_v27  ;;  %v15415_v32 = vsub.f32 %v408_v26, %v15403_v58  ;;  %v15418_v59 = vsub.f32 %v411_v42, %v15405_v27  ;;  %v414_v3 = vsel %vm346_vm0, %v328_v4, 0  ;;  %v417_v28 = vsel %vm346_vm0, %v329_v41, 0 }
  0x95   : > { %v17266_v47 = vand.u32 4294901760, %v15390_v35  ;;  %v15429_v42 = vand.u32 4294901760, %v414_v3  ;;  %v330_v5 = vmul.f32 %v15215_v45, %v15215_v45  ;;  %v331_v4 = vmul.f32 %v15221_v50, %v15221_v50 }
  0x96   : > { %17264 = vst [vmem:[#allocation40_spill] sm:$0xff] %v15415_v32  ;;  %17265 = vst [vmem:[#allocation41_spill] sm:$0xff] %v15418_v59  ;;  %12659 = vmatmul.mubr.f32.gmra.mrb[12].mxu0 %v668_v31  ;;  %v15431_v31 = vand.u32 4294901760, %v417_v28  ;;  %v708_v52 = vand.u32 4294901760, %v707_v53  ;;  %v333_v57 = vmul.f32 %v15229_v56, %v15229_v56  ;;  %v718_v53 = vand.u32 4294901760, %v717_v1 }
  0x97   : > { %12661 = vmatprep.mubr.f32.mxu0 %v678_v48  ;;  %v727_v26 = vsub.f32 %v15390_v35, %v17266_v47  ;;  %17267 = vst [vmem:[#allocation42_spill] sm:$0xff] %v15429_v42  ;;  %v332_v48 = vmul.f32 %v15226_v55, %v15226_v55  ;;  %v15441_v47 = vsub.f32 %v414_v3, %v15429_v42  ;;  %v420_v35 = vsel %vm346_vm0, %v330_v5, 0 }
  0x98   : > { %17268 = vst [vmem:[#allocation43_spill] sm:$0xff] %v15431_v31  ;;  %v15446_v51 = vsub.f32 %v417_v28, %v15431_v31  ;;  %v423_v30 = vsel %vm346_vm0, %v331_v4, 0  ;;  %v17271_v41 = vand.u32 4294901760, %v15415_v32  ;;  %v15455_v42 = vand.u32 4294901760, %v420_v35 }
  0x99   : > { %17269 = vst [vmem:[#allocation44_spill] sm:$0xff] %v15441_v47  ;;  %v426_v23 = vsel %vm346_vm0, %v332_v48, 0  ;;  %v15458_v28 = vand.u32 4294901760, %v423_v30  ;;  %v429_v5 = vsel %vm346_vm0, %v333_v57, 0  ;;  %v728_v4 = vand.u32 4294901760, %v727_v26 }
  0x9a   : > { %12662 = vmatmul.mubr.f32.gmra.mrb[14].mxu0 %v688_v49  ;;  %17270 = vst [vmem:[#allocation45_spill] sm:$0xff] %v15446_v51  ;;  %v737_v3 = vsub.f32 %v15415_v32, %v17271_v41  ;;  %17272 = vst [vmem:[#allocation46_spill] sm:$0xff] %v15455_v42  ;;  %v15460_v31 = vand.u32 4294901760, %v426_v23  ;;  %v15466_v1 = vand.u32 4294901760, %v429_v5  ;;  %v334_v48 = vmul.f32 %v15254_v10, %v15254_v10 }
  0x9b   : > { %12664 = vmatprep.mubr.f32.mxu0 %v698_v24  ;;  %17273 = vst [vmem:[#allocation47_spill] sm:$0xff] %v15458_v28  ;;  %v15464_v24 = vsub.f32 %v420_v35, %v15455_v42  ;;  %v17277_v41 = vand.u32 4294901760, %v15418_v59  ;;  %v15474_v19 = vsub.f32 %v423_v30, %v15458_v28  ;;  %v335_v35 = vmul.f32 %v15257_v11, %v15257_v11 }
  0x9c   : > { %17274 = vst [vmem:[#allocation48_spill] sm:$0xff] %v15460_v31  ;;  %17276 = vst [vmem:[#allocation50_spill] sm:$0xff] %v15466_v1  ;;  %v15477_v32 = vsub.f32 %v426_v23, %v15460_v31  ;;  %v738_v57 = vand.u32 4294901760, %v737_v3  ;;  %v17278_v26 = vand.u32 4294901760, %v15441_v47  ;;  %v432_v27 = vsel %vm346_vm0, %v334_v48, 0 }
  0x9d   : > { %17275 = vst [vmem:[#allocation49_spill] sm:$0xff] %v15464_v24  ;;  %v747_v49 = vsub.f32 %v15418_v59, %v17277_v41  ;;  %v17279_v41 = vand.u32 4294901760, %v15446_v51  ;;  %v15491_v59 = vsub.f32 %v429_v5, %v15466_v1  ;;  %v15493_v31 = vand.u32 4294901760, %v432_v27 }
  0x9e   : > { %12665 = vmatmul.mubr.f32.gmra.mrb[16].mxu0 %v708_v52  ;;  %v757_v42 = vsub.f32 %v15441_v47, %v17278_v26  ;;  %v435_v26 = vsel %vm346_vm0, %v335_v35, 0  ;;  %v336_v48 = vmul.f32 %v15306_v18, %v15306_v18  ;;  %v337_v35 = vmul.f32 %v15309_v54, %v15309_v54 }
  0x9f   : > { %12667 = vmatprep.mubr.f32.mxu0 %v718_v53  ;;  %v767_v30 = vsub.f32 %v15446_v51, %v17279_v41  ;;  %17280 = vst [vmem:[#allocation51_spill] sm:$0xff] %v15493_v31  ;;  %v338_v53 = vmul.f32 %v15215_v45, %v15116_v2  ;;  %v748_v52 = vand.u32 4294901760, %v747_v49  ;;  %v17281_v41 = vand.u32 4294901760, %v15464_v24 }
  0xa0   : > { %v15505_v5 = vsub.f32 %v432_v27, %v15493_v31  ;;  %v15507_v51 = vand.u32 4294901760, %v435_v26  ;;  %v758_v2 = vand.u32 4294901760, %v757_v42  ;;  %v438_v45 = vsel %vm346_vm0, %v336_v48, 0 }
  0xa1   : > { %v777_v23 = vsub.f32 %v15464_v24, %v17281_v41  ;;  %v768_v3 = vand.u32 4294901760, %v767_v30  ;;  %v17285_v27 = vand.u32 4294901760, %v15477_v32  ;;  %v15522_v42 = vand.u32 4294901760, %v438_v45 }
  0xa2   : > { %12668 = vmatmul.mubr.f32.gmra.mrb[18].mxu0 %v728_v4  ;;  %17282 = vst [vmem:[#allocation52_spill] sm:$0xff] %v15505_v5  ;;  %17283 = vst [vmem:[#allocation53_spill] sm:$0xff] %v15507_v51  ;;  %v17284_v4 = vand.u32 4294901760, %v15474_v19  ;;  %v15517_v41 = vsub.f32 %v435_v26, %v15507_v51  ;;  %v441_v48 = vsel %vm346_vm0, %v337_v35, 0  ;;  %v444_v24 = vsel %vm346_vm0, %v338_v53, 0 }
  0xa3   : > { %12670 = vmatprep.mubr.f32.mxu0 %v738_v57  ;;  %v797_v57 = vsub.f32 %v15477_v32, %v17285_v27  ;;  %17286 = vst [vmem:[#allocation54_spill] sm:$0xff] %v15522_v42  ;;  %v778_v30 = vand.u32 4294901760, %v777_v23  ;;  %v15529_v47 = vand.u32 4294901760, %v444_v24  ;;  %v15532_v26 = vsub.f32 %v438_v45, %v15522_v42 }
  0xa4   : > { %v787_v49 = vsub.f32 %v15474_v19, %v17284_v4  ;;  %v15527_v4 = vand.u32 4294901760, %v441_v48  ;;  %v339_v27 = vmul.f32 %v15221_v50, %v15121_v6  ;;  %v340_v35 = vmul.f32 %v15226_v55, %v15124_v7 }
  0xa5   : > { %17288 = vst [vmem:[#allocation56_spill] sm:$0xff] %v15529_v47  ;;  %v17289_v23 = vand.u32 4294901760, %v15491_v59  ;;  %v15548_v45 = vsub.f32 %v444_v24, %v15529_v47  ;;  %vm11860_vm2 = vcmask 46080  }
  0xa6   : > { %12671 = vmatmul.mubr.f32.gmra.mrb[20].mxu0 %v748_v52  ;;  %17287 = vst [vmem:[#allocation55_spill] sm:$0xff] %v15527_v4  ;;  %v341_v52 = vmul.f32 %v15229_v56, %v15137_v12  ;;  %v447_v6 = vsel %vm346_vm0, %v339_v27, 0  ;;  %v450_v50 = vsel %vm346_vm0, %v340_v35, 0  ;;  %v788_v7 = vand.u32 4294901760, %v787_v49 }
  0xa7   : > { %12673 = vmatprep.mubr.f32.mxu0 %v758_v2  ;;  %v807_v53 = vsub.f32 %v15491_v59, %v17289_v23  ;;  %v15545_v2 = vsub.f32 %v441_v48, %v15527_v4  ;;  %v17290_v12 = vand.u32 4294901760, %v15505_v5  ;;  %v15556_v23 = vand.u32 4294901760, %v447_v6 }
  0xa8   : > { %v798_v48 = vand.u32 4294901760, %v797_v57  ;;  %v15558_v31 = vand.u32 4294901760, %v450_v50  ;;  %v453_v24 = vsel %vm346_vm0, %v341_v52, 0  ;;  %v342_v27 = vmul.f32 %v15254_v10, %v15140_v13 }
  0xa9   : > { %v817_v55 = vsub.f32 %v15505_v5, %v17290_v12  ;;  %17291 = vst [vmem:[#allocation57_spill] sm:$0xff] %v15556_v23  ;;  %v343_v35 = vmul.f32 %v15257_v11, %v15143_v14  ;;  %v808_v12 = vand.u32 4294901760, %v807_v53  ;;  %v17139_v56 = vand.u32 4294901760, %v15545_v2 }
  0xaa   : > { %12674 = vmatmul.mubr.f32.gmra.mrb[22].mxu0 %v768_v3  ;;  %17292 = vst [vmem:[#allocation58_spill] sm:$0xff] %v15558_v31  ;;  %v17293_v3 = vand.u32 4294901760, %v15517_v41  ;;  %v456_v57 = vsel %vm346_vm0, %v342_v27, 0  ;;  %v17294_v52 = vand.u32 4294901760, %v15532_v26  ;;  %v15575_v10 = vsub.f32 %v447_v6, %v15556_v23 }
  0xab   : > { %12676 = vmatprep.mubr.f32.mxu0 %v778_v30  ;;  %v17138_v30 = vand.u32 4294901760, %v15548_v45  ;;  %v818_v5 = vand.u32 4294901760, %v817_v55  ;;  %v15580_v14 = vsub.f32 %v450_v50, %v15558_v31  ;;  %v15582_v11 = vand.u32 4294901760, %v456_v57 }
  0xac   : > { %v827_v49 = vsub.f32 %v15517_v41, %v17293_v3  ;;  %v837_v13 = vsub.f32 %v15532_v26, %v17294_v52  ;;  %17295 = vst [vmem:[#allocation59_spill] sm:$0xff] %v15575_v10  ;;  %v15577_v3 = vand.u32 4294901760, %v453_v24  ;;  %v459_v53 = vsel %vm346_vm0, %v343_v35, 0 }
  0xad   : > { %17297 = vst [vmem:[#allocation61_spill] sm:$0xff] %v15582_v11  ;;  %v345_v27 = vmul.f32 %v15309_v54, %v15212_v44  ;;  %v847_v6 = vsub.f32 %v15545_v2, %v17139_v56  ;;  %v857_v50 = vsub.f32 %v15548_v45, %v17138_v30  ;;  %v13868_v35 = vpack.c.bf16 %v15160_v22, %v15158_v21 }
  0xae   : > { %12677 = vmatmul.mubr.f32.gmra.mrb[24].mxu0 %v788_v7  ;;  %17296 = vst [vmem:[#allocation60_spill] sm:$0xff] %v15577_v3  ;;  %v344_v7 = vmul.f32 %v15306_v18, %v15209_v43  ;;  %v828_v55 = vand.u32 4294901760, %v827_v49  ;;  %v838_v52 = vand.u32 4294901760, %v837_v13  ;;  %v17140_v43 = vand.u32 4294901760, %v15575_v10 }
  0xaf   : > { %12679 = vmatprep.mubr.f32.mxu0 %v798_v48  ;;  %v15600_v18 = vsub.f32 %v453_v24, %v15577_v3  ;;  %v15602_v44 = vand.u32 4294901760, %v459_v53  ;;  %v17143_v54 = vand.u32 4294901760, %v15580_v14  ;;  %v15606_v49 = vsub.f32 %v456_v57, %v15582_v11  ;;  %13869 = vmatprep.subr.bf16.mxu0 %v13868_v35 }
  0xb0   : > { %v462_v48 = vsel %vm346_vm0, %v344_v7, 0  ;;  %v465_v7 = vsel %vm346_vm0, %v345_v27, 0  ;;  %v867_v24 = vsub.f32 %v15575_v10, %v17140_v43  ;;  %v858_v57 = vand.u32 4294901760, %v857_v50 }
  0xb1   : > { %17298 = vst [vmem:[#allocation62_spill] sm:$0xff] %v15600_v18  ;;  %17299 = vst [vmem:[#allocation63_spill] sm:$0xff] %v15602_v44  ;;  %v15608_v30 = vand.u32 4294901760, %v462_v48  ;;  %v17144_v13 = vand.u32 4294901760, %v15600_v18  ;;  %v15618_v56 = vand.u32 4294901760, %v465_v7  ;;  %v877_v27 = vsub.f32 %v15580_v14, %v17143_v54 }
  0xb2   : > { %12680 = vmatmul.mubr.f32.gmra.mrb[26].mxu0 %v808_v12  ;;  %v848_v12 = vand.u32 4294901760, %v847_v6  ;;  %v17150_v6 = vand.u32 4294901760, %v15606_v49  ;;  %v868_v43 = vand.u32 4294901760, %v867_v24 }
  0xb3   : > { %12682 = vmatprep.mubr.f32.mxu0 %v818_v5  ;;  %17300 = vst [vmem:[#allocation64_spill] sm:$0xff] %v15608_v30  ;;  %v15616_v5 = vsub.f32 %v459_v53, %v15602_v44  ;;  %17301 = vst [vmem:[#allocation65_spill] sm:$0xff] %v15618_v56  ;;  %v887_v53 = vsub.f32 %v15600_v18, %v17144_v13  ;;  %v878_v50 = vand.u32 4294901760, %v877_v27 }
  0xb4   : > { %v897_v54 = vsub.f32 %v15606_v49, %v17150_v6  ;;  %v17315_v6 = vld [vmem:[#allocation19_spill] sm:$0xff] }
  0xb5   : > { %v17149_v10 = vand.u32 4294901760, %v15616_v5 }
  0xb6   : > { %12683 = vmatmul.mubr.f32.gmra.mrb[28].mxu0 %v828_v55  ;;  %v15625_v55 = vsub.f32 %v462_v48, %v15608_v30  ;;  %v898_v18 = vand.u32 4294901760, %v897_v54  ;;  %v17304_v54 = vld [vmem:[#allocation43_spill] sm:$0xff] }
  0xb7   : > { %12685 = vmatprep.mubr.f32.mxu0 %v838_v52  ;;  %v15632_v52 = vsub.f32 %v465_v7, %v15618_v56  ;;  %v907_v24 = vsub.f32 %v15616_v5, %v17149_v10  ;;  %v17314_v10 = vld [vmem:[#allocation18_spill] sm:$0xff] }
  0xb8   : > { %v17148_v48 = vand.u32 4294901760, %v15625_v55 }
  0xb9   : > { %v17147_v13 = vand.u32 4294901760, %v15632_v52 }
  0xba   : > { %12686 = vmatmul.mubr.f32.gmra.mrb[30].mxu0 %v848_v12  ;;  %v888_v12 = vand.u32 4294901760, %v887_v53  ;;  %v917_v7 = vsub.f32 %v15625_v55, %v17148_v48  ;;  %v17313_v48 = vld [vmem:[#allocation17_spill] sm:$0xff] }
  0xbb   : > { %12688 = vmatprep.mubr.f32.mxu0 %v858_v57  ;;  %v908_v57 = vand.u32 4294901760, %v907_v24  ;;  %v927_v27 = vsub.f32 %v15632_v52, %v17147_v13  ;;  %v17307_v24 = vld [vmem:[#allocation51_spill] sm:$0xff]  ;;  %v17312_v13 = vld [vmem:[#allocation16_spill] sm:$0xff] }
  0xbd   : > { %v928_v53 = vand.u32 4294901760, %v927_v27  ;;  %v17310_v27 = vand.u32 4294901760, %v15160_v22  ;;  %v17319_v22 = vld [vmem:[#allocation23_spill] sm:$0xff] }
  0xbe   : > { %12689 = vmatmul.mubr.f32.gmra.mrb[32].mxu0 %v868_v43  ;;  %v918_v43 = vand.u32 4294901760, %v917_v7  ;;  %v17308_v7 = vld [vmem:[#allocation14_spill] sm:$0xff] }
  0xbf   : > { %12691 = vmatprep.mubr.f32.mxu0 %v878_v50  ;;  %v17305_v50 = vld [vmem:[#allocation46_spill] sm:$0xff] }
  0xc2   : > { %12692 = vmatmul.mubr.f32.gmra.mrb[34].mxu0 %v888_v12  ;;  %v17306_v12 = vld [vmem:[#allocation48_spill] sm:$0xff] }
  0xc3   : > { %12694 = vmatprep.mubr.f32.mxu0 %v898_v18  ;;  %v17303_v18 = vld [vmem:[#allocation42_spill] sm:$0xff] }
  0xc6   : > { %12695 = vmatmul.mubr.f32.gmra.mrb[36].mxu0 %v908_v57  ;;  %v17309_v57 = vand.u32 4294901760, %v15158_v21  ;;  %v17318_v21 = vld [vmem:[#allocation22_spill] sm:$0xff] }
  0xc7   : > { %12697 = vmatprep.mubr.f32.mxu0 %v918_v43 }
  0xc8   : > { %v13876_v43 = vpack.c.bf16 %v17310_v27, %v17309_v57  ;;  %v17320_v57 = vld [vmem:[#allocation24_spill] sm:$0xff]  ;;  %v17321_v27 = vld [vmem:[#allocation25_spill] sm:$0xff] }
  0xca   : > { %12698 = vmatmul.mubr.f32.gmra.mrb[38].mxu0 %v928_v53  ;;  %v17311_v53 = vld [vmem:[#allocation15_spill] sm:$0xff] }
  0xcb   : > { %12704 = vmatprep.mubr.f32.mxu0 %v15130_v9 }
  0xce   : > { %12705 = vmatmul.mubr.f32.vlgmr.msra.gmra.mrb[0].mxu0 %v15147_v16 }
  0xcf   : > { %12707 = vmatprep.mubr.f32.mxu0 %v15149_v17  ;;  %13871 = vmatpush3.bf16.msra.mxu0 %v13868_v35  ;;  %v17302_v35 = vld [vmem:[#allocation39_spill] sm:$0xff] }
  0xd0   : > { %13873 = vmatprep.subr.bf16.mxu0 %v15145_v15 }
  0xd2   : > { %12708 = vmatmul.mubr.f32.gmra.mrb[2].mxu0 %v15156_v20 }
  0xd3   : > { %12710 = vmatprep.mubr.f32.mxu0 %v15182_v33 }
  0xd6   : > { %12711 = vmatmul.mubr.f32.gmra.mrb[4].mxu0 %v15184_v34 }
  0xd7   : > { %12713 = vmatprep.mubr.f32.mxu0 %v15241_v63 }
  0xda   : > { %12714 = vmatmul.mubr.f32.gmra.mrb[6].mxu0 %v15243_v0 }
  0xdb   : > { %12716 = vmatprep.mubr.f32.mxu0 %v15265_v37 }
  0xde   : > { %12717 = vmatmul.mubr.f32.gmra.mrb[8].mxu0 %v15267_v38 }
  0xdf   : > { %12719 = vmatprep.mubr.f32.mxu0 %v15269_v39 }
  0xe2   : > { %12720 = vmatmul.mubr.f32.gmra.mrb[10].mxu0 %v15271_v40 }
  0xe3   : > { %12722 = vmatprep.mubr.f32.mxu0 %v15297_v61 }
  0xe6   : > { %12723 = vmatmul.mubr.f32.gmra.mrb[12].mxu0 %v15299_v62 }
  0xe7   : > { %12725 = vmatprep.mubr.f32.mxu0 %v15338_v46 }
  0xea   : > { %12726 = vmatmul.mubr.f32.gmra.mrb[14].mxu0 %v15340_v29 }
  0xeb   : > { %12728 = vmatprep.mubr.f32.mxu0 %v15359_v8  ;;  %v17343_v8 = vand.u32 4294901760, %v17315_v6 }
  0xee   : > { %12729 = vmatmul.mubr.f32.gmra.mrb[16].mxu0 %v15366_v25  ;;  %v17342_v25 = vand.u32 4294901760, %v17314_v10 }
  0xef   : > { %12731 = vmatprep.mubr.f32.mxu0 %v15368_v60  ;;  %v17341_v60 = vand.u32 4294901760, %v17313_v48 }
  0xf2   : > { %12732 = vmatmul.mubr.f32.gmra.mrb[18].mxu0 %v15373_v36  ;;  %v17340_v36 = vand.u32 4294901760, %v17312_v13 }
  0xf3   : > { %12734 = vmatprep.mubr.f32.mxu0 %v15403_v58  ;;  %v17339_v58 = vand.u32 4294901760, %v17311_v53 }
  0xf6   : > { %12735 = vmatmul.mubr.f32.gmra.mrb[20].mxu0 %v17302_v35  ;;  %v17338_v35 = vand.u32 4294901760, %v17308_v7 }
  0xf7   : > { %12737 = vmatprep.mubr.f32.mxu0 %v17303_v18  ;;  %v17337_v18 = vld [vmem:[#allocation62_spill] sm:$0xff] }
  0xfa   : > { %12738 = vmatmul.mubr.f32.gmra.mrb[22].mxu0 %v17304_v54  ;;  %v17336_v54 = vld [vmem:[#allocation59_spill] sm:$0xff] }
  0xfb   : > { %12740 = vmatprep.mubr.f32.mxu0 %v17305_v50  ;;  %v17335_v50 = vld [vmem:[#allocation52_spill] sm:$0xff] }
  0xfe   : > { %12741 = vmatmul.mubr.f32.gmra.mrb[24].mxu0 %v15458_v28  ;;  %v17334_v28 = vld [vmem:[#allocation49_spill] sm:$0xff] }
  0xff   : > { %12743 = vmatprep.mubr.f32.mxu0 %v17306_v12  ;;  %v17333_v12 = vld [vmem:[#allocation45_spill] sm:$0xff] }
 0x102   : > { %12744 = vmatmul.mubr.f32.gmra.mrb[26].mxu0 %v15466_v1  ;;  %v17332_v1 = vld [vmem:[#allocation44_spill] sm:$0xff] }
 0x103   : > { %12746 = vmatprep.mubr.f32.mxu0 %v17307_v24  ;;  %v17331_v24 = vld [vmem:[#allocation41_spill] sm:$0xff] }
 0x106   : > { %12747 = vmatmul.mubr.f32.gmra.mrb[28].mxu0 %v15507_v51  ;;  %v17330_v51 = vld [vmem:[#allocation40_spill] sm:$0xff] }
 0x107   : > { %12749 = vmatprep.mubr.f32.mxu0 %v15522_v42  ;;  %v17329_v42 = vld [vmem:[#allocation37_spill] sm:$0xff] }
 0x10a   : > { %12750 = vmatmul.mubr.f32.gmra.mrb[30].mxu0 %v15527_v4  ;;  %v17328_v4 = vld [vmem:[#allocation36_spill] sm:$0xff] }
 0x10b   : > { %12752 = vmatprep.mubr.f32.mxu0 %v15529_v47  ;;  %v17327_v47 = vld [vmem:[#allocation35_spill] sm:$0xff] }
 0x10e   : > { %12753 = vmatmul.mubr.f32.gmra.mrb[32].mxu0 %v15556_v23  ;;  %v17326_v23 = vld [vmem:[#allocation33_spill] sm:$0xff] }
 0x10f   : > { %12755 = vmatprep.mubr.f32.mxu0 %v15558_v31  ;;  %v17325_v31 = vld [vmem:[#allocation29_spill] sm:$0xff] }
 0x112   : > { %12756 = vmatmul.mubr.f32.gmra.mrb[34].mxu0 %v15577_v3  ;;  %v17324_v3 = vld [vmem:[#allocation28_spill] sm:$0xff] }
 0x113   : > { %12758 = vmatprep.mubr.f32.mxu0 %v15582_v11  ;;  %v17323_v11 = vld [vmem:[#allocation27_spill] sm:$0xff] }
 0x116   : > { %12759 = vmatmul.mubr.f32.gmra.mrb[36].mxu0 %v15602_v44  ;;  %v17322_v44 = vld [vmem:[#allocation26_spill] sm:$0xff] }
 0x117   : > { %12761 = vmatprep.mubr.f32.mxu0 %v15608_v30  ;;  %v17317_v30 = vld [vmem:[#allocation21_spill] sm:$0xff] }
 0x11a   : > { %12762 = vmatmul.mubr.f32.gmra.mrb[38].mxu0 %v15618_v56  ;;  %v17316_v56 = vld [vmem:[#allocation20_spill] sm:$0xff] }
 0x11b   : > { %12768 = vmatprep.mubr.f32.mxu0 %v17308_v7  ;;  %v17356_v7 = vand.u32 4294901760, %v17328_v4 }
 0x11e   : > { %12769 = vmatmul.mubr.f32.vlgmr.msra.gmra.mrb[0].mxu0 %v17311_v53  ;;  %v17387_v53 = vld [vmem:[#allocation47_spill] sm:$0xff] }
 0x11f   : > { %12771 = vmatprep.mubr.f32.mxu0 %v17312_v13  ;;  %13875 = vmatpush3.bf16.msra.mxu0 %v15145_v15  ;;  %v17347_v13 = vand.u32 4294901760, %v17319_v22 }
 0x120   : > { %13877 = vmatprep.subr.bf16.mxu0 %v13876_v43 }
 0x122   : > { %12772 = vmatmul.mubr.f32.gmra.mrb[2].mxu0 %v17313_v48  ;;  %v17355_v48 = vand.u32 4294901760, %v17327_v47 }
 0x123   : > { %12774 = vmatprep.mubr.f32.mxu0 %v17314_v10  ;;  %v17353_v10 = vand.u32 4294901760, %v17325_v31 }
 0x126   : > { %12775 = vmatmul.mubr.f32.gmra.mrb[4].mxu0 %v17315_v6  ;;  %v17354_v6 = vand.u32 4294901760, %v17326_v23 }
 0x127   : > { %12777 = vmatprep.mubr.f32.mxu0 %v17316_v56 }
 0x12a   : > { %12778 = vmatmul.mubr.f32.gmra.mrb[6].mxu0 %v17317_v30 }
 0x12b   : > { %12780 = vmatprep.mubr.f32.mxu0 %v17318_v21 }
 0x12e   : > { %12781 = vmatmul.mubr.f32.gmra.mrb[8].mxu0 %v17319_v22  ;;  %v17389_v22 = vld [vmem:[#allocation50_spill] sm:$0xff] }
 0x12f   : > { %12783 = vmatprep.mubr.f32.mxu0 %v17320_v57 }
 0x132   : > { %12784 = vmatmul.mubr.f32.gmra.mrb[10].mxu0 %v17321_v27 }
 0x133   : > { %12786 = vmatprep.mubr.f32.mxu0 %v17322_v44 }
 0x136   : > { %12787 = vmatmul.mubr.f32.gmra.mrb[12].mxu0 %v17323_v11 }
 0x137   : > { %12789 = vmatprep.mubr.f32.mxu0 %v17324_v3 }
 0x13a   : > { %12790 = vmatmul.mubr.f32.gmra.mrb[14].mxu0 %v17325_v31  ;;  %v17360_v31 = vand.u32 4294901760, %v17332_v1 }
 0x13b   : > { %12792 = vmatprep.mubr.f32.mxu0 %v17326_v23  ;;  %v17361_v23 = vand.u32 4294901760, %v17333_v12 }
 0x13e   : > { %12793 = vmatmul.mubr.f32.gmra.mrb[16].mxu0 %v17327_v47  ;;  %v17362_v47 = vand.u32 4294901760, %v17334_v28 }
 0x13f   : > { %12795 = vmatprep.mubr.f32.mxu0 %v17328_v4  ;;  %v17363_v4 = vand.u32 4294901760, %v15474_v19 }
 0x142   : > { %12796 = vmatmul.mubr.f32.gmra.mrb[18].mxu0 %v17329_v42 }
 0x143   : > { %12798 = vmatprep.mubr.f32.mxu0 %v17330_v51 }
 0x146   : > { %12799 = vmatmul.mubr.f32.gmra.mrb[20].mxu0 %v17331_v24 }
 0x147   : > { %12801 = vmatprep.mubr.f32.mxu0 %v17332_v1  ;;  %v17367_v1 = vand.u32 4294901760, %v15517_v41 }
 0x14a   : > { %12802 = vmatmul.mubr.f32.gmra.mrb[22].mxu0 %v17333_v12  ;;  %v17368_v12 = vand.u32 4294901760, %v15532_v26 }
 0x14b   : > { %12804 = vmatprep.mubr.f32.mxu0 %v17334_v28  ;;  %v17369_v28 = vand.u32 4294901760, %v15545_v2 }
 0x14e   : > { %12805 = vmatmul.mubr.f32.gmra.mrb[24].mxu0 %v15474_v19  ;;  %v17370_v19 = vand.u32 4294901760, %v15548_v45 }
 0x14f   : > { %12807 = vmatprep.mubr.f32.mxu0 %v15477_v32 }
 0x152   : > { %12808 = vmatmul.mubr.f32.gmra.mrb[26].mxu0 %v15491_v59 }
 0x153   : > { %12810 = vmatprep.mubr.f32.mxu0 %v17335_v50 }
 0x156   : > { %12811 = vmatmul.mubr.f32.gmra.mrb[28].mxu0 %v15517_v41  ;;  %v17374_v41 = vand.u32 4294901760, %v15606_v49 }
 0x157   : > { %12813 = vmatprep.mubr.f32.mxu0 %v15532_v26  ;;  %v17375_v26 = vand.u32 4294901760, %v15616_v5 }
 0x15a   : > { %12814 = vmatmul.mubr.f32.gmra.mrb[30].mxu0 %v15545_v2  ;;  %v17376_v2 = vand.u32 4294901760, %v15625_v55 }
 0x15b   : > { %12816 = vmatprep.mubr.f32.mxu0 %v15548_v45  ;;  %v17377_v45 = vand.u32 4294901760, %v15632_v52 }
 0x15e   : > { %12817 = vmatmul.mubr.f32.gmra.mrb[32].mxu0 %v17336_v54 }
 0x15f   : > { %12819 = vmatprep.mubr.f32.mxu0 %v15580_v14 }
 0x162   : > { %12820 = vmatmul.mubr.f32.gmra.mrb[34].mxu0 %v17337_v18 }
 0x163   : > { %12822 = vmatprep.mubr.f32.mxu0 %v15606_v49  ;;  %v17380_v49 = vld [vmem:[#allocation32_spill] sm:$0xff] }
 0x166   : > { %12823 = vmatmul.mubr.f32.gmra.mrb[36].mxu0 %v15616_v5  ;;  %v17381_v5 = vld [vmem:[#allocation34_spill] sm:$0xff] }
 0x167   : > { %12825 = vmatprep.mubr.f32.mxu0 %v15625_v55  ;;  %v17382_v55 = vld [vmem:[#allocation38_spill] sm:$0xff] }
 0x16a   : > { %12826 = vmatmul.mubr.f32.gmra.mrb[38].mxu0 %v15632_v52  ;;  %v17383_v52 = vld [vmem:[#allocation39_spill] sm:$0xff] }
 0x16b   : > { %12832 = vmatprep.mubr.f32.mxu0 %v17338_v35  ;;  %v17344_v35 = vand.u32 4294901760, %v17316_v56  ;;  %v17351_v56 = vand.u32 4294901760, %v17323_v11  ;;  %v17358_v11 = vand.u32 4294901760, %v17330_v51  ;;  %v17365_v51 = vand.u32 4294901760, %v15491_v59 }
 0x16c   : > { %v17372_v59 = vand.u32 4294901760, %v15580_v14  ;;  %v17379_v14 = vld [vmem:[#allocation31_spill] sm:$0xff] }
 0x16e   : > { %12833 = vmatmul.mubr.f32.vlgmr.msra.gmra.mrb[0].mxu0 %v17339_v58  ;;  %v17345_v58 = vand.u32 4294901760, %v17317_v30  ;;  %v17352_v30 = vand.u32 4294901760, %v17324_v3  ;;  %v17359_v3 = vand.u32 4294901760, %v17331_v24  ;;  %v17366_v24 = vand.u32 4294901760, %v17335_v50 }
 0x16f   : > { %12835 = vmatprep.mubr.f32.mxu0 %v17340_v36  ;;  %13879 = vmatpush3.bf16.msra.mxu0 %v13876_v43  ;;  %v17346_v36 = vand.u32 4294901760, %v17318_v21  ;;  %v17373_v50 = vand.u32 4294901760, %v17337_v18  ;;  %v17384_v18 = vld [vmem:[#allocation42_spill] sm:$0xff]  ;;  %v17388_v21 = vld [vmem:[#allocation48_spill] sm:$0xff] }
 0x170   : > { %13881 = vmatprep.subr.bf16.mxu0 %v15145_v15  ;;  %v17386_v43 = vld [vmem:[#allocation46_spill] sm:$0xff] }
 0x172   : > { %12836 = vmatmul.mubr.f32.gmra.mrb[2].mxu0 %v17341_v60  ;;  %v17348_v60 = vand.u32 4294901760, %v17320_v57  ;;  %v17390_v57 = vld [vmem:[#allocation51_spill] sm:$0xff] }
 0x173   : > { %12838 = vmatprep.mubr.f32.mxu0 %v17342_v25  ;;  %v17349_v25 = vand.u32 4294901760, %v17321_v27  ;;  %v17391_v27 = vld [vmem:[#allocation53_spill] sm:$0xff] }
 0x176   : > { %12839 = vmatmul.mubr.f32.gmra.mrb[4].mxu0 %v17343_v8  ;;  %v17350_v8 = vand.u32 4294901760, %v17322_v44  ;;  %v17357_v44 = vand.u32 4294901760, %v17329_v42  ;;  %v17364_v42 = vand.u32 4294901760, %v15477_v32  ;;  %v17371_v32 = vand.u32 4294901760, %v17336_v54  ;;  %v17385_v54 = vld [vmem:[#allocation43_spill] sm:$0xff] }
 0x177   : > { %12841 = vmatprep.mubr.f32.mxu0 %v17344_v35  ;;  %v17392_v35 = vld [vmem:[#allocation54_spill] sm:$0xff] }
 0x17a   : > { %12842 = vmatmul.mubr.f32.gmra.mrb[6].mxu0 %v17345_v58  ;;  %v17393_v58 = vld [vmem:[#allocation55_spill] sm:$0xff] }
 0x17b   : > { %12844 = vmatprep.mubr.f32.mxu0 %v17346_v36  ;;  %v17394_v36 = vld [vmem:[#allocation56_spill] sm:$0xff] }
 0x17e   : > { %12845 = vmatmul.mubr.f32.gmra.mrb[8].mxu0 %v17347_v13  ;;  %v17395_v13 = vld [vmem:[#allocation57_spill] sm:$0xff] }
 0x17f   : > { %12847 = vmatprep.mubr.f32.mxu0 %v17348_v60  ;;  %v17396_v60 = vld [vmem:[#allocation58_spill] sm:$0xff] }
 0x182   : > { %12848 = vmatmul.mubr.f32.gmra.mrb[10].mxu0 %v17349_v25  ;;  %v17397_v25 = vld [vmem:[#allocation60_spill] sm:$0xff] }
 0x183   : > { %12850 = vmatprep.mubr.f32.mxu0 %v17350_v8  ;;  %v17398_v8 = vld [vmem:[#allocation61_spill] sm:$0xff] }
 0x186   : > { %12851 = vmatmul.mubr.f32.gmra.mrb[12].mxu0 %v17351_v56  ;;  %v17399_v56 = vld [vmem:[#allocation63_spill] sm:$0xff] }
 0x187   : > { %12853 = vmatprep.mubr.f32.mxu0 %v17352_v30  ;;  %v17400_v30 = vld [vmem:[#allocation64_spill] sm:$0xff] }
 0x18a   : > { %12854 = vmatmul.mubr.f32.gmra.mrb[14].mxu0 %v17353_v10  ;;  %v17401_v10 = vld [vmem:[#allocation65_spill] sm:$0xff] }
 0x18b   : > { %12856 = vmatprep.mubr.f32.mxu0 %v17354_v6 }
 0x18e   : > { %12857 = vmatmul.mubr.f32.gmra.mrb[16].mxu0 %v17355_v48 }
 0x18f   : > { %12859 = vmatprep.mubr.f32.mxu0 %v17356_v7 }
 0x192   : > { %12860 = vmatmul.mubr.f32.gmra.mrb[18].mxu0 %v17357_v44 }
 0x193   : > { %12862 = vmatprep.mubr.f32.mxu0 %v17358_v11 }
 0x196   : > { %12863 = vmatmul.mubr.f32.gmra.mrb[20].mxu0 %v17359_v3 }
 0x197   : > { %12865 = vmatprep.mubr.f32.mxu0 %v17360_v31 }
 0x19a   : > { %12866 = vmatmul.mubr.f32.gmra.mrb[22].mxu0 %v17361_v23 }
 0x19b   : > { %12868 = vmatprep.mubr.f32.mxu0 %v17362_v47 }
 0x19e   : > { %12869 = vmatmul.mubr.f32.gmra.mrb[24].mxu0 %v17363_v4 }
 0x19f   : > { %12871 = vmatprep.mubr.f32.mxu0 %v17364_v42 }
 0x1a2   : > { %12872 = vmatmul.mubr.f32.gmra.mrb[26].mxu0 %v17365_v51 }
 0x1a3   : > { %12874 = vmatprep.mubr.f32.mxu0 %v17366_v24 }
 0x1a6   : > { %12875 = vmatmul.mubr.f32.gmra.mrb[28].mxu0 %v17367_v1 }
 0x1a7   : > { %12877 = vmatprep.mubr.f32.mxu0 %v17368_v12 }
 0x1aa   : > { %12878 = vmatmul.mubr.f32.gmra.mrb[30].mxu0 %v17369_v28 }
 0x1ab   : > { %12880 = vmatprep.mubr.f32.mxu0 %v17370_v19 }
 0x1ae   : > { %12881 = vmatmul.mubr.f32.gmra.mrb[32].mxu0 %v17371_v32 }
 0x1af   : > { %12883 = vmatprep.mubr.f32.mxu0 %v17372_v59 }
 0x1b2   : > { %12884 = vmatmul.mubr.f32.gmra.mrb[34].mxu0 %v17373_v50 }
 0x1b3   : > { %12886 = vmatprep.mubr.f32.mxu0 %v17374_v41 }
 0x1b6   : > { %12887 = vmatmul.mubr.f32.gmra.mrb[36].mxu0 %v17375_v26 }
 0x1b7   : > { %12889 = vmatprep.mubr.f32.mxu0 %v17376_v2 }
 0x1ba   : > { %12890 = vmatmul.mubr.f32.gmra.mrb[38].mxu0 %v17377_v45 }
 0x1bb   : > { %12896 = vmatprep.mubr.f32.mxu0 %v15130_v9 }
 0x1be   : > { %12897 = vmatmul.mubr.f32.vlgmr.msra.gmra.mrb[0].mxu0 %v15147_v16 }
 0x1bf   : > { %12899 = vmatprep.mubr.f32.mxu0 %v15149_v17  ;;  %13883 = vmatpush3.bf16.msra.mxu0 %v15145_v15  ;;  %v17378_v15 = vld [vmem:[#allocation30_spill] sm:$0xff] }
 0x1c2   : > { %12900 = vmatmul.mubr.f32.gmra.mrb[2].mxu0 %v15156_v20 }
 0x1c3   : > { %12902 = vmatprep.mubr.f32.mxu0 %v15182_v33 }
 0x1c6   : > { %12903 = vmatmul.mubr.f32.gmra.mrb[4].mxu0 %v15184_v34 }
 0x1c7   : > { %12905 = vmatprep.mubr.f32.mxu0 %v15241_v63 }
 0x1ca   : > { %12906 = vmatmul.mubr.f32.gmra.mrb[6].mxu0 %v15243_v0 }
 0x1cb   : > { %12908 = vmatprep.mubr.f32.mxu0 %v15265_v37 }
 0x1ce   : > { %12909 = vmatmul.mubr.f32.gmra.mrb[8].mxu0 %v15267_v38 }
 0x1cf   : > { %12911 = vmatprep.mubr.f32.mxu0 %v15269_v39 }
 0x1d2   : > { %12912 = vmatmul.mubr.f32.gmra.mrb[10].mxu0 %v15271_v40 }
 0x1d3   : > { %12914 = vmatprep.mubr.f32.mxu0 %v15297_v61 }
 0x1d6   : > { %12915 = vmatmul.mubr.f32.gmra.mrb[12].mxu0 %v15299_v62 }
 0x1d7   : > { %12917 = vmatprep.mubr.f32.mxu0 %v15338_v46 }
 0x1da   : > { %12918 = vmatmul.mubr.f32.gmra.mrb[14].mxu0 %v15340_v29 }
 0x1db   : > { %12920 = vmatprep.mubr.f32.mxu0 %v17378_v15 }
 0x1de   : > { %12921 = vmatmul.mubr.f32.gmra.mrb[16].mxu0 %v17379_v14 }
 0x1df   : > { %12923 = vmatprep.mubr.f32.mxu0 %v17380_v49 }
 0x1e2   : > { %12924 = vmatmul.mubr.f32.gmra.mrb[18].mxu0 %v17381_v5 }
 0x1e3   : > { %12926 = vmatprep.mubr.f32.mxu0 %v17382_v55 }
 0x1e6   : > { %12927 = vmatmul.mubr.f32.gmra.mrb[20].mxu0 %v17383_v52 }
 0x1e7   : > { %12929 = vmatprep.mubr.f32.mxu0 %v17384_v18 }
 0x1ea   : > { %12930 = vmatmul.mubr.f32.gmra.mrb[22].mxu0 %v17385_v54 }
 0x1eb   : > { %12932 = vmatprep.mubr.f32.mxu0 %v17386_v43 }
 0x1ee   : > { %12933 = vmatmul.mubr.f32.gmra.mrb[24].mxu0 %v17387_v53 }
 0x1ef   : > { %12935 = vmatprep.mubr.f32.mxu0 %v17388_v21 }
 0x1f2   : > { %12936 = vmatmul.mubr.f32.gmra.mrb[26].mxu0 %v17389_v22 }
 0x1f3   : > { %12938 = vmatprep.mubr.f32.mxu0 %v17390_v57 }
 0x1f6   : > { %12939 = vmatmul.mubr.f32.gmra.mrb[28].mxu0 %v17391_v27 }
 0x1f7   : > { %12941 = vmatprep.mubr.f32.mxu0 %v17392_v35 }
 0x1fa   : > { %12942 = vmatmul.mubr.f32.gmra.mrb[30].mxu0 %v17393_v58 }
 0x1fb   : > { %12944 = vmatprep.mubr.f32.mxu0 %v17394_v36 }
 0x1fe   : > { %12945 = vmatmul.mubr.f32.gmra.mrb[32].mxu0 %v17395_v13 }
 0x1ff   : > { %12947 = vmatprep.mubr.f32.mxu0 %v17396_v60 }
 0x202   : > { %12948 = vmatmul.mubr.f32.gmra.mrb[34].mxu0 %v17397_v25 }
 0x203   : > { %12950 = vmatprep.mubr.f32.mxu0 %v17398_v8 }
 0x206   : > { %12951 = vmatmul.mubr.f32.gmra.mrb[36].mxu0 %v17399_v56 }
 0x207   : > { %12953 = vmatprep.mubr.f32.mxu0 %v17400_v30 }
 0x20a   : > { %12954 = vmatmul.mubr.f32.gmra.mrb[38].mxu0 %v17401_v10 }
 0x20b   : > { %12960 = vmatprep.mubr.f32.mxu0 %v15130_v9  ;;  %v17187_v9 = vmov 0.0|0.0  }
 0x20c   : > { %13884 = vmatprep.subr.bf16.mxu1 %v17187_v9 }
 0x20e   : > { %12961 = vmatmul.mubr.f32.vlgmr.msra.gmra.mrb[0].mxu0 %v15147_v16  ;;  %v17190_v16 = vmov 0.0  }
 0x20f   : > { %12963 = vmatprep.mubr.f32.mxu0 %v15149_v17  ;;  %13024 = vmatprep.mubr.msk.f32.mxu1 %vm14878_vm1, %v17190_v16  ;;  %v319_v17 = vld [vmem:[%s17049_s3] sm:$0x3f] }
 0x212   : > { %12964 = vmatmul.mubr.f32.gmra.mrb[2].mxu0 %v15156_v20  ;;  %v2604_v20 = vsel %vm346_vm0, %v319_v17, 0 }
 0x213   : > { %12966 = vmatprep.mubr.f32.mxu0 %v15182_v33 }
 0x216   : > { %12967 = vmatmul.mubr.f32.gmra.mrb[4].mxu0 %v15184_v34 }
 0x217   : > { %12969 = vmatprep.mubr.f32.mxu0 %v15241_v63 }
 0x21a   : > { %12970 = vmatmul.mubr.f32.gmra.mrb[6].mxu0 %v15243_v0 }
 0x21b   : > { %12972 = vmatprep.mubr.f32.mxu0 %v15265_v37 }
 0x21e   : > { %12973 = vmatmul.mubr.f32.gmra.mrb[8].mxu0 %v15267_v38 }
 0x21f   : > { %12975 = vmatprep.mubr.f32.mxu0 %v15269_v39 }
 0x222   : > { %12976 = vmatmul.mubr.f32.gmra.mrb[10].mxu0 %v15271_v40 }
 0x223   : > { %12978 = vmatprep.mubr.f32.mxu0 %v15297_v61 }
 0x226   : > { %12979 = vmatmul.mubr.f32.gmra.mrb[12].mxu0 %v15299_v62 }
 0x227   : > { %12981 = vmatprep.mubr.f32.mxu0 %v15338_v46 }
 0x22a   : > { %12982 = vmatmul.mubr.f32.gmra.mrb[14].mxu0 %v15340_v29  ;;  %v15903_v29 = vand.u32 4294901760, %v2604_v20 }
 0x22b   : > { %12984 = vmatprep.mubr.f32.mxu0 %v17378_v15 }
 0x22c   : > { %v15906_v33 = vsub.f32 %v2604_v20, %v15903_v29 }
 0x22e   : > { %12985 = vmatmul.mubr.f32.gmra.mrb[16].mxu0 %v17379_v14  ;;  %v15909_v34 = vand.u32 4294901760, %v15906_v33 }
 0x22f   : > { %12987 = vmatprep.mubr.f32.mxu0 %v17380_v49 }
 0x230   : > { %v2676_v38 = vsub.f32 %v15906_v33, %v15909_v34 }
 0x232   : > { %12988 = vmatmul.mubr.f32.gmra.mrb[18].mxu0 %v17381_v5  ;;  %v15920_v44 = vand.u32 4294901760, %v2676_v38 }
 0x233   : > { %12990 = vmatprep.mubr.f32.mxu0 %v17382_v55 }
 0x236   : > { %12991 = vmatmul.mubr.f32.gmra.mrb[20].mxu0 %v17383_v52 }
 0x237   : > { %12993 = vmatprep.mubr.f32.mxu0 %v17384_v18 }
 0x23a   : > { %12994 = vmatmul.mubr.f32.gmra.mrb[22].mxu0 %v17385_v54 }
 0x23b   : > { %12996 = vmatprep.mubr.f32.mxu0 %v17386_v43 }
 0x23e   : > { %12997 = vmatmul.mubr.f32.gmra.mrb[24].mxu0 %v17387_v53 }
 0x23f   : > { %12999 = vmatprep.mubr.f32.mxu0 %v17388_v21 }
 0x242   : > { %13000 = vmatmul.mubr.f32.gmra.mrb[26].mxu0 %v17389_v22 }
 0x243   : > { %13002 = vmatprep.mubr.f32.mxu0 %v17390_v57 }
 0x246   : > { %13003 = vmatmul.mubr.f32.gmra.mrb[28].mxu0 %v17391_v27 }
 0x247   : > { %13005 = vmatprep.mubr.f32.mxu0 %v17392_v35 }
 0x24a   : > { %13006 = vmatmul.mubr.f32.gmra.mrb[30].mxu0 %v17393_v58 }
 0x24b   : > { %13008 = vmatprep.mubr.f32.mxu0 %v17394_v36 }
 0x24e   : > { %13009 = vmatmul.mubr.f32.gmra.mrb[32].mxu0 %v17395_v13 }
 0x24f   : > { %13011 = vmatprep.mubr.f32.mxu0 %v17396_v60 }
 0x252   : > { %13012 = vmatmul.mubr.f32.gmra.mrb[34].mxu0 %v17397_v25 }
 0x253   : > { %13014 = vmatprep.mubr.f32.mxu0 %v17398_v8 }
 0x256   : > { %13015 = vmatmul.mubr.f32.gmra.mrb[36].mxu0 %v17399_v56 }
 0x257   : > { %13017 = vmatprep.mubr.f32.mxu0 %v17400_v30 }
 0x25a   : > { %13018 = vmatmul.mubr.f32.gmra.mrb[38].mxu0 %v17401_v10 }
 0x2e1   : > { %v12962_v63 = vpop.f32.mrb[0].mxu0 }
 0x2e2   : > { %v2610_v0 = vand.u32 4294901760, %v12962_v63  ;;  %v2365_v37 = vpop.f32.mrb[1].mxu0 }
 0x2e3   : > { %v2607_v39 = vand.u32 4294901760, %v2365_v37 }
 0x2e4   : > { %v15913_v40 = vsub.f32 %v12962_v63, %v2610_v0 }
 0x2e5   : > { %v15915_v61 = vpack.c.bf16 %v2610_v0, %v2607_v39  ;;  %v15917_v62 = vsub.f32 %v2365_v37, %v2607_v39  ;;  %v12965_v46 = vpop.f32.mrb[2].mxu0 }
 0x2e6   : > { %v2693_v6 = vand.u32 4294901760, %v15913_v40  ;;  %v3069_v48 = vand.u32 4294901760, %v12965_v46  ;;  %v2377_v7 = vpop.f32.mrb[3].mxu0 }
 0x2e7   : > { %v2686_v11 = vand.u32 4294901760, %v15917_v62  ;;  %v13891_v3 = vpack.c.bf16 %v15913_v40, %v15917_v62  ;;  %v3066_v31 = vand.u32 4294901760, %v2377_v7  ;;  %13886 = vmatpush3.bf16.msra.mxu1 %v15915_v61 }
 0x2e8   : > { %v2694_v23 = vsub.f32 %v15913_v40, %v2693_v6  ;;  %v15927_v47 = vsub.f32 %v12965_v46, %v3069_v48  ;;  %13887 = vmatprep.subr.bf16.mxu1 %v17187_v9 }
 0x2e9   : > { %v2687_v4 = vsub.f32 %v15917_v62, %v2686_v11  ;;  %v15931_v42 = vpack.c.bf16 %v3069_v48, %v3066_v31  ;;  %v15933_v51 = vsub.f32 %v2377_v7, %v3066_v31  ;;  %v12968_v24 = vpop.f32.mrb[4].mxu0  ;;  %v15935_v1 = vpack.c.bf16 %v2693_v6, %v2686_v11 }
 0x2ea   : > { %v2695_v12 = vand.u32 4294901760, %v2694_v23  ;;  %v3152_v28 = vand.u32 4294901760, %v15927_v47  ;;  %v3528_v19 = vand.u32 4294901760, %v12968_v24  ;;  %v2389_v32 = vpop.f32.mrb[5].mxu0  ;;  %13025 = vmatmul.mubr.f32.vlgmr.msra.gmra.mrb[0].mxu1 %v15920_v44 }
 0x2eb   : > { %v2688_v59 = vand.u32 4294901760, %v2687_v4  ;;  %v3145_v50 = vand.u32 4294901760, %v15933_v51  ;;  %v3525_v26 = vand.u32 4294901760, %v2389_v32  ;;  %13031 = vmatprep.mubr.msk.f32.mxu1 %vm14878_vm1, %v17190_v16 }
 0x2ec   : > { %v3153_v2 = vsub.f32 %v15927_v47, %v3152_v28  ;;  %v15945_v45 = vsub.f32 %v12968_v24, %v3528_v19 }
 0x2ed   : > { %v3146_v15 = vsub.f32 %v15933_v51, %v3145_v50  ;;  %v15948_v14 = vpack.c.bf16 %v3528_v19, %v3525_v26  ;;  %v15950_v49 = vsub.f32 %v2389_v32, %v3525_v26  ;;  %v12971_v5 = vpop.f32.mrb[6].mxu0  ;;  %v13888_v55 = vpack.c.bf16 %v2695_v12, %v2688_v59 }
 0x2ee   : > { %v3154_v52 = vand.u32 4294901760, %v3153_v2  ;;  %v3611_v18 = vand.u32 4294901760, %v15945_v45  ;;  %v3987_v54 = vand.u32 4294901760, %v12971_v5  ;;  %v2401_v43 = vpop.f32.mrb[7].mxu0  ;;  %v15953_v53 = vpack.c.bf16 %v3152_v28, %v3145_v50 }
 0x2ef   : > { %v3147_v21 = vand.u32 4294901760, %v3146_v15  ;;  %v3604_v22 = vand.u32 4294901760, %v15950_v49  ;;  %v3984_v27 = vand.u32 4294901760, %v2401_v43  ;;  %13889 = vmatpush3.bf16.msra.mxu1 %v13888_v55 }
 0x2f0   : > { %v3612_v35 = vsub.f32 %v15945_v45, %v3611_v18  ;;  %v15959_v58 = vsub.f32 %v12971_v5, %v3987_v54  ;;  %13890 = vmatprep.subr.bf16.mxu1 %v17187_v9 }
 0x2f1   : > { %v3605_v36 = vsub.f32 %v15950_v49, %v3604_v22  ;;  %v15963_v13 = vpack.c.bf16 %v3987_v54, %v3984_v27  ;;  %v15965_v60 = vsub.f32 %v2401_v43, %v3984_v27  ;;  %v12974_v25 = vpop.f32.mrb[8].mxu0  ;;  %v15967_v8 = vpack.c.bf16 %v3154_v52, %v3147_v21 }
 0x2f2   : > { %v3613_v56 = vand.u32 4294901760, %v3612_v35  ;;  %v4070_v30 = vand.u32 4294901760, %v15959_v58  ;;  %v4446_v10 = vand.u32 4294901760, %v12974_v25  ;;  %v2413_v17 = vpop.f32.mrb[9].mxu0  ;;  %13032 = vmatmul.mubr.f32.vlgmr.msra.gmra.mrb[0].mxu1 %v15903_v29  ;;  %v15971_v20 = vpack.c.bf16 %v3611_v18, %v3604_v22 }
 0x2f3   : > { %v3606_v63 = vand.u32 4294901760, %v3605_v36  ;;  %v4063_v0 = vand.u32 4294901760, %v15965_v60  ;;  %v4443_v38 = vand.u32 4294901760, %v2413_v17  ;;  %13892 = vmatpush3.bf16.msra.mxu1 %v13891_v3  ;;  %13038 = vmatprep.mubr.msk.f32.mxu1 %vm14878_vm1, %v17190_v16 }
 0x2f4   : > { %v4071_v39 = vsub.f32 %v15959_v58, %v4070_v30  ;;  %v15979_v40 = vsub.f32 %v12974_v25, %v4446_v10  ;;  %13893 = vmatprep.subr.bf16.mxu1 %v17187_v9 }
 0x2f5   : > { %v4064_v62 = vsub.f32 %v15965_v60, %v4063_v0  ;;  %v15983_v46 = vpack.c.bf16 %v4446_v10, %v4443_v38  ;;  %v15985_v6 = vsub.f32 %v2413_v17, %v4443_v38  ;;  %v12977_v48 = vpop.f32.mrb[10].mxu0  ;;  %v15987_v7 = vpack.c.bf16 %v3613_v56, %v3606_v63 }
 0x2f6   : > { %v4072_v11 = vand.u32 4294901760, %v4071_v39  ;;  %v4529_v3 = vand.u32 4294901760, %v15979_v40  ;;  %v4905_v31 = vand.u32 4294901760, %v12977_v48  ;;  %v2425_v23 = vpop.f32.mrb[11].mxu0  ;;  %v15990_v4 = vpack.c.bf16 %v4070_v30, %v4063_v0 }
 0x2f7   : > { %v4065_v24 = vand.u32 4294901760, %v4064_v62  ;;  %v4522_v12 = vand.u32 4294901760, %v15985_v6  ;;  %v4902_v19 = vand.u32 4294901760, %v2425_v23 }
 0x2f8   : > { %v4530_v32 = vsub.f32 %v15979_v40, %v4529_v3  ;;  %v15996_v59 = vsub.f32 %v12977_v48, %v4905_v31 }
 0x2f9   : > { %v4523_v50 = vsub.f32 %v15985_v6, %v4522_v12  ;;  %v15999_v26 = vpack.c.bf16 %v4905_v31, %v4902_v19  ;;  %v16001_v2 = vsub.f32 %v2425_v23, %v4902_v19  ;;  %v12980_v15 = vpop.f32.mrb[12].mxu0  ;;  %v16003_v5 = vpack.c.bf16 %v4072_v11, %v4065_v24 }
 0x2fa   : > { %v4531_v55 = vand.u32 4294901760, %v4530_v32  ;;  %v4988_v52 = vand.u32 4294901760, %v15996_v59  ;;  %v5364_v18 = vand.u32 4294901760, %v12980_v15  ;;  %v2437_v54 = vpop.f32.mrb[13].mxu0  ;;  %13039 = vmatmul.mubr.f32.vlgmr.msra.gmra.mrb[0].mxu1 %v15906_v33  ;;  %v16007_v43 = vpack.c.bf16 %v4529_v3, %v4522_v12 }
 0x2fb   : > { %v4524_v21 = vand.u32 4294901760, %v4523_v50  ;;  %v4981_v22 = vand.u32 4294901760, %v16001_v2  ;;  %v5361_v35 = vand.u32 4294901760, %v2437_v54  ;;  %13895 = vmatpush3.bf16.msra.mxu1 %v15915_v61  ;;  %13045 = vmatprep.mubr.msk.f32.mxu1 %vm14878_vm1, %v17190_v16 }
 0x2fc   : > { %v4989_v36 = vsub.f32 %v15996_v59, %v4988_v52  ;;  %v16016_v25 = vsub.f32 %v12980_v15, %v5364_v18  ;;  %13896 = vmatprep.subr.bf16.mxu1 %v17187_v9 }
 0x2fd   : > { %v4982_v56 = vsub.f32 %v16001_v2, %v4981_v22  ;;  %v16020_v30 = vpack.c.bf16 %v5364_v18, %v5361_v35  ;;  %v16022_v10 = vsub.f32 %v2437_v54, %v5361_v35  ;;  %v12983_v17 = vpop.f32.mrb[14].mxu0  ;;  %v16024_v63 = vpack.c.bf16 %v4531_v55, %v4524_v21 }
 0x2fe   : > { %v4990_v0 = vand.u32 4294901760, %v4989_v36  ;;  %v5447_v38 = vand.u32 4294901760, %v16016_v25  ;;  %v5823_v39 = vand.u32 4294901760, %v12983_v17  ;;  %v2449_v62 = vpop.f32.mrb[15].mxu0  ;;  %v16027_v48 = vpack.c.bf16 %v4988_v52, %v4981_v22 }
 0x2ff   : > { %v4983_v11 = vand.u32 4294901760, %v4982_v56  ;;  %v5440_v3 = vand.u32 4294901760, %v16022_v10  ;;  %v5820_v23 = vand.u32 4294901760, %v2449_v62 }
 0x300   : > { %v5448_v24 = vsub.f32 %v16016_v25, %v5447_v38  ;;  %v16033_v12 = vsub.f32 %v12983_v17, %v5823_v39 }
 0x301   : > { %v5441_v19 = vsub.f32 %v16022_v10, %v5440_v3  ;;  %v16036_v32 = vpack.c.bf16 %v5823_v39, %v5820_v23  ;;  %v16038_v50 = vsub.f32 %v2449_v62, %v5820_v23  ;;  %v12986_v15 = vpop.f32.mrb[16].mxu0  ;;  %v16040_v55 = vpack.c.bf16 %v4990_v0, %v4983_v11 }
 0x302   : > { %v5449_v52 = vand.u32 4294901760, %v5448_v24  ;;  %v5906_v18 = vand.u32 4294901760, %v16033_v12  ;;  %v6282_v54 = vand.u32 4294901760, %v12986_v15  ;;  %v2461_v21 = vpop.f32.mrb[17].mxu0  ;;  %13046 = vmatmul.mubr.f32.vlgmr.msra.gmra.mrb[0].mxu1 %v15909_v34  ;;  %v16044_v22 = vpack.c.bf16 %v5447_v38, %v5440_v3 }
 0x303   : > { %v5442_v35 = vand.u32 4294901760, %v5441_v19  ;;  %v5899_v36 = vand.u32 4294901760, %v16038_v50  ;;  %v6279_v17 = vand.u32 4294901760, %v2461_v21  ;;  %13898 = vmatpush3.bf16.msra.mxu1 %v15935_v1  ;;  %13052 = vmatprep.mubr.msk.f32.mxu1 %vm14878_vm1, %v17190_v16 }
 0x304   : > { %v5907_v0 = vsub.f32 %v16033_v12, %v5906_v18  ;;  %v16053_v39 = vsub.f32 %v12986_v15, %v6282_v54  ;;  %13899 = vmatprep.subr.bf16.mxu1 %v17187_v9 }
 0x305   : > { %v5900_v38 = vsub.f32 %v16038_v50, %v5899_v36  ;;  %v16057_v62 = vpack.c.bf16 %v6282_v54, %v6279_v17  ;;  %v16059_v11 = vsub.f32 %v2461_v21, %v6279_v17  ;;  %v12989_v3 = vpop.f32.mrb[18].mxu0  ;;  %v16061_v23 = vpack.c.bf16 %v5449_v52, %v5442_v35 }
 0x306   : > { %17402 = vst [vmem:[#allocation14_spill] sm:$0xff] %v16053_v39  ;;  %v5908_v24 = vand.u32 4294901760, %v5907_v0  ;;  %v6365_v1 = vand.u32 4294901760, %v16053_v39  ;;  %v6741_v19 = vand.u32 4294901760, %v12989_v3  ;;  %v2473_v56 = vpop.f32.mrb[19].mxu0  ;;  %v16064_v31 = vpack.c.bf16 %v5906_v18, %v5899_v36 }
 0x307   : > { %17403 = vst [vmem:[#allocation15_spill] sm:$0xff] %v16059_v11  ;;  %v5901_v15 = vand.u32 4294901760, %v5900_v38  ;;  %v6358_v27 = vand.u32 4294901760, %v16059_v11  ;;  %v6738_v54 = vand.u32 4294901760, %v2473_v56 }
 0x308   : > { %v6366_v21 = vsub.f32 %v16053_v39, %v6365_v1  ;;  %v16070_v17 = vsub.f32 %v12989_v3, %v6741_v19 }
 0x309   : > { %v6359_v52 = vsub.f32 %v16059_v11, %v6358_v27  ;;  %v16073_v35 = vpack.c.bf16 %v6741_v19, %v6738_v54  ;;  %v16075_v0 = vsub.f32 %v2473_v56, %v6738_v54  ;;  %v12992_v37 = vpop.f32.mrb[20].mxu0  ;;  %v16077_v18 = vpack.c.bf16 %v5908_v24, %v5901_v15 }
 0x30a   : > { %17404 = vst [vmem:[#allocation16_spill] sm:$0xff] %v16070_v17  ;;  %v6367_v36 = vand.u32 4294901760, %v6366_v21  ;;  %v6824_v38 = vand.u32 4294901760, %v16070_v17  ;;  %v7200_v57 = vand.u32 4294901760, %v12992_v37  ;;  %v2485_v41 = vpop.f32.mrb[21].mxu0  ;;  %13053 = vmatmul.mubr.f32.vlgmr.msra.gmra.mrb[0].mxu1 %v15903_v29  ;;  %v16081_v28 = vpack.c.bf16 %v6365_v1, %v6358_v27 }
 0x30b   : > { %17405 = vst [vmem:[#allocation17_spill] sm:$0xff] %v16073_v35  ;;  %17406 = vst [vmem:[#allocation18_spill] sm:$0xff] %v16075_v0  ;;  %v6360_v3 = vand.u32 4294901760, %v6359_v52  ;;  %v6817_v9 = vand.u32 4294901760, %v16075_v0  ;;  %v7197_v56 = vand.u32 4294901760, %v2485_v41  ;;  %13901 = vmatpush3.bf16.msra.mxu1 %v15915_v61  ;;  %13059 = vmatprep.mubr.msk.f32.mxu1 %vm14878_vm1, %v17190_v16  ;;  %v17409_v54 = vmov 0.0|0.0  }
 0x30c   : > { %17407 = vst [vmem:[#allocation19_spill] sm:$0xff] %v16081_v28  ;;  %v6825_v24 = vsub.f32 %v16070_v17, %v6824_v38  ;;  %v16090_v15 = vsub.f32 %v12992_v37, %v7200_v57  ;;  %13902 = vmatprep.subr.bf16.mxu1 %v17409_v54 }
 0x30d   : > { %v6818_v27 = vsub.f32 %v16075_v0, %v6817_v9  ;;  %v16094_v1 = vpack.c.bf16 %v7200_v57, %v7197_v56  ;;  %v16096_v21 = vsub.f32 %v2485_v41, %v7197_v56  ;;  %v12995_v52 = vpop.f32.mrb[22].mxu0  ;;  %v16098_v19 = vpack.c.bf16 %v6367_v36, %v6360_v3 }
 0x30e   : > { %17408 = vst [vmem:[#allocation20_spill] sm:$0xff] %v16090_v15  ;;  %v6826_v35 = vand.u32 4294901760, %v6825_v24  ;;  %v7283_v61 = vand.u32 4294901760, %v16090_v15  ;;  %v7659_v28 = vand.u32 4294901760, %v12995_v52  ;;  %v2497_v16 = vpop.f32.mrb[23].mxu0  ;;  %v16101_v11 = vpack.c.bf16 %v6824_v38, %v6817_v9 }
 0x30f   : > { %17410 = vst [vmem:[#allocation21_spill] sm:$0xff] %v16094_v1  ;;  %17411 = vst [vmem:[#allocation22_spill] sm:$0xff] %v16096_v21  ;;  %v6819_v37 = vand.u32 4294901760, %v6818_v27  ;;  %v7276_v17 = vand.u32 4294901760, %v16096_v21  ;;  %v7656_v57 = vand.u32 4294901760, %v2497_v16 }
 0x310   : > { %17412 = vst [vmem:[#allocation23_spill] sm:$0xff] %v16098_v19  ;;  %17413 = vst [vmem:[#allocation24_spill] sm:$0xff] %v16101_v11  ;;  %v7284_v41 = vsub.f32 %v16090_v15, %v7283_v61  ;;  %v16107_v56 = vsub.f32 %v12995_v52, %v7659_v28 }
 0x311   : > { %v7277_v36 = vsub.f32 %v16096_v21, %v7276_v17  ;;  %v16110_v3 = vpack.c.bf16 %v7659_v28, %v7656_v57  ;;  %v16112_v24 = vsub.f32 %v2497_v16, %v7656_v57  ;;  %v12998_v1 = vpop.f32.mrb[24].mxu0  ;;  %v16114_v9 = vpack.c.bf16 %v6826_v35, %v6819_v37 }
 0x312   : > { %17414 = vst [vmem:[#allocation25_spill] sm:$0xff] %v16107_v56  ;;  %v7285_v38 = vand.u32 4294901760, %v7284_v41  ;;  %v7742_v27 = vand.u32 4294901760, %v16107_v56  ;;  %v8118_v11 = vand.u32 4294901760, %v12998_v1  ;;  %v2509_v39 = vpop.f32.mrb[25].mxu0  ;;  %13060 = vmatmul.mubr.f32.vlgmr.msra.gmra.mrb[0].mxu1 %v15903_v29  ;;  %v16118_v0 = vpack.c.bf16 %v7283_v61, %v7276_v17 }
 0x313   : > { %17415 = vst [vmem:[#allocation26_spill] sm:$0xff] %v16110_v3  ;;  %17416 = vst [vmem:[#allocation27_spill] sm:$0xff] %v16112_v24  ;;  %v7278_v52 = vand.u32 4294901760, %v7277_v36  ;;  %v7735_v15 = vand.u32 4294901760, %v16112_v24  ;;  %v8115_v16 = vand.u32 4294901760, %v2509_v39  ;;  %13904 = vmatpush3.bf16.msra.mxu1 %v15931_v42  ;;  %v17419_v35 = vmov 0.0  }
 0x314   : > { %17417 = vst [vmem:[#allocation28_spill] sm:$0xff] %v16114_v9  ;;  %17418 = vst [vmem:[#allocation29_spill] sm:$0xff] %v16118_v0  ;;  %13066 = vmatprep.mubr.msk.f32.mxu1 %vm14878_vm1, %v17419_v35  ;;  %v7743_v37 = vsub.f32 %v16107_v56, %v7742_v27  ;;  %v16127_v57 = vsub.f32 %v12998_v1, %v8118_v11  ;;  %13905 = vmatprep.subr.bf16.mxu1 %v17409_v54 }
 0x315   : > { %v7736_v17 = vsub.f32 %v16112_v24, %v7735_v15  ;;  %v16131_v61 = vpack.c.bf16 %v8118_v11, %v8115_v16  ;;  %v16133_v41 = vsub.f32 %v2509_v39, %v8115_v16  ;;  %v13001_v36 = vpop.f32.mrb[26].mxu0  ;;  %v16135_v28 = vpack.c.bf16 %v7285_v38, %v7278_v52 }
 0x316   : > { %17420 = vst [vmem:[#allocation33_spill] sm:$0xff] %v16127_v57  ;;  %v7744_v3 = vand.u32 4294901760, %v7743_v37  ;;  %v8201_v0 = vand.u32 4294901760, %v16127_v57  ;;  %v8577_v21 = vand.u32 4294901760, %v13001_v36  ;;  %v2521_v9 = vpop.f32.mrb[27].mxu0  ;;  %13067 = vmatmul.mubr.f32.vlgmr.msra.gmra.mrb[2].mxu1 %v15920_v44  ;;  %v16139_v1 = vpack.c.bf16 %v7742_v27, %v7735_v15 }
 0x317   : > { %17421 = vst [vmem:[#allocation35_spill] sm:$0xff] %v16131_v61  ;;  %17422 = vst [vmem:[#allocation36_spill] sm:$0xff] %v16133_v41  ;;  %v7737_v56 = vand.u32 4294901760, %v7736_v17  ;;  %v8194_v19 = vand.u32 4294901760, %v16133_v41  ;;  %v8574_v39 = vand.u32 4294901760, %v2521_v9  ;;  %13907 = vmatpush3.bf16.msra.mxu1 %v15967_v8  ;;  %13073 = vmatprep.mubr.msk.f32.mxu1 %vm14878_vm1, %v17419_v35 }
 0x318   : > { %17423 = vst [vmem:[#allocation37_spill] sm:$0xff] %v16139_v1  ;;  %v8202_v38 = vsub.f32 %v16127_v57, %v8201_v0  ;;  %v16148_v52 = vsub.f32 %v13001_v36, %v8577_v21  ;;  %13908 = vmatprep.subr.bf16.mxu1 %v17409_v54 }
 0x319   : > { %v8195_v15 = vsub.f32 %v16133_v41, %v8194_v19  ;;  %v16152_v27 = vpack.c.bf16 %v8577_v21, %v8574_v39  ;;  %v16154_v16 = vsub.f32 %v2521_v9, %v8574_v39  ;;  %v13004_v37 = vpop.f32.mrb[28].mxu0  ;;  %v16156_v17 = vpack.c.bf16 %v7744_v3, %v7737_v56 }
 0x31a   : > { %17424 = vst [vmem:[#allocation40_spill] sm:$0xff] %v16148_v52  ;;  %v8203_v11 = vand.u32 4294901760, %v8202_v38  ;;  %v8660_v8 = vand.u32 4294901760, %v16148_v52  ;;  %v9036_v61 = vand.u32 4294901760, %v13004_v37  ;;  %v2533_v1 = vpop.f32.mrb[29].mxu0  ;;  %v16159_v24 = vpack.c.bf16 %v8201_v0, %v8194_v19 }
 0x31b   : > { %17425 = vst [vmem:[#allocation41_spill] sm:$0xff] %v16152_v27  ;;  %17426 = vst [vmem:[#allocation44_spill] sm:$0xff] %v16154_v16  ;;  %v8196_v36 = vand.u32 4294901760, %v8195_v15  ;;  %v8653_v57 = vand.u32 4294901760, %v16154_v16  ;;  %v9033_v21 = vand.u32 4294901760, %v2533_v1 }
 0x31c   : > { %17427 = vst [vmem:[#allocation45_spill] sm:$0xff] %v16156_v17  ;;  %17428 = vst [vmem:[#allocation49_spill] sm:$0xff] %v16159_v24  ;;  %v8661_v9 = vsub.f32 %v16148_v52, %v8660_v8  ;;  %v16165_v39 = vsub.f32 %v13004_v37, %v9036_v61 }
 0x31d   : > { %v8654_v56 = vsub.f32 %v16154_v16, %v8653_v57  ;;  %v16168_v3 = vpack.c.bf16 %v9036_v61, %v9033_v21  ;;  %v16170_v38 = vsub.f32 %v2533_v1, %v9033_v21  ;;  %v13007_v27 = vpop.f32.mrb[30].mxu0  ;;  %v16172_v0 = vpack.c.bf16 %v8203_v11, %v8196_v36 }
 0x31e   : > { %17429 = vst [vmem:[#allocation52_spill] sm:$0xff] %v16165_v39  ;;  %v8662_v19 = vand.u32 4294901760, %v8661_v9  ;;  %v9119_v15 = vand.u32 4294901760, %v16165_v39  ;;  %v9495_v24 = vand.u32 4294901760, %v13007_v27  ;;  %v2545_v17 = vpop.f32.mrb[31].mxu0  ;;  %13074 = vmatmul.mubr.f32.vlgmr.msra.gmra.mrb[2].mxu1 %v15903_v29  ;;  %v16176_v41 = vpack.c.bf16 %v8660_v8, %v8653_v57 }
 0x31f   : > { %17430 = vst [vmem:[#allocation59_spill] sm:$0xff] %v16168_v3  ;;  %17431 = vst [vmem:[#allocation62_spill] sm:$0xff] %v16170_v38  ;;  %v8655_v37 = vand.u32 4294901760, %v8654_v56  ;;  %v9112_v52 = vand.u32 4294901760, %v16170_v38  ;;  %v9492_v1 = vand.u32 4294901760, %v2545_v17  ;;  %v17433_v11 = vpack.c.bf16 %v15927_v47, %v15933_v51  ;;  %13080 = vmatprep.mubr.msk.f32.mxu1 %vm14878_vm1, %v17419_v35 }
 0x320   : > { %17432 = vst [vmem:[#allocation30_spill] sm:$0xff] %v16176_v41  ;;  %v9120_v36 = vsub.f32 %v16165_v39, %v9119_v15  ;;  %v16187_v21 = vsub.f32 %v13007_v27, %v9495_v24 }
 0x321   : > { %13910 = vmatpush3.bf16.msra.mxu1 %v17433_v11  ;;  %v9113_v57 = vsub.f32 %v16170_v38, %v9112_v52  ;;  %v16191_v8 = vpack.c.bf16 %v9495_v24, %v9492_v1  ;;  %v16193_v9 = vsub.f32 %v2545_v17, %v9492_v1  ;;  %v13010_v56 = vpop.f32.mrb[32].mxu0  ;;  %v16195_v61 = vpack.c.bf16 %v8662_v19, %v8655_v37 }
 0x322   : > { %17434 = vst [vmem:[#allocation31_spill] sm:$0xff] %v16187_v21  ;;  %13911 = vmatprep.subr.bf16.mxu1 %v17409_v54  ;;  %v9121_v47 = vand.u32 4294901760, %v9120_v36  ;;  %v9578_v51 = vand.u32 4294901760, %v16187_v21  ;;  %v9954_v11 = vand.u32 4294901760, %v13010_v56  ;;  %v2557_v3 = vpop.f32.mrb[33].mxu0  ;;  %v16198_v41 = vpack.c.bf16 %v9119_v15, %v9112_v52 }
 0x323   : > { %17435 = vst [vmem:[#allocation32_spill] sm:$0xff] %v16191_v8  ;;  %17436 = vst [vmem:[#allocation34_spill] sm:$0xff] %v16193_v9  ;;  %v9114_v27 = vand.u32 4294901760, %v9113_v57  ;;  %v9571_v39 = vand.u32 4294901760, %v16193_v9  ;;  %v9951_v24 = vand.u32 4294901760, %v2557_v3 }
 0x324   : > { %17437 = vst [vmem:[#allocation38_spill] sm:$0xff] %v16198_v41  ;;  %v9579_v17 = vsub.f32 %v16187_v21, %v9578_v51  ;;  %v16204_v1 = vsub.f32 %v13010_v56, %v9954_v11 }
 0x325   : > { %v9572_v19 = vsub.f32 %v16193_v9, %v9571_v39  ;;  %v16207_v37 = vpack.c.bf16 %v9954_v11, %v9951_v24  ;;  %v16209_v36 = vsub.f32 %v2557_v3, %v9951_v24  ;;  %v13013_v8 = vpop.f32.mrb[34].mxu0  ;;  %v16211_v52 = vpack.c.bf16 %v9121_v47, %v9114_v27 }
 0x326   : > { %17438 = vst [vmem:[#allocation39_spill] sm:$0xff] %v16204_v1  ;;  %v9580_v15 = vand.u32 4294901760, %v9579_v17  ;;  %v10037_v57 = vand.u32 4294901760, %v16204_v1  ;;  %v10413_v41 = vand.u32 4294901760, %v13013_v8  ;;  %v2569_v16 = vpop.f32.mrb[35].mxu0  ;;  %13081 = vmatmul.mubr.f32.vlgmr.msra.gmra.mrb[2].mxu1 %v15906_v33  ;;  %v16215_v38 = vpack.c.bf16 %v9578_v51, %v9571_v39 }
 0x327   : > { %17439 = vst [vmem:[#allocation42_spill] sm:$0xff] %v16207_v37  ;;  %17440 = vst [vmem:[#allocation43_spill] sm:$0xff] %v16209_v36  ;;  %v9573_v56 = vand.u32 4294901760, %v9572_v19  ;;  %v10030_v21 = vand.u32 4294901760, %v16209_v36  ;;  %v10410_v3 = vand.u32 4294901760, %v2569_v16  ;;  %13913 = vmatpush3.bf16.msra.mxu1 %v15931_v42  ;;  %13087 = vmatprep.mubr.msk.f32.mxu1 %vm14878_vm1, %v17419_v35 }
 0x328   : > { %17441 = vst [vmem:[#allocation46_spill] sm:$0xff] %v16211_v52  ;;  %17442 = vst [vmem:[#allocation47_spill] sm:$0xff] %v16215_v38  ;;  %v10038_v47 = vsub.f32 %v16204_v1, %v10037_v57  ;;  %v16224_v27 = vsub.f32 %v13013_v8, %v10413_v41  ;;  %13914 = vmatprep.subr.bf16.mxu1 %v17409_v54 }
 0x329   : > { %v10031_v39 = vsub.f32 %v16209_v36, %v10030_v21  ;;  %v16228_v51 = vpack.c.bf16 %v10413_v41, %v10410_v3  ;;  %v16230_v24 = vsub.f32 %v2569_v16, %v10410_v3  ;;  %v13016_v17 = vpop.f32.mrb[36].mxu0  ;;  %v16232_v19 = vpack.c.bf16 %v9580_v15, %v9573_v56 }
 0x32a   : > { %17443 = vst [vmem:[#allocation48_spill] sm:$0xff] %v16224_v27  ;;  %v10039_v11 = vand.u32 4294901760, %v10038_v47  ;;  %v10496_v37 = vand.u32 4294901760, %v16224_v27  ;;  %v10872_v38 = vand.u32 4294901760, %v13016_v17  ;;  %v2581_v9 = vpop.f32.mrb[37].mxu0  ;;  %v16235_v52 = vpack.c.bf16 %v10037_v57, %v10030_v21 }
 0x32b   : > { %17444 = vst [vmem:[#allocation50_spill] sm:$0xff] %v16228_v51  ;;  %17445 = vst [vmem:[#allocation51_spill] sm:$0xff] %v16232_v19  ;;  %v10032_v8 = vand.u32 4294901760, %v10031_v39  ;;  %v10489_v1 = vand.u32 4294901760, %v16230_v24  ;;  %v10869_v41 = vand.u32 4294901760, %v2581_v9 }
 0x32c   : > { %17446 = vst [vmem:[#allocation53_spill] sm:$0xff] %v16235_v52  ;;  %v10497_v16 = vsub.f32 %v16224_v27, %v10496_v37  ;;  %v16241_v3 = vsub.f32 %v13016_v17, %v10872_v38 }
 0x32d   : > { %v10490_v15 = vsub.f32 %v16230_v24, %v10489_v1  ;;  %v16244_v56 = vpack.c.bf16 %v10872_v38, %v10869_v41  ;;  %v16246_v47 = vsub.f32 %v2581_v9, %v10869_v41  ;;  %v13019_v51 = vpop.f32.mrb[38].mxu0  ;;  %v16248_v21 = vpack.c.bf16 %v10039_v11, %v10032_v8 }
 0x32e   : > { %17447 = vst [vmem:[#allocation54_spill] sm:$0xff] %v16241_v3  ;;  %v10498_v57 = vand.u32 4294901760, %v10497_v16  ;;  %v10955_v39 = vand.u32 4294901760, %v16241_v3  ;;  %v11331_v52 = vand.u32 4294901760, %v13019_v51  ;;  %v2593_v19 = vpop.f32.mrb[39].mxu0  ;;  %13088 = vmatmul.mubr.f32.vlgmr.msra.gmra.mrb[2].mxu1 %v15909_v34  ;;  %v16252_v36 = vpack.c.bf16 %v10496_v37, %v10489_v1 }
 0x32f   : > { %17448 = vst [vmem:[#allocation55_spill] sm:$0xff] %v16244_v56  ;;  %v10491_v17 = vand.u32 4294901760, %v10490_v15  ;;  %v10948_v27 = vand.u32 4294901760, %v16246_v47  ;;  %v11328_v9 = vand.u32 4294901760, %v2593_v19  ;;  %13916 = vmatpush3.bf16.msra.mxu1 %v15953_v53  ;;  %13094 = vmatprep.mubr.msk.f32.mxu1 %vm14878_vm1, %v17419_v35 }
 0x330   : > { %17449 = vst [vmem:[#allocation56_spill] sm:$0xff] %v16252_v36  ;;  %v10956_v11 = vsub.f32 %v16241_v3, %v10955_v39  ;;  %v16261_v8 = vsub.f32 %v13019_v51, %v11331_v52  ;;  %13917 = vmatprep.subr.bf16.mxu1 %v17409_v54 }
 0x331   : > { %v10949_v1 = vsub.f32 %v16246_v47, %v10948_v27  ;;  %v16265_v37 = vpack.c.bf16 %v11331_v52, %v11328_v9  ;;  %v16267_v41 = vsub.f32 %v2593_v19, %v11328_v9  ;;  %v16269_v16 = vpack.c.bf16 %v10498_v57, %v10491_v17 }
 0x332   : > { %v10957_v15 = vand.u32 4294901760, %v10956_v11  ;;  %v11414_v53 = vand.u32 4294901760, %v16261_v8  ;;  %v16272_v38 = vpack.c.bf16 %v10955_v39, %v10948_v27 }
 0x333   : > { %17450 = vst [vmem:[#allocation57_spill] sm:$0xff] %v16265_v37  ;;  %v10950_v56 = vand.u32 4294901760, %v10949_v1  ;;  %v11407_v3 = vand.u32 4294901760, %v16267_v41  ;;  %v14233_v51 = vpack.c.bf16 %v16261_v8, %v16267_v41 }
 0x334   : > { %v11415_v36 = vsub.f32 %v16261_v8, %v11414_v53 }
 0x335   : > { %v11408_v52 = vsub.f32 %v16267_v41, %v11407_v3  ;;  %v16279_v37 = vpack.c.bf16 %v11414_v53, %v11407_v3  ;;  %v16281_v19 = vpack.c.bf16 %v10957_v15, %v10950_v56  ;;  %v17470_v3 = vld [vmem:[#allocation22_spill] sm:$0xff] }
 0x336   : > { %v11416_v57 = vand.u32 4294901760, %v11415_v36  ;;  %13095 = vmatmul.mubr.f32.vlgmr.msra.gmra.mrb[2].mxu1 %v15903_v29  ;;  %v17469_v36 = vld [vmem:[#allocation20_spill] sm:$0xff] }
 0x337   : > { %v11409_v17 = vand.u32 4294901760, %v11408_v52  ;;  %13919 = vmatpush3.bf16.msra.mxu1 %v15931_v42  ;;  %13101 = vmatprep.mubr.msk.f32.mxu1 %vm14878_vm1, %v17419_v35  ;;  %v17451_v42 = vpack.c.bf16 %v15945_v45, %v15950_v49  ;;  %v17452_v45 = vpack.c.bf16 %v15959_v58, %v15965_v60  ;;  %v17454_v49 = vpack.c.bf16 %v15996_v59, %v16001_v2  ;;  %v17458_v59 = vld [vmem:[#allocation14_spill] sm:$0xff] }
 0x338   : > { %13920 = vmatprep.subr.bf16.mxu1 %v17409_v54  ;;  %v17455_v60 = vpack.c.bf16 %v16016_v25, %v16022_v10  ;;  %v17463_v10 = vld [vmem:[#allocation28_spill] sm:$0xff]  ;;  %v17471_v56 = vpack.c.bf16 %v17469_v36, %v17470_v3  ;;  %v17473_v52 = vld [vmem:[#allocation26_spill] sm:$0xff] }
 0x339   : > { %v16288_v27 = vpack.c.bf16 %v11416_v57, %v11409_v17  ;;  %v17474_v57 = vld [vmem:[#allocation45_spill] sm:$0xff]  ;;  %v17491_v36 = vld [vmem:[#allocation52_spill] sm:$0xff]  ;;  %v17492_v3 = vld [vmem:[#allocation62_spill] sm:$0xff] }
 0x33a   : > { %v17475_v17 = vld [vmem:[#allocation25_spill] sm:$0xff] }
 0x33e   : > { %13102 = vmatmul.mubr.f32.vlgmr.msra.gmra.mrb[2].mxu1 %v15903_v29 }
 0x33f   : > { %13922 = vmatpush3.bf16.msra.mxu1 %v15948_v14  ;;  %13108 = vmatprep.mubr.msk.f32.mxu1 %vm14878_vm1, %v17419_v35 }
 0x340   : > { %13923 = vmatprep.subr.bf16.mxu1 %v17409_v54 }
 0x342   : > { %13109 = vmatmul.mubr.f32.vlgmr.msra.gmra.mrb[4].mxu1 %v15920_v44 }
 0x343   : > { %13925 = vmatpush3.bf16.msra.mxu1 %v15987_v7  ;;  %13115 = vmatprep.mubr.msk.f32.mxu1 %vm14878_vm1, %v17419_v35 }
 0x344   : > { %13926 = vmatprep.subr.bf16.mxu1 %v17409_v54 }
 0x34a   : > { %13116 = vmatmul.mubr.f32.vlgmr.msra.gmra.mrb[4].mxu1 %v15903_v29 }
 0x34b   : > { %13928 = vmatpush3.bf16.msra.mxu1 %v17451_v42  ;;  %13122 = vmatprep.mubr.msk.f32.mxu1 %vm14878_vm1, %v17419_v35  ;;  %v17476_v42 = vld [vmem:[#allocation27_spill] sm:$0xff] }
 0x34c   : > { %13929 = vmatprep.subr.bf16.mxu1 %v17409_v54 }
 0x352   : > { %13123 = vmatmul.mubr.f32.vlgmr.msra.gmra.mrb[4].mxu1 %v15906_v33 }
 0x353   : > { %13931 = vmatpush3.bf16.msra.mxu1 %v15948_v14  ;;  %13129 = vmatprep.mubr.msk.f32.mxu1 %vm14878_vm1, %v17419_v35 }
 0x354   : > { %13932 = vmatprep.subr.bf16.mxu1 %v17409_v54 }
 0x35a   : > { %13130 = vmatmul.mubr.f32.vlgmr.msra.gmra.mrb[4].mxu1 %v15909_v34 }
 0x35b   : > { %13934 = vmatpush3.bf16.msra.mxu1 %v15971_v20  ;;  %13136 = vmatprep.mubr.msk.f32.mxu1 %vm14878_vm1, %v17419_v35 }
 0x35c   : > { %13935 = vmatprep.subr.bf16.mxu1 %v17409_v54 }
 0x362   : > { %13137 = vmatmul.mubr.f32.vlgmr.msra.gmra.mrb[4].mxu1 %v15903_v29 }
 0x363   : > { %13937 = vmatpush3.bf16.msra.mxu1 %v15948_v14  ;;  %13143 = vmatprep.mubr.msk.f32.mxu1 %vm14878_vm1, %v17419_v35  ;;  %v17453_v14 = vpack.c.bf16 %v15979_v40, %v15985_v6 }
 0x364   : > { %13938 = vmatprep.subr.bf16.mxu1 %v17409_v54 }
 0x36a   : > { %13144 = vmatmul.mubr.f32.vlgmr.msra.gmra.mrb[4].mxu1 %v15903_v29 }
 0x36b   : > { %13940 = vmatpush3.bf16.msra.mxu1 %v15963_v13  ;;  %13150 = vmatprep.mubr.msk.f32.mxu1 %vm14878_vm1, %v17419_v35 }
 0x36c   : > { %13941 = vmatprep.subr.bf16.mxu1 %v17409_v54 }
 0x36e   : > { %13151 = vmatmul.mubr.f32.vlgmr.msra.gmra.mrb[6].mxu1 %v15920_v44 }
 0x36f   : > { %13943 = vmatpush3.bf16.msra.mxu1 %v16003_v5  ;;  %13157 = vmatprep.mubr.msk.f32.mxu1 %vm14878_vm1, %v17419_v35  ;;  %v17461_v5 = vld [vmem:[#allocation19_spill] sm:$0xff] }
 0x370   : > { %13944 = vmatprep.subr.bf16.mxu1 %v17409_v54 }
 0x376   : > { %13158 = vmatmul.mubr.f32.vlgmr.msra.gmra.mrb[6].mxu1 %v15903_v29 }
 0x377   : > { %13946 = vmatpush3.bf16.msra.mxu1 %v17452_v45  ;;  %13164 = vmatprep.mubr.msk.f32.mxu1 %vm14878_vm1, %v17419_v35  ;;  %v17477_v45 = vpack.c.bf16 %v17475_v17, %v17476_v42  ;;  %v17496_v17 = vld [vmem:[#allocation51_spill] sm:$0xff] }
 0x378   : > { %13947 = vmatprep.subr.bf16.mxu1 %v17409_v54  ;;  %v17497_v42 = vld [vmem:[#allocation31_spill] sm:$0xff] }
 0x37e   : > { %13165 = vmatmul.mubr.f32.vlgmr.msra.gmra.mrb[6].mxu1 %v15906_v33 }
 0x37f   : > { %13949 = vmatpush3.bf16.msra.mxu1 %v15963_v13  ;;  %13171 = vmatprep.mubr.msk.f32.mxu1 %vm14878_vm1, %v17419_v35 }
 0x380   : > { %13950 = vmatprep.subr.bf16.mxu1 %v17409_v54 }
 0x386   : > { %13172 = vmatmul.mubr.f32.vlgmr.msra.gmra.mrb[6].mxu1 %v15909_v34 }
 0x387   : > { %13952 = vmatpush3.bf16.msra.mxu1 %v15990_v4  ;;  %13178 = vmatprep.mubr.msk.f32.mxu1 %vm14878_vm1, %v17419_v35  ;;  %v17457_v4 = vld [vmem:[#allocation23_spill] sm:$0xff] }
 0x388   : > { %13953 = vmatprep.subr.bf16.mxu1 %v17409_v54 }
 0x38e   : > { %13179 = vmatmul.mubr.f32.vlgmr.msra.gmra.mrb[6].mxu1 %v15903_v29 }
 0x38f   : > { %13955 = vmatpush3.bf16.msra.mxu1 %v15963_v13  ;;  %13185 = vmatprep.mubr.msk.f32.mxu1 %vm14878_vm1, %v17419_v35 }
 0x390   : > { %13956 = vmatprep.subr.bf16.mxu1 %v17409_v54 }
 0x396   : > { %13186 = vmatmul.mubr.f32.vlgmr.msra.gmra.mrb[6].mxu1 %v15903_v29 }
 0x397   : > { %13958 = vmatpush3.bf16.msra.mxu1 %v15983_v46  ;;  %13192 = vmatprep.mubr.msk.f32.mxu1 %vm14878_vm1, %v17419_v35 }
 0x398   : > { %13959 = vmatprep.subr.bf16.mxu1 %v17409_v54 }
 0x39a   : > { %13193 = vmatmul.mubr.f32.vlgmr.msra.gmra.mrb[8].mxu1 %v15920_v44 }
 0x39b   : > { %13961 = vmatpush3.bf16.msra.mxu1 %v16024_v63  ;;  %13199 = vmatprep.mubr.msk.f32.mxu1 %vm14878_vm1, %v17419_v35  ;;  %v17464_v63 = vld [vmem:[#allocation16_spill] sm:$0xff] }
 0x39c   : > { %13962 = vmatprep.subr.bf16.mxu1 %v17409_v54 }
 0x3a2   : > { %13200 = vmatmul.mubr.f32.vlgmr.msra.gmra.mrb[8].mxu1 %v15903_v29 }
 0x3a3   : > { %13964 = vmatpush3.bf16.msra.mxu1 %v17453_v14  ;;  %13206 = vmatprep.mubr.msk.f32.mxu1 %vm14878_vm1, %v17419_v35  ;;  %v17478_v14 = vld [vmem:[#allocation37_spill] sm:$0xff] }
 0x3a4   : > { %13965 = vmatprep.subr.bf16.mxu1 %v17409_v54 }
 0x3aa   : > { %13207 = vmatmul.mubr.f32.vlgmr.msra.gmra.mrb[8].mxu1 %v15906_v33 }
 0x3ab   : > { %13967 = vmatpush3.bf16.msra.mxu1 %v15983_v46  ;;  %13213 = vmatprep.mubr.msk.f32.mxu1 %vm14878_vm1, %v17419_v35 }
 0x3ac   : > { %13968 = vmatprep.subr.bf16.mxu1 %v17409_v54 }
 0x3b2   : > { %13214 = vmatmul.mubr.f32.vlgmr.msra.gmra.mrb[8].mxu1 %v15909_v34 }
 0x3b3   : > { %13970 = vmatpush3.bf16.msra.mxu1 %v16007_v43  ;;  %13220 = vmatprep.mubr.msk.f32.mxu1 %vm14878_vm1, %v17419_v35 }
 0x3b4   : > { %13971 = vmatprep.subr.bf16.mxu1 %v17409_v54 }
 0x3ba   : > { %13221 = vmatmul.mubr.f32.vlgmr.msra.gmra.mrb[8].mxu1 %v15903_v29 }
 0x3bb   : > { %13973 = vmatpush3.bf16.msra.mxu1 %v15983_v46  ;;  %13227 = vmatprep.mubr.msk.f32.mxu1 %vm14878_vm1, %v17419_v35  ;;  %v17456_v46 = vpack.c.bf16 %v16033_v12, %v16038_v50  ;;  %v17467_v12 = vld [vmem:[#allocation24_spill] sm:$0xff] }
 0x3bc   : > { %13974 = vmatprep.subr.bf16.mxu1 %v17409_v54 }
 0x3c2   : > { %13228 = vmatmul.mubr.f32.vlgmr.msra.gmra.mrb[8].mxu1 %v15903_v29 }
 0x3c3   : > { %13976 = vmatpush3.bf16.msra.mxu1 %v15999_v26  ;;  %13234 = vmatprep.mubr.msk.f32.mxu1 %vm14878_vm1, %v17419_v35 }
 0x3c4   : > { %13977 = vmatprep.subr.bf16.mxu1 %v17409_v54 }
 0x3c6   : > { %13235 = vmatmul.mubr.f32.vlgmr.msra.gmra.mrb[10].mxu1 %v15920_v44 }
 0x3c7   : > { %13979 = vmatpush3.bf16.msra.mxu1 %v16040_v55  ;;  %13241 = vmatprep.mubr.msk.f32.mxu1 %vm14878_vm1, %v17419_v35 }
 0x3c8   : > { %13980 = vmatprep.subr.bf16.mxu1 %v17409_v54 }
 0x3ce   : > { %13242 = vmatmul.mubr.f32.vlgmr.msra.gmra.mrb[10].mxu1 %v15903_v29 }
 0x3cf   : > { %13982 = vmatpush3.bf16.msra.mxu1 %v17454_v49  ;;  %13248 = vmatprep.mubr.msk.f32.mxu1 %vm14878_vm1, %v17419_v35 }
 0x3d0   : > { %13983 = vmatprep.subr.bf16.mxu1 %v17409_v54 }
 0x3d6   : > { %13249 = vmatmul.mubr.f32.vlgmr.msra.gmra.mrb[10].mxu1 %v15906_v33 }
 0x3d7   : > { %13985 = vmatpush3.bf16.msra.mxu1 %v15999_v26  ;;  %13255 = vmatprep.mubr.msk.f32.mxu1 %vm14878_vm1, %v17419_v35 }
 0x3d8   : > { %13986 = vmatprep.subr.bf16.mxu1 %v17409_v54 }
 0x3de   : > { %13256 = vmatmul.mubr.f32.vlgmr.msra.gmra.mrb[10].mxu1 %v15909_v34 }
 0x3df   : > { %13988 = vmatpush3.bf16.msra.mxu1 %v16027_v48  ;;  %13262 = vmatprep.mubr.msk.f32.mxu1 %vm14878_vm1, %v17419_v35  ;;  %v17465_v48 = vld [vmem:[#allocation18_spill] sm:$0xff] }
 0x3e0   : > { %13989 = vmatprep.subr.bf16.mxu1 %v17409_v54 }
 0x3e5   : > { %v16413_v58 = vpop.f32.mrb[0].mxu1 }
 0x3e6   : > { %v13061_v13 = vpop.f32.mrb[1].mxu1  ;;  %13263 = vmatmul.mubr.f32.vlgmr.msra.gmra.mrb[10].mxu1 %v15903_v29  ;;  %v16551_v50 = vmul.f32 %v16413_v58, %v16413_v58 }
 0x3e7   : > { %13991 = vmatpush3.bf16.msra.mxu1 %v15999_v26  ;;  %13269 = vmatprep.mubr.msk.f32.mxu1 %vm14878_vm1, %v17419_v35  ;;  %v17459_v26 = vld [vmem:[#allocation15_spill] sm:$0xff] }
 0x3e8   : > { %13992 = vmatprep.subr.bf16.mxu1 %v17409_v54  ;;  %v17460_v2 = vpack.c.bf16 %v17458_v59, %v17459_v26 }
 0x3ee   : > { %13270 = vmatmul.mubr.f32.vlgmr.msra.gmra.mrb[10].mxu1 %v15903_v29 }
 0x3ef   : > { %13994 = vmatpush3.bf16.msra.mxu1 %v16020_v30  ;;  %13276 = vmatprep.mubr.msk.f32.mxu1 %vm14878_vm1, %v17419_v35 }
 0x3f0   : > { %13995 = vmatprep.subr.bf16.mxu1 %v17409_v54 }
 0x3f2   : > { %13277 = vmatmul.mubr.f32.vlgmr.msra.gmra.mrb[12].mxu1 %v15920_v44 }
 0x3f3   : > { %13997 = vmatpush3.bf16.msra.mxu1 %v16061_v23  ;;  %13283 = vmatprep.mubr.msk.f32.mxu1 %vm14878_vm1, %v17419_v35 }
 0x3f4   : > { %13998 = vmatprep.subr.bf16.mxu1 %v17409_v54 }
 0x3fa   : > { %13284 = vmatmul.mubr.f32.vlgmr.msra.gmra.mrb[12].mxu1 %v15903_v29 }
 0x3fb   : > { %14000 = vmatpush3.bf16.msra.mxu1 %v17455_v60  ;;  %13290 = vmatprep.mubr.msk.f32.mxu1 %vm14878_vm1, %v17419_v35 }
 0x3fc   : > { %14001 = vmatprep.subr.bf16.mxu1 %v17409_v54 }
 0x402   : > { %13291 = vmatmul.mubr.f32.vlgmr.msra.gmra.mrb[12].mxu1 %v15906_v33 }
 0x403   : > { %14003 = vmatpush3.bf16.msra.mxu1 %v16020_v30  ;;  %13297 = vmatprep.mubr.msk.f32.mxu1 %vm14878_vm1, %v17419_v35 }
 0x404   : > { %14004 = vmatprep.subr.bf16.mxu1 %v17409_v54 }
 0x40a   : > { %13298 = vmatmul.mubr.f32.vlgmr.msra.gmra.mrb[12].mxu1 %v15909_v34 }
 0x40b   : > { %14006 = vmatpush3.bf16.msra.mxu1 %v16044_v22  ;;  %13304 = vmatprep.mubr.msk.f32.mxu1 %vm14878_vm1, %v17419_v35 }
 0x40c   : > { %14007 = vmatprep.subr.bf16.mxu1 %v17409_v54 }
 0x411   : > { %v16447_v20 = vpop.f32.mrb[2].mxu1 }
 0x412   : > { %v13103_v40 = vpop.f32.mrb[3].mxu1  ;;  %13305 = vmatmul.mubr.f32.vlgmr.msra.gmra.mrb[12].mxu1 %v15903_v29  ;;  %v16596_v9 = vmul.f32 %v16447_v20, %v16447_v20 }
 0x413   : > { %14009 = vmatpush3.bf16.msra.mxu1 %v16020_v30  ;;  %13311 = vmatprep.mubr.msk.f32.mxu1 %vm14878_vm1, %v17419_v35  ;;  %v17462_v30 = vld [vmem:[#allocation17_spill] sm:$0xff] }
 0x414   : > { %14010 = vmatprep.subr.bf16.mxu1 %v17409_v54 }
 0x41a   : > { %13312 = vmatmul.mubr.f32.vlgmr.msra.gmra.mrb[12].mxu1 %v15903_v29 }
 0x41b   : > { %14012 = vmatpush3.bf16.msra.mxu1 %v16036_v32  ;;  %13318 = vmatprep.mubr.msk.f32.mxu1 %vm14878_vm1, %v17419_v35 }
 0x41c   : > { %14013 = vmatprep.subr.bf16.mxu1 %v17409_v54 }
 0x41e   : > { %13319 = vmatmul.mubr.f32.vlgmr.msra.gmra.mrb[14].mxu1 %v15920_v44 }
 0x41f   : > { %14015 = vmatpush3.bf16.msra.mxu1 %v16077_v18  ;;  %13325 = vmatprep.mubr.msk.f32.mxu1 %vm14878_vm1, %v17419_v35  ;;  %v17468_v18 = vld [vmem:[#allocation21_spill] sm:$0xff] }
 0x420   : > { %14016 = vmatprep.subr.bf16.mxu1 %v17409_v54 }
 0x426   : > { %13326 = vmatmul.mubr.f32.vlgmr.msra.gmra.mrb[14].mxu1 %v15903_v29 }
 0x427   : > { %14018 = vmatpush3.bf16.msra.mxu1 %v17456_v46  ;;  %13332 = vmatprep.mubr.msk.f32.mxu1 %vm14878_vm1, %v17419_v35  ;;  %v17479_v46 = vld [vmem:[#allocation35_spill] sm:$0xff] }
 0x428   : > { %14019 = vmatprep.subr.bf16.mxu1 %v17409_v54 }
 0x42e   : > { %13333 = vmatmul.mubr.f32.vlgmr.msra.gmra.mrb[14].mxu1 %v15906_v33 }
 0x42f   : > { %14021 = vmatpush3.bf16.msra.mxu1 %v16036_v32  ;;  %13339 = vmatprep.mubr.msk.f32.mxu1 %vm14878_vm1, %v17419_v35 }
 0x430   : > { %14022 = vmatprep.subr.bf16.mxu1 %v17409_v54 }
 0x436   : > { %13340 = vmatmul.mubr.f32.vlgmr.msra.gmra.mrb[14].mxu1 %v15909_v34 }
 0x437   : > { %14024 = vmatpush3.bf16.msra.mxu1 %v16064_v31  ;;  %13346 = vmatprep.mubr.msk.f32.mxu1 %vm14878_vm1, %v17419_v35  ;;  %v17466_v31 = vpack.c.bf16 %v17464_v63, %v17465_v48  ;;  %v17486_v63 = vld [vmem:[#allocation44_spill] sm:$0xff] }
 0x438   : > { %14025 = vmatprep.subr.bf16.mxu1 %v17409_v54 }
 0x43d   : > { %v16481_v6 = vpop.f32.mrb[4].mxu1 }
 0x43e   : > { %v13145_v7 = vpop.f32.mrb[5].mxu1  ;;  %13347 = vmatmul.mubr.f32.vlgmr.msra.gmra.mrb[14].mxu1 %v15903_v29 }
 0x43f   : > { %14027 = vmatpush3.bf16.msra.mxu1 %v16036_v32  ;;  %13353 = vmatprep.mubr.msk.f32.mxu1 %vm14878_vm1, %v17419_v35  ;;  %v17481_v7 = vld [vmem:[#allocation36_spill] sm:$0xff] }
 0x440   : > { %14028 = vmatprep.subr.bf16.mxu1 %v17409_v54 }
 0x446   : > { %13354 = vmatmul.mubr.f32.vlgmr.msra.gmra.mrb[14].mxu1 %v15903_v29 }
 0x447   : > { %14030 = vmatpush3.bf16.msra.mxu1 %v16057_v62  ;;  %13360 = vmatprep.mubr.msk.f32.mxu1 %vm14878_vm1, %v17419_v35 }
 0x448   : > { %14031 = vmatprep.subr.bf16.mxu1 %v17409_v54 }
 0x44a   : > { %13361 = vmatmul.mubr.f32.vlgmr.msra.gmra.mrb[16].mxu1 %v15920_v44 }
 0x44b   : > { %14033 = vmatpush3.bf16.msra.mxu1 %v17457_v4  ;;  %13367 = vmatprep.mubr.msk.f32.mxu1 %vm14878_vm1, %v17419_v35 }
 0x44c   : > { %14034 = vmatprep.subr.bf16.mxu1 %v17409_v54 }
 0x452   : > { %13368 = vmatmul.mubr.f32.vlgmr.msra.gmra.mrb[16].mxu1 %v15903_v29 }
 0x453   : > { %14036 = vmatpush3.bf16.msra.mxu1 %v17460_v2  ;;  %13374 = vmatprep.mubr.msk.f32.mxu1 %vm14878_vm1, %v17419_v35 }
 0x454   : > { %14037 = vmatprep.subr.bf16.mxu1 %v17409_v54 }
 0x45a   : > { %13375 = vmatmul.mubr.f32.vlgmr.msra.gmra.mrb[16].mxu1 %v15906_v33 }
 0x45b   : > { %14039 = vmatpush3.bf16.msra.mxu1 %v16057_v62  ;;  %13381 = vmatprep.mubr.msk.f32.mxu1 %vm14878_vm1, %v17419_v35 }
 0x45c   : > { %14040 = vmatprep.subr.bf16.mxu1 %v17409_v54 }
 0x462   : > { %13382 = vmatmul.mubr.f32.vlgmr.msra.gmra.mrb[16].mxu1 %v15909_v34 }
 0x463   : > { %14042 = vmatpush3.bf16.msra.mxu1 %v17461_v5  ;;  %13388 = vmatprep.mubr.msk.f32.mxu1 %vm14878_vm1, %v17419_v35 }
 0x464   : > { %14043 = vmatprep.subr.bf16.mxu1 %v17409_v54 }
 0x469   : > { %v16515_v43 = vpop.f32.mrb[6].mxu1 }
 0x46a   : > { %v13187_v25 = vpop.f32.mrb[7].mxu1  ;;  %13389 = vmatmul.mubr.f32.vlgmr.msra.gmra.mrb[16].mxu1 %v15903_v29  ;;  %v16686_v26 = vmul.f32 %v16515_v43, %v16515_v43 }
 0x46b   : > { %14045 = vmatpush3.bf16.msra.mxu1 %v16057_v62  ;;  %13395 = vmatprep.mubr.msk.f32.mxu1 %vm14878_vm1, %v17419_v35 }
 0x46c   : > { %14046 = vmatprep.subr.bf16.mxu1 %v17409_v54 }
 0x472   : > { %13396 = vmatmul.mubr.f32.vlgmr.msra.gmra.mrb[16].mxu1 %v15903_v29 }
 0x473   : > { %14048 = vmatpush3.bf16.msra.mxu1 %v17462_v30  ;;  %13402 = vmatprep.mubr.msk.f32.mxu1 %vm14878_vm1, %v17419_v35 }
 0x474   : > { %14049 = vmatprep.subr.bf16.mxu1 %v17409_v54 }
 0x476   : > { %13403 = vmatmul.mubr.f32.vlgmr.msra.gmra.mrb[18].mxu1 %v15920_v44 }
 0x477   : > { %14051 = vmatpush3.bf16.msra.mxu1 %v17463_v10  ;;  %13409 = vmatprep.mubr.msk.f32.mxu1 %vm14878_vm1, %v17419_v35  ;;  %v17484_v10 = vld [vmem:[#allocation41_spill] sm:$0xff] }
 0x478   : > { %14052 = vmatprep.subr.bf16.mxu1 %v17409_v54 }
 0x47e   : > { %13410 = vmatmul.mubr.f32.vlgmr.msra.gmra.mrb[18].mxu1 %v15903_v29 }
 0x47f   : > { %14054 = vmatpush3.bf16.msra.mxu1 %v17466_v31  ;;  %13416 = vmatprep.mubr.msk.f32.mxu1 %vm14878_vm1, %v17419_v35 }
 0x480   : > { %14055 = vmatprep.subr.bf16.mxu1 %v17409_v54 }
 0x486   : > { %13417 = vmatmul.mubr.f32.vlgmr.msra.gmra.mrb[18].mxu1 %v15906_v33 }
 0x487   : > { %14057 = vmatpush3.bf16.msra.mxu1 %v17462_v30  ;;  %13423 = vmatprep.mubr.msk.f32.mxu1 %vm14878_vm1, %v17419_v35 }
 0x488   : > { %14058 = vmatprep.subr.bf16.mxu1 %v17409_v54 }
 0x48e   : > { %13424 = vmatmul.mubr.f32.vlgmr.msra.gmra.mrb[18].mxu1 %v15909_v34 }
 0x48f   : > { %14060 = vmatpush3.bf16.msra.mxu1 %v17467_v12  ;;  %13430 = vmatprep.mubr.msk.f32.mxu1 %vm14878_vm1, %v17419_v35 }
 0x490   : > { %14061 = vmatprep.subr.bf16.mxu1 %v17409_v54 }
 0x495   : > { %v4897_v32 = vpop.f32.mrb[8].mxu1 }
 0x496   : > { %v16553_v55 = vmul.f32 %v4897_v32, %v4897_v32  ;;  %v16556_v22 = vmul.f32 %v4897_v32, %v16413_v58  ;;  %v13229_v62 = vpop.f32.mrb[9].mxu1  ;;  %13431 = vmatmul.mubr.f32.vlgmr.msra.gmra.mrb[18].mxu1 %v15903_v29  ;;  %v16641_v58 = vmul.f32 %v16481_v6, %v16481_v6 }
 0x497   : > { %14063 = vmatpush3.bf16.msra.mxu1 %v17462_v30  ;;  %13437 = vmatprep.mubr.msk.f32.mxu1 %vm14878_vm1, %v17419_v35  ;;  %v17489_v62 = vld [vmem:[#allocation59_spill] sm:$0xff] }
 0x498   : > { %v16564_v23 = vadd.f32 %v16553_v55, %v16551_v50  ;;  %14064 = vmatprep.subr.bf16.mxu1 %v17409_v54 }
 0x49e   : > { %13438 = vmatmul.mubr.f32.vlgmr.msra.gmra.mrb[18].mxu1 %v15903_v29 }
 0x49f   : > { %14066 = vmatpush3.bf16.msra.mxu1 %v17468_v18  ;;  %13444 = vmatprep.mubr.msk.f32.mxu1 %vm14878_vm1, %v17419_v35 }
 0x4a0   : > { %14067 = vmatprep.subr.bf16.mxu1 %v17409_v54 }
 0x4a2   : > { %13445 = vmatmul.mubr.f32.vlgmr.msra.gmra.mrb[20].mxu1 %v15920_v44 }
 0x4a3   : > { %14069 = vmatpush3.bf16.msra.mxu1 %v16135_v28  ;;  %13451 = vmatprep.mubr.msk.f32.mxu1 %vm14878_vm1, %v17419_v35  ;;  %v17472_v28 = vld [vmem:[#allocation29_spill] sm:$0xff] }
 0x4a4   : > { %14070 = vmatprep.subr.bf16.mxu1 %v17409_v54 }
 0x4aa   : > { %13452 = vmatmul.mubr.f32.vlgmr.msra.gmra.mrb[20].mxu1 %v15903_v29 }
 0x4ab   : > { %14072 = vmatpush3.bf16.msra.mxu1 %v17471_v56  ;;  %13458 = vmatprep.mubr.msk.f32.mxu1 %vm14878_vm1, %v17419_v35  ;;  %v17493_v56 = vpack.c.bf16 %v17491_v36, %v17492_v3  ;;  %v16877_v36 = vstv %s12015_s26 }
 0x4ac   : > { %14073 = vmatprep.subr.bf16.mxu1 %v17409_v54 }
 0x4b2   : > { %13459 = vmatmul.mubr.f32.vlgmr.msra.gmra.mrb[20].mxu1 %v15906_v33 }
 0x4b3   : > { %14075 = vmatpush3.bf16.msra.mxu1 %v17468_v18  ;;  %13465 = vmatprep.mubr.msk.f32.mxu1 %vm14878_vm1, %v17419_v35 }
 0x4b4   : > { %14076 = vmatprep.subr.bf16.mxu1 %v17409_v54 }
 0x4ba   : > { %13466 = vmatmul.mubr.f32.vlgmr.msra.gmra.mrb[20].mxu1 %v15909_v34 }
 0x4bb   : > { %14078 = vmatpush3.bf16.msra.mxu1 %v17472_v28  ;;  %13472 = vmatprep.mubr.msk.f32.mxu1 %vm14878_vm1, %v17419_v35  ;;  %v17494_v28 = vld [vmem:[#allocation38_spill] sm:$0xff] }
 0x4bc   : > { %14079 = vmatprep.subr.bf16.mxu1 %v17409_v54 }
 0x4c1   : > { %v5356_v39 = vpop.f32.mrb[10].mxu1 }
 0x4c2   : > { %v16598_v11 = vmul.f32 %v5356_v39, %v5356_v39  ;;  %v16601_v1 = vmul.f32 %v5356_v39, %v16447_v20  ;;  %v13271_v15 = vpop.f32.mrb[11].mxu1  ;;  %13473 = vmatmul.mubr.f32.vlgmr.msra.gmra.mrb[20].mxu1 %v15903_v29 }
 0x4c3   : > { %14081 = vmatpush3.bf16.msra.mxu1 %v17468_v18  ;;  %13479 = vmatprep.mubr.msk.f32.mxu1 %vm14878_vm1, %v17419_v35  ;;  %v17490_v18 = vld [vmem:[#allocation46_spill] sm:$0xff] }
 0x4c4   : > { %v16609_v53 = vadd.f32 %v16598_v11, %v16596_v9  ;;  %14082 = vmatprep.subr.bf16.mxu1 %v17409_v54 }
 0x4ca   : > { %13480 = vmatmul.mubr.f32.vlgmr.msra.gmra.mrb[20].mxu1 %v15903_v29 }
 0x4cb   : > { %14084 = vmatpush3.bf16.msra.mxu1 %v17473_v52  ;;  %13486 = vmatprep.mubr.msk.f32.mxu1 %vm14878_vm1, %v17419_v35 }
 0x4cc   : > { %14085 = vmatprep.subr.bf16.mxu1 %v17409_v54 }
 0x4ce   : > { %13487 = vmatmul.mubr.f32.vlgmr.msra.gmra.mrb[22].mxu1 %v15920_v44 }
 0x4cf   : > { %14087 = vmatpush3.bf16.msra.mxu1 %v17474_v57  ;;  %13493 = vmatprep.mubr.msk.f32.mxu1 %vm14878_vm1, %v17419_v35  ;;  %v17495_v57 = vld [vmem:[#allocation32_spill] sm:$0xff] }
 0x4d0   : > { %14088 = vmatprep.subr.bf16.mxu1 %v17409_v54 }
 0x4d6   : > { %13494 = vmatmul.mubr.f32.vlgmr.msra.gmra.mrb[22].mxu1 %v15903_v29 }
 0x4d7   : > { %14090 = vmatpush3.bf16.msra.mxu1 %v17477_v45  ;;  %13500 = vmatprep.mubr.msk.f32.mxu1 %vm14878_vm1, %v17419_v35  ;;  %v17498_v45 = vld [vmem:[#allocation34_spill] sm:$0xff] }
 0x4d8   : > { %14091 = vmatprep.subr.bf16.mxu1 %v17409_v54 }
 0x4de   : > { %13501 = vmatmul.mubr.f32.vlgmr.msra.gmra.mrb[22].mxu1 %v15906_v33 }
 0x4df   : > { %14093 = vmatpush3.bf16.msra.mxu1 %v17473_v52  ;;  %13507 = vmatprep.mubr.msk.f32.mxu1 %vm14878_vm1, %v17419_v35 }
 0x4e0   : > { %14094 = vmatprep.subr.bf16.mxu1 %v17409_v54 }
 0x4e6   : > { %13508 = vmatmul.mubr.f32.vlgmr.msra.gmra.mrb[22].mxu1 %v15909_v34 }
 0x4e7   : > { %14096 = vmatpush3.bf16.msra.mxu1 %v17478_v14  ;;  %13514 = vmatprep.mubr.msk.f32.mxu1 %vm14878_vm1, %v17419_v35  ;;  %v17499_v14 = vpack.c.bf16 %v17497_v42, %v17498_v45 }
 0x4e8   : > { %14097 = vmatprep.subr.bf16.mxu1 %v17409_v54 }
 0x4ed   : > { %v5815_v49 = vpop.f32.mrb[12].mxu1 }
 0x4ee   : > { %v16643_v13 = vmul.f32 %v5815_v49, %v5815_v49  ;;  %v16646_v60 = vmul.f32 %v5815_v49, %v16481_v6  ;;  %v13313_v20 = vpop.f32.mrb[13].mxu1  ;;  %13515 = vmatmul.mubr.f32.vlgmr.msra.gmra.mrb[22].mxu1 %v15903_v29  ;;  %v17480_v6 = vld [vmem:[#allocation33_spill] sm:$0xff]  ;;  %v17500_v49 = vld [vmem:[#allocation47_spill] sm:$0xff] }
 0x4ef   : > { %14099 = vmatpush3.bf16.msra.mxu1 %v17473_v52  ;;  %13521 = vmatprep.mubr.msk.f32.mxu1 %vm14878_vm1, %v17419_v35  ;;  %v17482_v4 = vpack.c.bf16 %v17480_v6, %v17481_v7  ;;  %v17501_v7 = vld [vmem:[#allocation42_spill] sm:$0xff] }
 0x4f0   : > { %v16654_v40 = vadd.f32 %v16643_v13, %v16641_v58  ;;  %14100 = vmatprep.subr.bf16.mxu1 %v17409_v54 }
 0x4f6   : > { %13522 = vmatmul.mubr.f32.vlgmr.msra.gmra.mrb[22].mxu1 %v15903_v29 }
 0x4f7   : > { %14102 = vmatpush3.bf16.msra.mxu1 %v17479_v46  ;;  %13528 = vmatprep.mubr.msk.f32.mxu1 %vm14878_vm1, %v17419_v35 }
 0x4f8   : > { %14103 = vmatprep.subr.bf16.mxu1 %v17409_v54 }
 0x4fa   : > { %13529 = vmatmul.mubr.f32.vlgmr.msra.gmra.mrb[24].mxu1 %v15920_v44 }
 0x4fb   : > { %14105 = vmatpush3.bf16.msra.mxu1 %v16172_v0  ;;  %13535 = vmatprep.mubr.msk.f32.mxu1 %vm14878_vm1, %v17419_v35  ;;  %v17483_v0 = vld [vmem:[#allocation49_spill] sm:$0xff] }
 0x4fc   : > { %14106 = vmatprep.subr.bf16.mxu1 %v17409_v54 }
 0x502   : > { %13536 = vmatmul.mubr.f32.vlgmr.msra.gmra.mrb[24].mxu1 %v15903_v29 }
 0x503   : > { %14108 = vmatpush3.bf16.msra.mxu1 %v17482_v4  ;;  %13542 = vmatprep.mubr.msk.f32.mxu1 %vm14878_vm1, %v17419_v35  ;;  %v17502_v4 = vld [vmem:[#allocation39_spill] sm:$0xff] }
 0x504   : > { %14109 = vmatprep.subr.bf16.mxu1 %v17409_v54 }
 0x50a   : > { %13543 = vmatmul.mubr.f32.vlgmr.msra.gmra.mrb[24].mxu1 %v15906_v33 }
 0x50b   : > { %14111 = vmatpush3.bf16.msra.mxu1 %v17479_v46  ;;  %13549 = vmatprep.mubr.msk.f32.mxu1 %vm14878_vm1, %v17419_v35 }
 0x50c   : > { %14112 = vmatprep.subr.bf16.mxu1 %v17409_v54 }
 0x512   : > { %13550 = vmatmul.mubr.f32.vlgmr.msra.gmra.mrb[24].mxu1 %v15909_v34 }
 0x513   : > { %14114 = vmatpush3.bf16.msra.mxu1 %v17483_v0  ;;  %13556 = vmatprep.mubr.msk.f32.mxu1 %vm14878_vm1, %v17419_v35  ;;  %v17503_v0 = vld [vmem:[#allocation43_spill] sm:$0xff] }
 0x514   : > { %14115 = vmatprep.subr.bf16.mxu1 %v17409_v54 }
 0x519   : > { %v6274_v59 = vpop.f32.mrb[14].mxu1 }
 0x51a   : > { %v16688_v2 = vmul.f32 %v6274_v59, %v6274_v59  ;;  %v16691_v5 = vmul.f32 %v6274_v59, %v16515_v43  ;;  %v13355_v25 = vpop.f32.mrb[15].mxu1  ;;  %13557 = vmatmul.mubr.f32.vlgmr.msra.gmra.mrb[24].mxu1 %v15903_v29  ;;  %v17485_v43 = vld [vmem:[#allocation40_spill] sm:$0xff]  ;;  %v17504_v59 = vpack.c.bf16 %v17502_v4, %v17503_v0 }
 0x51b   : > { %14117 = vmatpush3.bf16.msra.mxu1 %v17479_v46  ;;  %13563 = vmatprep.mubr.msk.f32.mxu1 %vm14878_vm1, %v17419_v35  ;;  %v17487_v48 = vpack.c.bf16 %v17485_v43, %v17486_v63  ;;  %v17506_v63 = vld [vmem:[#allocation50_spill] sm:$0xff] }
 0x51c   : > { %v16699_v30 = vadd.f32 %v16688_v2, %v16686_v26  ;;  %14118 = vmatprep.subr.bf16.mxu1 %v17409_v54 }
 0x522   : > { %13564 = vmatmul.mubr.f32.vlgmr.msra.gmra.mrb[24].mxu1 %v15903_v29 }
 0x523   : > { %14120 = vmatpush3.bf16.msra.mxu1 %v17484_v10  ;;  %13570 = vmatprep.mubr.msk.f32.mxu1 %vm14878_vm1, %v17419_v35 }
 0x524   : > { %14121 = vmatprep.subr.bf16.mxu1 %v17409_v54 }
 0x526   : > { %13571 = vmatmul.mubr.f32.vlgmr.msra.gmra.mrb[26].mxu1 %v15920_v44 }
 0x527   : > { %14123 = vmatpush3.bf16.msra.mxu1 %v16195_v61  ;;  %13577 = vmatprep.mubr.msk.f32.mxu1 %vm14878_vm1, %v17419_v35  ;;  %v17488_v61 = vld [vmem:[#allocation30_spill] sm:$0xff] }
 0x528   : > { %14124 = vmatprep.subr.bf16.mxu1 %v17409_v54 }
 0x52e   : > { %13578 = vmatmul.mubr.f32.vlgmr.msra.gmra.mrb[26].mxu1 %v15903_v29 }
 0x52f   : > { %14126 = vmatpush3.bf16.msra.mxu1 %v17487_v48  ;;  %13584 = vmatprep.mubr.msk.f32.mxu1 %vm14878_vm1, %v17419_v35  ;;  %v17507_v48 = vld [vmem:[#allocation48_spill] sm:$0xff] }
 0x530   : > { %14127 = vmatprep.subr.bf16.mxu1 %v17409_v54 }
 0x536   : > { %13585 = vmatmul.mubr.f32.vlgmr.msra.gmra.mrb[26].mxu1 %v15906_v33 }
 0x537   : > { %14129 = vmatpush3.bf16.msra.mxu1 %v17484_v10  ;;  %13591 = vmatprep.mubr.msk.f32.mxu1 %vm14878_vm1, %v17419_v35 }
 0x538   : > { %14130 = vmatprep.subr.bf16.mxu1 %v17409_v54 }
 0x53e   : > { %13592 = vmatmul.mubr.f32.vlgmr.msra.gmra.mrb[26].mxu1 %v15909_v34 }
 0x53f   : > { %14132 = vmatpush3.bf16.msra.mxu1 %v17488_v61  ;;  %13598 = vmatprep.mubr.msk.f32.mxu1 %vm14878_vm1, %v17419_v35  ;;  %v17508_v61 = vpack.c.bf16 %v17507_v48, %v16230_v24  ;;  %v11829_v48 = vmul.f32 2.0, %v16646_v60 }
 0x540   : > { %14133 = vmatprep.subr.bf16.mxu1 %v17409_v54 }
 0x545   : > { %v16729_v31 = vpop.f32.mrb[16].mxu1 }
 0x546   : > { %v11798_v12 = vsub.f32 %v16729_v31, %v16551_v50  ;;  %v13397_v32 = vpop.f32.mrb[17].mxu1  ;;  %13599 = vmatmul.mubr.f32.vlgmr.msra.gmra.mrb[26].mxu1 %v15903_v29  ;;  %v17511_v50 = vld [vmem:[#allocation54_spill] sm:$0xff] }
 0x547   : > { %14135 = vmatpush3.bf16.msra.mxu1 %v17484_v10  ;;  %13605 = vmatprep.mubr.msk.f32.mxu1 %vm14878_vm1, %v17419_v35 }
 0x548   : > { %14136 = vmatprep.subr.bf16.mxu1 %v17409_v54 }
 0x54e   : > { %13606 = vmatmul.mubr.f32.vlgmr.msra.gmra.mrb[26].mxu1 %v15903_v29 }
 0x54f   : > { %14138 = vmatpush3.bf16.msra.mxu1 %v17489_v62  ;;  %13612 = vmatprep.mubr.msk.f32.mxu1 %vm14878_vm1, %v17419_v35 }
 0x550   : > { %14139 = vmatprep.subr.bf16.mxu1 %v17409_v54 }
 0x552   : > { %13613 = vmatmul.mubr.f32.vlgmr.msra.gmra.mrb[28].mxu1 %v15920_v44 }
 0x553   : > { %14141 = vmatpush3.bf16.msra.mxu1 %v17490_v18  ;;  %13619 = vmatprep.mubr.msk.f32.mxu1 %vm14878_vm1, %v17419_v35  ;;  %v16875_v18 = vstv %s301_s9 }
 0x554   : > { %14142 = vmatprep.subr.bf16.mxu1 %v17409_v54 }
 0x55a   : > { %13620 = vmatmul.mubr.f32.vlgmr.msra.gmra.mrb[28].mxu1 %v15903_v29 }
 0x55b   : > { %14144 = vmatpush3.bf16.msra.mxu1 %v17493_v56  ;;  %13626 = vmatprep.mubr.msk.f32.mxu1 %vm14878_vm1, %v17419_v35 }
 0x55c   : > { %14145 = vmatprep.subr.bf16.mxu1 %v17409_v54 }
 0x562   : > { %13627 = vmatmul.mubr.f32.vlgmr.msra.gmra.mrb[28].mxu1 %v15906_v33 }
 0x563   : > { %14147 = vmatpush3.bf16.msra.mxu1 %v17489_v62  ;;  %13633 = vmatprep.mubr.msk.f32.mxu1 %vm14878_vm1, %v17419_v35 }
 0x564   : > { %14148 = vmatprep.subr.bf16.mxu1 %v17409_v54 }
 0x56a   : > { %13634 = vmatmul.mubr.f32.vlgmr.msra.gmra.mrb[28].mxu1 %v15909_v34 }
 0x56b   : > { %14150 = vmatpush3.bf16.msra.mxu1 %v17494_v28  ;;  %13640 = vmatprep.mubr.msk.f32.mxu1 %vm14878_vm1, %v17419_v35 }
 0x56c   : > { %14151 = vmatprep.subr.bf16.mxu1 %v17409_v54 }
 0x571   : > { %v16765_v39 = vpop.f32.mrb[18].mxu1 }
 0x572   : > { %v11799_v15 = vsub.f32 %v16765_v39, %v16596_v9  ;;  %v13439_v52 = vpop.f32.mrb[19].mxu1  ;;  %13641 = vmatmul.mubr.f32.vlgmr.msra.gmra.mrb[28].mxu1 %v15903_v29  ;;  %v11827_v39 = vmul.f32 2.0, %v16556_v22 }
 0x573   : > { %14153 = vmatpush3.bf16.msra.mxu1 %v17489_v62  ;;  %13647 = vmatprep.mubr.msk.f32.mxu1 %vm14878_vm1, %v17419_v35  ;;  %v17510_v52 = vld [vmem:[#allocation55_spill] sm:$0xff] }
 0x574   : > { %14154 = vmatprep.subr.bf16.mxu1 %v17409_v54  ;;  %v11832_v42 = vadd.f32 %v16875_v18, %v11827_v39 }
 0x57a   : > { %13648 = vmatmul.mubr.f32.vlgmr.msra.gmra.mrb[28].mxu1 %v15903_v29 }
 0x57b   : > { %14156 = vmatpush3.bf16.msra.mxu1 %v17495_v57  ;;  %13654 = vmatprep.mubr.msk.f32.mxu1 %vm14878_vm1, %v17419_v35 }
 0x57c   : > { %14157 = vmatprep.subr.bf16.mxu1 %v17409_v54 }
 0x57e   : > { %13655 = vmatmul.mubr.f32.vlgmr.msra.gmra.mrb[30].mxu1 %v15920_v44 }
 0x57f   : > { %14159 = vmatpush3.bf16.msra.mxu1 %v17496_v17  ;;  %13661 = vmatprep.mubr.msk.f32.mxu1 %vm14878_vm1, %v17419_v35  ;;  %v17513_v17 = vld [vmem:[#allocation57_spill] sm:$0xff] }
 0x580   : > { %14160 = vmatprep.subr.bf16.mxu1 %v17409_v54 }
 0x586   : > { %13662 = vmatmul.mubr.f32.vlgmr.msra.gmra.mrb[30].mxu1 %v15903_v29 }
 0x587   : > { %14162 = vmatpush3.bf16.msra.mxu1 %v17499_v14  ;;  %13668 = vmatprep.mubr.msk.f32.mxu1 %vm14878_vm1, %v17419_v35 }
 0x588   : > { %14163 = vmatprep.subr.bf16.mxu1 %v17409_v54 }
 0x58e   : > { %13669 = vmatmul.mubr.f32.vlgmr.msra.gmra.mrb[30].mxu1 %v15906_v33 }
 0x58f   : > { %14165 = vmatpush3.bf16.msra.mxu1 %v17495_v57  ;;  %13675 = vmatprep.mubr.msk.f32.mxu1 %vm14878_vm1, %v17419_v35 }
 0x590   : > { %14166 = vmatprep.subr.bf16.mxu1 %v17409_v54 }
 0x596   : > { %13676 = vmatmul.mubr.f32.vlgmr.msra.gmra.mrb[30].mxu1 %v15909_v34 }
 0x597   : > { %14168 = vmatpush3.bf16.msra.mxu1 %v17500_v49  ;;  %13682 = vmatprep.mubr.msk.f32.mxu1 %vm14878_vm1, %v17419_v35 }
 0x598   : > { %14169 = vmatprep.subr.bf16.mxu1 %v17409_v54 }
 0x59d   : > { %v16801_v20 = vpop.f32.mrb[20].mxu1 }
 0x59e   : > { %v11800_v46 = vsub.f32 %v16801_v20, %v16641_v58  ;;  %v13481_v6 = vpop.f32.mrb[21].mxu1  ;;  %13683 = vmatmul.mubr.f32.vlgmr.msra.gmra.mrb[30].mxu1 %v15903_v29  ;;  %v11828_v20 = vmul.f32 2.0, %v16601_v1 }
 0x59f   : > { %14171 = vmatpush3.bf16.msra.mxu1 %v17495_v57  ;;  %13689 = vmatprep.mubr.msk.f32.mxu1 %vm14878_vm1, %v17419_v35 }
 0x5a0   : > { %14172 = vmatprep.subr.bf16.mxu1 %v17409_v54  ;;  %v11833_v4 = vadd.f32 %v16875_v18, %v11828_v20 }
 0x5a6   : > { %13690 = vmatmul.mubr.f32.vlgmr.msra.gmra.mrb[30].mxu1 %v15903_v29 }
 0x5a7   : > { %14174 = vmatpush3.bf16.msra.mxu1 %v17501_v7  ;;  %13696 = vmatprep.mubr.msk.f32.mxu1 %vm14878_vm1, %v17419_v35 }
 0x5a8   : > { %14175 = vmatprep.subr.bf16.mxu1 %v17409_v54 }
 0x5aa   : > { %13697 = vmatmul.mubr.f32.vlgmr.msra.gmra.mrb[32].mxu1 %v15920_v44 }
 0x5ab   : > { %14177 = vmatpush3.bf16.msra.mxu1 %v16248_v21  ;;  %13703 = vmatprep.mubr.msk.f32.mxu1 %vm14878_vm1, %v17419_v35  ;;  %v17505_v21 = vld [vmem:[#allocation53_spill] sm:$0xff] }
 0x5ac   : > { %14178 = vmatprep.subr.bf16.mxu1 %v17409_v54 }
 0x5b2   : > { %13704 = vmatmul.mubr.f32.vlgmr.msra.gmra.mrb[32].mxu1 %v15903_v29 }
 0x5b3   : > { %14180 = vmatpush3.bf16.msra.mxu1 %v17504_v59  ;;  %13710 = vmatprep.mubr.msk.f32.mxu1 %vm14878_vm1, %v17419_v35 }
 0x5b4   : > { %14181 = vmatprep.subr.bf16.mxu1 %v17409_v54 }
 0x5ba   : > { %13711 = vmatmul.mubr.f32.vlgmr.msra.gmra.mrb[32].mxu1 %v15906_v33 }
 0x5bb   : > { %14183 = vmatpush3.bf16.msra.mxu1 %v17501_v7  ;;  %13717 = vmatprep.mubr.msk.f32.mxu1 %vm14878_vm1, %v17419_v35 }
 0x5bc   : > { %14184 = vmatprep.subr.bf16.mxu1 %v17409_v54 }
 0x5c2   : > { %13718 = vmatmul.mubr.f32.vlgmr.msra.gmra.mrb[32].mxu1 %v15909_v34 }
 0x5c3   : > { %14186 = vmatpush3.bf16.msra.mxu1 %v17505_v21  ;;  %13724 = vmatprep.mubr.msk.f32.mxu1 %vm14878_vm1, %v17419_v35 }
 0x5c4   : > { %14187 = vmatprep.subr.bf16.mxu1 %v17409_v54 }
 0x5c9   : > { %v16837_v25 = vpop.f32.mrb[22].mxu1 }
 0x5ca   : > { %v11801_v10 = vsub.f32 %v16837_v25, %v16686_v26  ;;  %v13523_v43 = vpop.f32.mrb[23].mxu1  ;;  %13725 = vmatmul.mubr.f32.vlgmr.msra.gmra.mrb[32].mxu1 %v15903_v29 }
 0x5cb   : > { %14189 = vmatpush3.bf16.msra.mxu1 %v17501_v7  ;;  %13731 = vmatprep.mubr.msk.f32.mxu1 %vm14878_vm1, %v17419_v35 }
 0x5cc   : > { %14190 = vmatprep.subr.bf16.mxu1 %v17409_v54 }
 0x5d2   : > { %13732 = vmatmul.mubr.f32.vlgmr.msra.gmra.mrb[32].mxu1 %v15903_v29 }
 0x5d3   : > { %14192 = vmatpush3.bf16.msra.mxu1 %v17506_v63  ;;  %13738 = vmatprep.mubr.msk.f32.mxu1 %vm14878_vm1, %v17419_v35 }
 0x5d4   : > { %14193 = vmatprep.subr.bf16.mxu1 %v17409_v54 }
 0x5d6   : > { %13739 = vmatmul.mubr.f32.vlgmr.msra.gmra.mrb[34].mxu1 %v15920_v44 }
 0x5d7   : > { %14195 = vmatpush3.bf16.msra.mxu1 %v16269_v16  ;;  %13745 = vmatprep.mubr.msk.f32.mxu1 %vm14878_vm1, %v17419_v35  ;;  %v17509_v16 = vld [vmem:[#allocation56_spill] sm:$0xff] }
 0x5d8   : > { %14196 = vmatprep.subr.bf16.mxu1 %v17409_v54 }
 0x5de   : > { %13746 = vmatmul.mubr.f32.vlgmr.msra.gmra.mrb[34].mxu1 %v15903_v29 }
 0x5df   : > { %14198 = vmatpush3.bf16.msra.mxu1 %v17508_v61  ;;  %13752 = vmatprep.mubr.msk.f32.mxu1 %vm14878_vm1, %v17419_v35 }
 0x5e0   : > { %14199 = vmatprep.subr.bf16.mxu1 %v17409_v54 }
 0x5e6   : > { %13753 = vmatmul.mubr.f32.vlgmr.msra.gmra.mrb[34].mxu1 %v15906_v33 }
 0x5e7   : > { %14201 = vmatpush3.bf16.msra.mxu1 %v17506_v63  ;;  %13759 = vmatprep.mubr.msk.f32.mxu1 %vm14878_vm1, %v17419_v35 }
 0x5e8   : > { %14202 = vmatprep.subr.bf16.mxu1 %v17409_v54 }
 0x5ee   : > { %13760 = vmatmul.mubr.f32.vlgmr.msra.gmra.mrb[34].mxu1 %v15909_v34 }
 0x5ef   : > { %14204 = vmatpush3.bf16.msra.mxu1 %v17509_v16  ;;  %13766 = vmatprep.mubr.msk.f32.mxu1 %vm14878_vm1, %v17419_v35 }
 0x5f0   : > { %14205 = vmatprep.subr.bf16.mxu1 %v17409_v54 }
 0x5f5   : > { %v8569_v24 = vpop.f32.mrb[24].mxu1 }
 0x5f6   : > { %v11802_v32 = vsub.f32 %v8569_v24, %v16553_v55  ;;  %v13565_v62 = vpop.f32.mrb[25].mxu1  ;;  %13767 = vmatmul.mubr.f32.vlgmr.msra.gmra.mrb[34].mxu1 %v15903_v29  ;;  %v11844_v55 = vadd.f32 %v16564_v23, %v16875_v18  ;;  %v17512_v23 = vpack.c.bf16 %v17511_v50, %v16246_v47  ;;  %v11834_v24 = vadd.f32 %v16875_v18, %v11829_v48 }
 0x5f7   : > { %14207 = vmatpush3.bf16.msra.mxu1 %v17506_v63  ;;  %13773 = vmatprep.mubr.msk.f32.mxu1 %vm14878_vm1, %v17419_v35  ;;  %v11830_v50 = vmul.f32 2.0, %v16691_v5 }
 0x5f8   : > { %v11819_v3 = vadd.f32 %v11802_v32, %v11798_v12  ;;  %14208 = vmatprep.subr.bf16.mxu1 %v17409_v54  ;;  %v11845_v12 = vadd.f32 %v16609_v53, %v16875_v18  ;;  %v11847_v53 = vadd.f32 %v16699_v30, %v16875_v18 }
 0x5fa   : > { %v11823_v56 = vadd.f32 %v11819_v3, %v16877_v36 }
 0x5fc   : > { %v16889_v28 = vmul.f32 %v11844_v55, %v11823_v56 }
 0x5fe   : > { %13774 = vmatmul.mubr.f32.vlgmr.msra.gmra.mrb[34].mxu1 %v15903_v29  ;;  %14713 = vrcp.f32 %v16889_v28 }
 0x5ff   : > { %14210 = vmatpush3.bf16.msra.mxu1 %v17510_v52  ;;  %13780 = vmatprep.mubr.msk.f32.mxu1 %vm14878_vm1, %v17419_v35 }
 0x600   : > { %14211 = vmatprep.subr.bf16.mxu1 %v17409_v54 }
 0x602   : > { %13781 = vmatmul.mubr.f32.vlgmr.msra.gmra.mrb[36].mxu1 %v15920_v44 }
 0x603   : > { %14213 = vmatpush3.bf16.msra.mxu1 %v16281_v19  ;;  %13787 = vmatprep.mubr.msk.f32.mxu1 %vm14878_vm1, %v17419_v35 }
 0x604   : > { %14214 = vmatprep.subr.bf16.mxu1 %v17409_v54 }
 0x608   : > { %v14714_v14 = vpop.eup %14713 }
 0x60a   : > { %13788 = vmatmul.mubr.f32.vlgmr.msra.gmra.mrb[36].mxu1 %v15903_v29 }
 0x60b   : > { %14216 = vmatpush3.bf16.msra.mxu1 %v17512_v23  ;;  %13794 = vmatprep.mubr.msk.f32.mxu1 %vm14878_vm1, %v17419_v35 }
 0x60c   : > { %14217 = vmatprep.subr.bf16.mxu1 %v17409_v54 }
 0x612   : > { %13795 = vmatmul.mubr.f32.vlgmr.msra.gmra.mrb[36].mxu1 %v15906_v33 }
 0x613   : > { %14219 = vmatpush3.bf16.msra.mxu1 %v17510_v52  ;;  %13801 = vmatprep.mubr.msk.f32.mxu1 %vm14878_vm1, %v17419_v35 }
 0x614   : > { %14220 = vmatprep.subr.bf16.mxu1 %v17409_v54 }
 0x61a   : > { %13802 = vmatmul.mubr.f32.vlgmr.msra.gmra.mrb[36].mxu1 %v15909_v34 }
 0x61b   : > { %14222 = vmatpush3.bf16.msra.mxu1 %v16272_v38  ;;  %13808 = vmatprep.mubr.msk.f32.mxu1 %vm14878_vm1, %v17419_v35 }
 0x61c   : > { %14223 = vmatprep.subr.bf16.mxu1 %v17409_v54 }
 0x621   : > { %v9028_v47 = vpop.f32.mrb[26].mxu1 }
 0x622   : > { %v11803_v19 = vsub.f32 %v9028_v47, %v16598_v11  ;;  %v13607_v31 = vpop.f32.mrb[27].mxu1  ;;  %13809 = vmatmul.mubr.f32.vlgmr.msra.gmra.mrb[36].mxu1 %v15903_v29 }
 0x623   : > { %14225 = vmatpush3.bf16.msra.mxu1 %v17510_v52  ;;  %13815 = vmatprep.mubr.msk.f32.mxu1 %vm14878_vm1, %v17419_v35 }
 0x624   : > { %v11820_v38 = vadd.f32 %v11803_v19, %v11799_v15  ;;  %14226 = vmatprep.subr.bf16.mxu1 %v17409_v54  ;;  %v11835_v19 = vadd.f32 %v16875_v18, %v11830_v50 }
 0x626   : > { %v11824_v57 = vadd.f32 %v11820_v38, %v16877_v36 }
 0x628   : > { %v11849_v11 = vmul.f32 %v11845_v12, %v11824_v57 }
 0x62a   : > { %13816 = vmatmul.mubr.f32.vlgmr.msra.gmra.mrb[36].mxu1 %v15903_v29  ;;  %14715 = vrcp.f32 %v11849_v11 }
 0x62b   : > { %14228 = vmatpush3.bf16.msra.mxu1 %v17513_v17  ;;  %13822 = vmatprep.mubr.msk.f32.mxu1 %vm14878_vm1, %v17419_v35 }
 0x62c   : > { %14229 = vmatprep.subr.bf16.mxu1 %v17409_v54 }
 0x62e   : > { %13823 = vmatmul.mubr.f32.vlgmr.msra.gmra.mrb[38].mxu1 %v15920_v44 }
 0x62f   : > { %14231 = vmatpush3.bf16.msra.mxu1 %v16288_v27  ;;  %13829 = vmatprep.mubr.msk.f32.mxu1 %vm14878_vm1, %v17419_v35 }
 0x630   : > { %14232 = vmatprep.subr.bf16.mxu1 %v17409_v54 }
 0x634   : > { %v14716_v59 = vpop.eup %14715 }
 0x636   : > { %13830 = vmatmul.mubr.f32.vlgmr.msra.gmra.mrb[38].mxu1 %v15903_v29 }
 0x637   : > { %14234 = vmatpush3.bf16.msra.mxu1 %v14233_v51  ;;  %13836 = vmatprep.mubr.msk.f32.mxu1 %vm14878_vm1, %v17419_v35 }
 0x638   : > { %14235 = vmatprep.subr.bf16.mxu1 %v17409_v54 }
 0x63e   : > { %13837 = vmatmul.mubr.f32.vlgmr.msra.gmra.mrb[38].mxu1 %v15906_v33 }
 0x63f   : > { %14237 = vmatpush3.bf16.msra.mxu1 %v17513_v17  ;;  %13843 = vmatprep.mubr.msk.f32.mxu1 %vm14878_vm1, %v17419_v35 }
 0x640   : > { %14238 = vmatprep.subr.bf16.mxu1 %v17409_v54 }
 0x646   : > { %13844 = vmatmul.mubr.f32.vlgmr.msra.gmra.mrb[38].mxu1 %v15909_v34 }
 0x647   : > { %14240 = vmatpush3.bf16.msra.mxu1 %v16279_v37  ;;  %13850 = vmatprep.mubr.msk.f32.mxu1 %vm14878_vm1, %v17419_v35  ;;  %v11846_v37 = vadd.f32 %v16654_v40, %v16875_v18 }
 0x648   : > { %14241 = vmatprep.subr.bf16.mxu1 %v17409_v54 }
 0x64d   : > { %v9487_v44 = vpop.f32.mrb[28].mxu1 }
 0x64e   : > { %v11804_v8 = vsub.f32 %v9487_v44, %v16643_v13  ;;  %v13649_v33 = vpop.f32.mrb[29].mxu1  ;;  %13851 = vmatmul.mubr.f32.vlgmr.msra.gmra.mrb[38].mxu1 %v15903_v29 }
 0x64f   : > { %14243 = vmatpush3.bf16.msra.mxu1 %v17513_v17  ;;  %13857 = vmatprep.mubr.msk.f32.mxu1 %vm14878_vm1, %v17419_v35 }
 0x650   : > { %v11821_v34 = vadd.f32 %v11804_v8, %v11800_v46 }
 0x652   : > { %v11825_v54 = vadd.f32 %v11821_v34, %v16877_v36 }
 0x654   : > { %v11850_v41 = vmul.f32 %v11846_v37, %v11825_v54 }
 0x656   : > { %13858 = vmatmul.mubr.f32.vlgmr.msra.gmra.mrb[38].mxu1 %v15903_v29  ;;  %14717 = vrcp.f32 %v11850_v41 }
 0x660   : > { %v14718_v3 = vpop.eup %14717 }
 0x679   : > { %v9946_v51 = vpop.f32.mrb[30].mxu1 }
 0x67a   : > { %v11805_v27 = vsub.f32 %v9946_v51, %v16688_v2  ;;  %v13691_v9 = vpop.f32.mrb[31].mxu1 }
 0x67c   : > { %v11822_v35 = vadd.f32 %v11805_v27, %v11801_v10 }
 0x67e   : > { %v11826_v58 = vadd.f32 %v11822_v35, %v16877_v36 }
 0x680   : > { %v11851_v13 = vmul.f32 %v11847_v53, %v11826_v58 }
 0x682   : > { %14719 = vrcp.f32 %v11851_v13 }
 0x68c   : > { %v14720_v12 = vpop.eup %14719 }
 0x6a5   : > { %v10405_v40 = vpop.f32.mrb[32].mxu1 }
 0x6a6   : > { %v11806_v29 = vsub.f32 %v10405_v40, %v16556_v22  ;;  %v13733_v15 = vpop.f32.mrb[33].mxu1 }
 0x6a8   : > { %v11810_v2 = vmul.f32 2.0, %v11806_v29 }
 0x6aa   : > { %v11815_v26 = vadd.f32 %v16877_v36, %v11810_v2 }
 0x6ac   : > { %v11836_v45 = vmul.f32 %v11832_v42, %v11815_v26 }
 0x6ae   : > { %v11856_v49 = vmul.f32 %v14714_v14, %v11836_v45 }
 0x6b0   : > { %v11861_v25 = vsel %vm11860_vm2, %v11856_v49, 0.0 }
 0x6d1   : > { %v10864_v30 = vpop.f32.mrb[34].mxu1 }
 0x6d2   : > { %v11807_v46 = vsub.f32 %v10864_v30, %v16601_v1  ;;  %v13775_v6 = vpop.f32.mrb[35].mxu1 }
 0x6d4   : > { %v11811_v7 = vmul.f32 2.0, %v11807_v46 }
 0x6d6   : > { %v11816_v22 = vadd.f32 %v16877_v36, %v11811_v7 }
 0x6d8   : > { %v11837_v0 = vmul.f32 %v11833_v4, %v11816_v22 }
 0x6da   : > { %v11857_v21 = vmul.f32 %v14716_v59, %v11837_v0 }
 0x6dc   : > { %v11862_v10 = vsel %vm11860_vm2, %v11857_v21, 0.0 }
 0x6dd   : > { %v11863_v43 = vadd.f32 %v11862_v10, %v11861_v25 }
 0x6fd   : > { %v11323_v63 = vpop.f32.mrb[36].mxu1 }
 0x6fe   : > { %v11808_v1 = vsub.f32 %v11323_v63, %v16646_v60  ;;  %v13817_v61 = vpop.f32.mrb[37].mxu1 }
 0x700   : > { %v11812_v16 = vmul.f32 2.0, %v11808_v1 }
 0x702   : > { %v11817_v32 = vadd.f32 %v16877_v36, %v11812_v16 }
 0x704   : > { %v11838_v62 = vmul.f32 %v11834_v24, %v11817_v32 }
 0x706   : > { %v11858_v55 = vmul.f32 %v14718_v3, %v11838_v62 }
 0x708   : > { %v11864_v56 = vsel %vm11860_vm2, %v11858_v55, 0.0 }
 0x709   : > { %v11865_v28 = vadd.f32 %v11864_v56, %v11863_v43 }
 0x729   : > { %v11782_v52 = vpop.f32.mrb[38].mxu1 }
 0x72a   : > { %v11809_v23 = vsub.f32 %v11782_v52, %v16691_v5  ;;  %v13859_v47 = vpop.f32.mrb[39].mxu1 }
 0x72c   : > { %v11813_v60 = vmul.f32 2.0, %v11809_v23 }
 0x72e   : > { %v11818_v31 = vadd.f32 %v16877_v36, %v11813_v60 }
 0x730   : > { %v11839_v38 = vmul.f32 %v11835_v19, %v11818_v31 }
 0x732   : > { %v11859_v57 = vmul.f32 %v14720_v12, %v11839_v38 }
 0x734   : > { %v11866_v11 = vsel %vm11860_vm2, %v11859_v57, 0.0 }
 0x735   : > { %v11867_v17 = vadd.f32 %v11866_v11, %v11865_v28 }
 0x737   : > { %11868 = vadd.xlane.f32.xlu0 %v11867_v17 }
 0x7c4   : > { %v11869_v44 = vpop.xlane.xlu0 %11868 }
 0x7c5   : > { %v11870_v8 = vrot.slane %v11869_v44, 4 }
 0x7c7   : > { %v11871_v33 = vadd.f32 %v11870_v8, %v11869_v44 }
 0x7c9   : > { %v11872_v5 = vrot.slane %v11871_v33, 2 }
 0x7cb   : > { %v11873_v34 = vadd.f32 %v11872_v5, %v11871_v33 }
 0x7cd   : > { %v11874_v37 = vrot.slane %v11873_v34, 1 }
 0x7cf   : > { %v11875_v18 = vadd.f32 %v11874_v37, %v11873_v34 }
 0x7d1   : > { %14644 = vpush %v11875_v18 }
 0x802   : > { %s14645_s13 = spop %14644 }
 0x803   : > { %v11877_v36 = vstv %s14645_s13 }
 0x804   : > { %11878 = vst [vmem:[%s298_s28] sm:$0xff] %v11877_v36 }
 0x805   : > { %14809 = shalt.err (!%p14806_p12)
}
 0x806   : > { %s14810_s1 = scalar_lea.hbm %s17004_s0, 128  ;;  %s14814_s17 = scalar_lea.hbm %s17051_s5, 256 }
 0x807   : > { %p14811_p9 = scmp.ne.s32.totalorder %s17004_s0, %s14810_s1  ;;  %p14815_p5 = scmp.lt.u32.totalorder %s17004_s0, %s17051_s5 }
 0x808   : > { %p14816_p8 = scmp.lt.u32.totalorder %s14814_s17, %s14810_s1  ;;  %p14818_p13 = scmp.lt.u32.totalorder %s14810_s1, %s17004_s0 }
 0x809   : > { %p14812_p10 = pnand %p14811_p9, %p17514_p4 }
 0x80a   : > { %p14817_p3 = por %p14816_p8, %p14815_p5 }
 0x80b   : > { %p14813_p1 = pneg %p14812_p10 }
 0x80c   : > { %p14819_p11 = por %p14818_p13, %p14817_p3 }
 0x80e   : > { %p14820_p0 = pnand %p14819_p11, %p14813_p1 }
 0x810   : > { %14823 = shalt.err (!%p14820_p0)
}
 0x811   : > { %14654 = dma.vmem_to_hbm [thread:$0]  (%p17514_p4), %s16999_s15, 128, %s17004_s0, %s11880_s7  }
 0x812 PF: > { %s11905_s14 = sand.u32 1, %s14858_s18   ;;  %p17515_p2 = scmp.ne.s32.totalorder %s17227_s6, 0 }
 0x813   : > { %p17516_p7 = scmp.ge.s32.totalorder %s14870_s21, 2  ;;  %s11906_s28 = scalar_lea.sflag [#allocation4], %s11905_s14 }
 0x815   : > { %p14668_p6 = pnand %p17516_p7, %p17515_p2 }
 0x817   : > { %14853 = dma.done.wait (!%p14668_p6), %s11906_s28, 128  }
 0x818   : > { %14855 = vsyncadd (!%p14668_p6), %s11906_s28, 4294967168  ;;  %p22_p12 = scmp.ge.s32.totalorder %s14936_s24, 4   ;;  %s17517_s18 = smov %s14862_s19 }
 0x819   : > { %s17518_s19 = smov %s14866_s20  ;;  %s17519_s20 = smov %s14948_s27 }
 0x81a   : > { %s17520_s21 = smov %s14936_s24  ;;  %24 = sbr.rel (!%p22_p12) target bundleno = 11 (0xb), region = 103 }
 0x821   :  { %11911 = vsyncpa [#allocation3], 1 }
 0x822   :  { %11913 = vsyncpa [#allocation3 + $0x1], 1 }
 0x823   :  { %11914 = vsyncpa [#allocation8], 1 }
 0x824   :  { %11916 = vsyncpa [#allocation8 + $0x1], 1 }
 0x825   :  { %11917 = vsyncpa [#allocation4], 1 }
 0x826   :  { %11919 = vsyncpa [#allocation4 + $0x1], 1 }
 0x827   :  { %11920 = vsyncpa [#allocation5], 1 }
 0x828   :  { %11922 = vsyncpa [#allocation5 + $0x1], 1 }

</bundles_post_ra>
